<compile_context>
chip_gen: v7x
topology: tpu7x:2x2x1
jax: 0.10.0
libtpu: 0.0.40
codegen_flags: <defaults>
</compile_context>

<pallas_src>
import functools
import math

import jax
import jax.numpy as jnp
from jax import lax
from jax.experimental import pallas as pl
from jax.experimental.pallas import tpu as pltpu

_NEG = -1e30  # bias value for padded logit lanes (exp -> 0 under softmax)


# ----------------------------- fused Pallas kernel -------------------------- #

def _fused_kernel(x_ref, y_ref, m1_ref, b1r_ref, m2_ref, b2r_ref,
                  w1p_ref, fb1_ref, fw2_ref, fb2_ref, fw3_ref, fb3_ref,
                  out_ref, c1p_ref, h1_ref, *, probabilities):
    bt = x_ref.shape[0]
    f32 = jnp.float32
    bf16 = jnp.bfloat16

    def encode(img_ref):
        """Conv(1->6,5) + pool + ReLU + Conv(6->16,5) + (ow-pooled) output.

        Returns (bt, 8, 64) = [b, oh2, (c2, ow2//2)]; the oh2 2x2-pooling,
        conv2 bias and ReLU are fused into the classifier loop below.
        """
        # ---- conv1: 5 banded matmuls, one per kernel row ky ----------------
        acc = jnp.zeros((bt * 24, 144), f32)
        for ky in range(5):
            rows = img_ref[:, pl.ds(ky, 24), :]            # (bt, 24, 28)
            rows = rows.reshape(bt * 24, 28).astype(bf16)  # aligned leading merge
            acc = acc + jnp.dot(rows, m1_ref[ky], preferred_element_type=f32)
        # columns = parity*72 + c1*12 + ow//2  ->  ow-pool = max of the halves
        pw = jnp.maximum(acc[:, :72], acc[:, 72:144])      # (bt*24, 72)
        c1p_ref[...] = pw.reshape(bt, 24, 72)
        even = c1p_ref[:, pl.ds(0, 12, 2), :]              # oh = 0,2,...,22
        odd = c1p_ref[:, pl.ds(1, 12, 2), :]               # oh = 1,3,...,23
        h1 = jnp.maximum(jnp.maximum(even, odd) + b1r_ref[...], 0.0)
        h1_ref[...] = h1                                   # (bt, 12, 72)

        # ---- conv2: same banded-matmul trick on the pooled map -------------
        acc2 = jnp.zeros((bt * 8, 128), f32)
        for ky in range(5):
            rows = h1_ref[:, pl.ds(ky, 8), :]              # (bt, 8, 72)
            rows = rows.reshape(bt * 8, 72).astype(bf16)
            acc2 = acc2 + jnp.dot(rows, m2_ref[ky], preferred_element_type=f32)
        # columns = parity*64 + c2*4 + ow2//2  ->  ow-pool = max of the halves
        pw2 = jnp.maximum(acc2[:, :64], acc2[:, 64:128])   # (bt*8, 64)
        return pw2.reshape(bt, 8, 64)

    cx = encode(x_ref)
    cy = encode(y_ref)

    # oh2 pooling + bias + ReLU + (x + y) feature add + FC1, fused per row pair
    b2r = b2r_ref[...]                                     # (1, 64)
    zacc = jnp.zeros((bt, 128), f32)
    for i2 in range(4):
        fx_i = jnp.maximum(
            jnp.maximum(cx[:, 2 * i2, :], cx[:, 2 * i2 + 1, :]) + b2r, 0.0)
        fy_i = jnp.maximum(
            jnp.maximum(cy[:, 2 * i2, :], cy[:, 2 * i2 + 1, :]) + b2r, 0.0)
        f_i = (fx_i + fy_i).astype(bf16)                   # (bt, 64)
        zacc = zacc + jnp.dot(f_i, w1p_ref[i2], preferred_element_type=f32)
    z1 = jnp.maximum(zacc + fb1_ref[...], 0.0)             # (bt, 128), pads = 0
    z2 = jnp.maximum(
        jnp.dot(z1.astype(bf16), fw2_ref[...], preferred_element_type=f32)
        + fb2_ref[...], 0.0)
    z3 = (jnp.dot(z2.astype(bf16), fw3_ref[...], preferred_element_type=f32)
          + fb3_ref[...])                                  # pads = -1e30

    if probabilities:
        m = jnp.max(z3, axis=-1, keepdims=True)
        e = jnp.exp(z3 - m)
        s = jnp.sum(e, axis=-1, keepdims=True)
        z3 = e * pl.reciprocal(s, approx=True)

    out_ref[...] = z3                                      # lane-dense (bt, 128)


# ---------------------- wrapper-side weight preprocessing ------------------- #

def _prepare_operands(p):
    """Torch-layout params -> banded / lane-padded kernel operands."""
    f32, bf16 = jnp.float32, jnp.bfloat16

    # conv1 -> M1[ky, w, parity*72 + c*12 + j] = W1[c, 0, ky, w - (2j+parity)]
    w1 = p["conv1_w"].astype(f32)                           # (6, 1, 5, 5)
    u1 = (jnp.arange(28)[:, None, None]
          == jnp.arange(24)[None, :, None] + jnp.arange(5)[None, None, :]
          ).astype(f32)                                     # (28, 24, 5)
    m1 = jnp.einsum("wok,cyk->ywoc", u1, w1[:, 0])          # (5, 28, 24, 6)
    m1 = m1.reshape(5, 28, 12, 2, 6).transpose(0, 1, 3, 4, 2).reshape(5, 28, 144)
    b1r = jnp.repeat(p["conv1_b"].astype(f32), 12)[None, :]  # (1, 72)

    # conv2 -> M2[ky, ci*12 + x1, parity*64 + c2*4 + j2]
    w2 = p["conv2_w"].astype(f32)                           # (16, 6, 5, 5)
    u2 = (jnp.arange(12)[:, None, None]
          == jnp.arange(8)[None, :, None] + jnp.arange(5)[None, None, :]
          ).astype(f32)                                     # (12, 8, 5)
    m2 = jnp.einsum("xok,cdyk->ydxoc", u2, w2)              # (5, 6, 12, 8, 16)
    m2 = (m2.reshape(5, 72, 8, 16).reshape(5, 72, 4, 2, 16)
          .transpose(0, 1, 3, 4, 2).reshape(5, 72, 128))
    b2r = jnp.repeat(p["conv2_b"].astype(f32), 4)[None, :]  # (1, 64)

    # FC1: torch flatten order is (c2, oh2/2, ow2/2); split per oh2/2 (=i2) so the
    # kernel never has to flatten (bt, 4, 64) -> (bt, 256).
    fw1 = p["fc1_w"].astype(f32).reshape(120, 16, 4, 4)     # (n, c2, i2, j2)
    w1p = fw1.transpose(2, 1, 3, 0).reshape(4, 64, 120)     # (i2, c2*4+j2, n)
    w1p = jnp.pad(w1p, ((0, 0), (0, 0), (0, 8)))            # pad n -> 128
    fb1 = jnp.pad(p["fc1_b"].astype(f32), (0, 8))[None, :]

    fw2 = jnp.pad(p["fc2_w"].astype(f32).T, ((0, 8), (0, 44)))     # (128, 128)
    fb2 = jnp.pad(p["fc2_b"].astype(f32), (0, 44))[None, :]
    fw3 = jnp.pad(p["fc3_w"].astype(f32).T, ((0, 44), (0, 109)))   # (128, 128)
    fb3 = jnp.pad(p["fc3_b"].astype(f32), (0, 109),
                  constant_values=_NEG)[None, :]

    return dict(m1=m1.astype(bf16), b1r=b1r, m2=m2.astype(bf16), b2r=b2r,
                w1p=w1p.astype(bf16), fb1=fb1, fw2=fw2.astype(bf16), fb2=fb2,
                fw3=fw3.astype(bf16), fb3=fb3)


# --------------------------------- forward ---------------------------------- #

def separate_baseline_forward(x, y, params, batched=True, probabilities=True,
                              block_b=None):
    if not batched:
        x = x[None]
        y = y[None]
    b = x.shape[0]
    x2 = x.reshape(b, 28, 28).astype(jnp.float32)
    y2 = y.reshape(b, 28, 28).astype(jnp.float32)

    ops = _prepare_operands(params)

    bt = block_b if block_b is not None else (32 if b >= 32 else 8)
    n_tiles = -(-b // bt)
    bpad = n_tiles * bt
    if bpad != b:
        x2 = jnp.pad(x2, ((0, bpad - b), (0, 0), (0, 0)))
        y2 = jnp.pad(y2, ((0, bpad - b), (0, 0), (0, 0)))

    out = pl.pallas_call(
        functools.partial(_fused_kernel, probabilities=probabilities),
        out_shape=jax.ShapeDtypeStruct((bpad, 128), jnp.float32),
        grid_spec=pltpu.PrefetchScalarGridSpec(
            num_scalar_prefetch=0,
            grid=(n_tiles,),
            in_specs=[
                pl.BlockSpec((bt, 28, 28), lambda i: (i, 0, 0)),   # x tile
                pl.BlockSpec((bt, 28, 28), lambda i: (i, 0, 0)),   # y tile
                pl.BlockSpec((5, 28, 144), lambda i: (0, 0, 0)),   # conv1 banded W
                pl.BlockSpec((1, 72), lambda i: (0, 0)),           # conv1 bias row
                pl.BlockSpec((5, 72, 128), lambda i: (0, 0, 0)),   # conv2 banded W
                pl.BlockSpec((1, 64), lambda i: (0, 0)),           # conv2 bias row
                pl.BlockSpec((4, 64, 128), lambda i: (0, 0, 0)),   # fc1 (split, padded)
                pl.BlockSpec((1, 128), lambda i: (0, 0)),          # fc1 bias
                pl.BlockSpec((128, 128), lambda i: (0, 0)),        # fc2
                pl.BlockSpec((1, 128), lambda i: (0, 0)),          # fc2 bias
                pl.BlockSpec((128, 128), lambda i: (0, 0)),        # fc3
                pl.BlockSpec((1, 128), lambda i: (0, 0)),          # fc3 bias (-1e30 pads)
            ],
            out_specs=pl.BlockSpec((bt, 128), lambda i: (i, 0)),
            scratch_shapes=[
                pltpu.VMEM((bt, 24, 72), jnp.float32),   # conv1, ow-pooled
                pltpu.VMEM((bt, 12, 72), jnp.float32),   # pool1+ReLU output
            ],
        ),
        compiler_params=pltpu.CompilerParams(
            dimension_semantics=("parallel",),          # megacore on v7x
            vmem_limit_bytes=32 * 1024 * 1024,
        ),
    )(x2, y2, ops["m1"], ops["b1r"], ops["m2"], ops["b2r"],
      ops["w1p"], ops["fb1"], ops["fw2"], ops["fb2"], ops["fw3"], ops["fb3"])

    out = out[:b, :19]
    if not batched:
        out = out[0]
    return out


# --------------------------- deterministic params --------------------------- #

def init_params(key):
    ks = jax.random.split(key, 10)

    def u(k, shape, fan_in):
        bound = 1.0 / math.sqrt(fan_in)
        return jax.random.uniform(k, shape, jnp.float32, -bound, bound)

    return {
        "conv1_w": u(ks[0], (6, 1, 5, 5), 25), "conv1_b": u(ks[1], (6,), 25),
        "conv2_w": u(ks[2], (16, 6, 5, 5), 150), "conv2_b": u(ks[3], (16,), 150),
        "fc1_w": u(ks[4], (120, 256), 256), "fc1_b": u(ks[5], (120,), 256),
        "fc2_w": u(ks[6], (84, 120), 120), "fc2_b": u(ks[7], (84,), 120),
        "fc3_w": u(ks[8], (19, 84), 84), "fc3_b": u(ks[9], (19,), 84),
    }


# ----------------------- pure-JAX (XLA) reference --------------------------- #

def _reference_forward(x, y, params, probabilities=True):
    def enc(a):
        z = lax.conv_general_dilated(a, params["conv1_w"], (1, 1), "VALID",
                                     dimension_numbers=("NCHW", "OIHW", "NCHW"))
        z = z + params["conv1_b"][None, :, None, None]
        z = lax.reduce_window(z, -jnp.inf, lax.max, (1, 1, 2, 2), (1, 1, 2, 2),
                              "VALID")
        z = jnp.maximum(z, 0.0)
        z = lax.conv_general_dilated(z, params["conv2_w"], (1, 1), "VALID",
                                     dimension_numbers=("NCHW", "OIHW", "NCHW"))
        z = z + params["conv2_b"][None, :, None, None]
        z = lax.reduce_window(z, -jnp.inf, lax.max, (1, 1, 2, 2), (1, 1, 2, 2),
                              "VALID")
        return jnp.maximum(z, 0.0)

    f = enc(x) + enc(y)
    f = f.reshape(f.shape[0], 256)               # == torch .view(-1, 16*8*2)
    z = jnp.maximum(f @ params["fc1_w"].T + params["fc1_b"], 0.0)
    z = jnp.maximum(z @ params["fc2_w"].T + params["fc2_b"], 0.0)
    z = z @ params["fc3_w"].T + params["fc3_b"]
    if probabilities:
        z = jax.nn.softmax(z, axis=-1)
    return z


if __name__ == "__main__":
    key = jax.random.PRNGKey(0)
    kx, kyy, kp = jax.random.split(key, 3)
    B = 2
    x = jax.random.normal(kx, (B, 1, 28, 28), jnp.float32)
    y = jax.random.normal(kyy, (B, 1, 28, 28), jnp.float32)
    params = init_params(kp)

    fwd = jax.jit(functools.partial(separate_baseline_forward,
                                    batched=True, probabilities=True))
    out = fwd(x, y, params)
    jax.block_until_ready(out)

    assert out.shape == (B, 19), out.shape
    assert bool(jnp.all(jnp.isfinite(out)))
    # softmax rows sum to ~1 (approx reciprocal -> loose tolerance)
    assert bool(jnp.all(jnp.abs(jnp.sum(out, axis=-1) - 1.0) < 5e-3))
    # matches an f32 XLA reference (kernel uses bf16 matmul inputs, f32 accum)
    ref = _reference_forward(x, y, params, probabilities=True)
    assert bool(jnp.max(jnp.abs(out - ref)) < 3e-2)
    print("KERNEL_OK")
</pallas_src>

<mosaic_0001>
module attributes {stable_mosaic.version = 11 : i64} {
  func.func @_fused_kernel(%arg0: i32, %arg1: memref<8x28x28xf32, #tpu.memory_space<vmem>>, %arg2: memref<8x28x28xf32, #tpu.memory_space<vmem>>, %arg3: memref<5x28x144xbf16, #tpu.memory_space<vmem>>, %arg4: memref<1x72xf32, #tpu.memory_space<vmem>>, %arg5: memref<5x72x128xbf16, #tpu.memory_space<vmem>>, %arg6: memref<1x64xf32, #tpu.memory_space<vmem>>, %arg7: memref<4x64x128xbf16, #tpu.memory_space<vmem>>, %arg8: memref<1x128xf32, #tpu.memory_space<vmem>>, %arg9: memref<128x128xbf16, #tpu.memory_space<vmem>>, %arg10: memref<1x128xf32, #tpu.memory_space<vmem>>, %arg11: memref<128x128xbf16, #tpu.memory_space<vmem>>, %arg12: memref<1x128xf32, #tpu.memory_space<vmem>>, %arg13: memref<8x128xf32, #tpu.memory_space<vmem>>, %arg14: memref<8x24x72xf32, #tpu.memory_space<vmem>>, %arg15: memref<8x12x72xf32, #tpu.memory_space<vmem>>) attributes {dimension_semantics = [#tpu.dimension_semantics<parallel>], iteration_bounds = array<i64: 1>, scalar_prefetch = 0 : i64, scratch_operands = 2 : i64, tpu.core_type = #tpu.core_type<tc>, window_params = [{transform_indices = @transform_0, window_bounds = array<i64: 8, 28, 28>}, {transform_indices = @transform_1, window_bounds = array<i64: 8, 28, 28>}, {pipeline_mode = #tpu.pipeline_mode<synchronous>, transform_indices = @transform_2, window_bounds = array<i64: 5, 28, 144>}, {pipeline_mode = #tpu.pipeline_mode<synchronous>, transform_indices = @transform_3, window_bounds = array<i64: 1, 72>}, {pipeline_mode = #tpu.pipeline_mode<synchronous>, transform_indices = @transform_4, window_bounds = array<i64: 5, 72, 128>}, {pipeline_mode = #tpu.pipeline_mode<synchronous>, transform_indices = @transform_5, window_bounds = array<i64: 1, 64>}, {pipeline_mode = #tpu.pipeline_mode<synchronous>, transform_indices = @transform_6, window_bounds = array<i64: 4, 64, 128>}, {pipeline_mode = #tpu.pipeline_mode<synchronous>, transform_indices = @transform_7, window_bounds = array<i64: 1, 128>}, {pipeline_mode = #tpu.pipeline_mode<synchronous>, transform_indices = @transform_8, window_bounds = array<i64: 128, 128>}, {pipeline_mode = #tpu.pipeline_mode<synchronous>, transform_indices = @transform_9, window_bounds = array<i64: 1, 128>}, {pipeline_mode = #tpu.pipeline_mode<synchronous>, transform_indices = @transform_10, window_bounds = array<i64: 128, 128>}, {pipeline_mode = #tpu.pipeline_mode<synchronous>, transform_indices = @transform_11, window_bounds = array<i64: 1, 128>}, {transform_indices = @transform_12, window_bounds = array<i64: 8, 128>}]} {
    %cst = arith.constant 0.000000e+00 : f32
    %0 = vector.broadcast %cst : f32 to vector<192x144xf32>
    %c0 = arith.constant 0 : index
    %c0_0 = arith.constant 0 : index
    %c0_1 = arith.constant 0 : index
    %1 = vector.load %arg1[%c0, %c0_0, %c0_1] : memref<8x28x28xf32, #tpu.memory_space<vmem>>, vector<8x24x28xf32>
    %2 = vector.shape_cast %1 : vector<8x24x28xf32> to vector<192x28xf32>
    %3 = arith.truncf %2 : vector<192x28xf32> to vector<192x28xbf16>
    %c0_2 = arith.constant 0 : index
    %c0_3 = arith.constant 0 : index
    %c0_4 = arith.constant 0 : index
    %4 = vector.load %arg3[%c0_2, %c0_3, %c0_4] : memref<5x28x144xbf16, #tpu.memory_space<vmem>>, vector<1x28x144xbf16>
    %5 = vector.shape_cast %4 : vector<1x28x144xbf16> to vector<28x144xbf16>
    %cst_5 = arith.constant dense<0.000000e+00> : vector<192x144xf32>
    %6 = tpu.matmul %3, %5, %cst_5 {dimension_numbers = #tpu.dot_dimension_numbers<[1], [0], [0], [1], [0, 0, 1, 1], [], []>} : vector<192x28xbf16>, vector<28x144xbf16>, vector<192x144xf32> -> vector<192x144xf32>
    %7 = arith.addf %0, %6 : vector<192x144xf32>
    %c0_6 = arith.constant 0 : index
    %c1 = arith.constant 1 : index
    %c0_7 = arith.constant 0 : index
    %8 = vector.load %arg1[%c0_6, %c1, %c0_7] : memref<8x28x28xf32, #tpu.memory_space<vmem>>, vector<8x24x28xf32>
    %9 = vector.shape_cast %8 : vector<8x24x28xf32> to vector<192x28xf32>
    %10 = arith.truncf %9 : vector<192x28xf32> to vector<192x28xbf16>
    %c1_8 = arith.constant 1 : index
    %c0_9 = arith.constant 0 : index
    %c0_10 = arith.constant 0 : index
    %11 = vector.load %arg3[%c1_8, %c0_9, %c0_10] : memref<5x28x144xbf16, #tpu.memory_space<vmem>>, vector<1x28x144xbf16>
    %12 = vector.shape_cast %11 : vector<1x28x144xbf16> to vector<28x144xbf16>
    %cst_11 = arith.constant dense<0.000000e+00> : vector<192x144xf32>
    %13 = tpu.matmul %10, %12, %cst_11 {dimension_numbers = #tpu.dot_dimension_numbers<[1], [0], [0], [1], [0, 0, 1, 1], [], []>} : vector<192x28xbf16>, vector<28x144xbf16>, vector<192x144xf32> -> vector<192x144xf32>
    %14 = arith.addf %7, %13 : vector<192x144xf32>
    %c0_12 = arith.constant 0 : index
    %c2 = arith.constant 2 : index
    %c0_13 = arith.constant 0 : index
    %15 = vector.load %arg1[%c0_12, %c2, %c0_13] : memref<8x28x28xf32, #tpu.memory_space<vmem>>, vector<8x24x28xf32>
    %16 = vector.shape_cast %15 : vector<8x24x28xf32> to vector<192x28xf32>
    %17 = arith.truncf %16 : vector<192x28xf32> to vector<192x28xbf16>
    %c2_14 = arith.constant 2 : index
    %c0_15 = arith.constant 0 : index
    %c0_16 = arith.constant 0 : index
    %18 = vector.load %arg3[%c2_14, %c0_15, %c0_16] : memref<5x28x144xbf16, #tpu.memory_space<vmem>>, vector<1x28x144xbf16>
    %19 = vector.shape_cast %18 : vector<1x28x144xbf16> to vector<28x144xbf16>
    %cst_17 = arith.constant dense<0.000000e+00> : vector<192x144xf32>
    %20 = tpu.matmul %17, %19, %cst_17 {dimension_numbers = #tpu.dot_dimension_numbers<[1], [0], [0], [1], [0, 0, 1, 1], [], []>} : vector<192x28xbf16>, vector<28x144xbf16>, vector<192x144xf32> -> vector<192x144xf32>
    %21 = arith.addf %14, %20 : vector<192x144xf32>
    %c0_18 = arith.constant 0 : index
    %c3 = arith.constant 3 : index
    %c0_19 = arith.constant 0 : index
    %22 = vector.load %arg1[%c0_18, %c3, %c0_19] : memref<8x28x28xf32, #tpu.memory_space<vmem>>, vector<8x24x28xf32>
    %23 = vector.shape_cast %22 : vector<8x24x28xf32> to vector<192x28xf32>
    %24 = arith.truncf %23 : vector<192x28xf32> to vector<192x28xbf16>
    %c3_20 = arith.constant 3 : index
    %c0_21 = arith.constant 0 : index
    %c0_22 = arith.constant 0 : index
    %25 = vector.load %arg3[%c3_20, %c0_21, %c0_22] : memref<5x28x144xbf16, #tpu.memory_space<vmem>>, vector<1x28x144xbf16>
    %26 = vector.shape_cast %25 : vector<1x28x144xbf16> to vector<28x144xbf16>
    %cst_23 = arith.constant dense<0.000000e+00> : vector<192x144xf32>
    %27 = tpu.matmul %24, %26, %cst_23 {dimension_numbers = #tpu.dot_dimension_numbers<[1], [0], [0], [1], [0, 0, 1, 1], [], []>} : vector<192x28xbf16>, vector<28x144xbf16>, vector<192x144xf32> -> vector<192x144xf32>
    %28 = arith.addf %21, %27 : vector<192x144xf32>
    %c0_24 = arith.constant 0 : index
    %c4 = arith.constant 4 : index
    %c0_25 = arith.constant 0 : index
    %29 = vector.load %arg1[%c0_24, %c4, %c0_25] : memref<8x28x28xf32, #tpu.memory_space<vmem>>, vector<8x24x28xf32>
    %30 = vector.shape_cast %29 : vector<8x24x28xf32> to vector<192x28xf32>
    %31 = arith.truncf %30 : vector<192x28xf32> to vector<192x28xbf16>
    %c4_26 = arith.constant 4 : index
    %c0_27 = arith.constant 0 : index
    %c0_28 = arith.constant 0 : index
    %32 = vector.load %arg3[%c4_26, %c0_27, %c0_28] : memref<5x28x144xbf16, #tpu.memory_space<vmem>>, vector<1x28x144xbf16>
    %33 = vector.shape_cast %32 : vector<1x28x144xbf16> to vector<28x144xbf16>
    %cst_29 = arith.constant dense<0.000000e+00> : vector<192x144xf32>
    %34 = tpu.matmul %31, %33, %cst_29 {dimension_numbers = #tpu.dot_dimension_numbers<[1], [0], [0], [1], [0, 0, 1, 1], [], []>} : vector<192x28xbf16>, vector<28x144xbf16>, vector<192x144xf32> -> vector<192x144xf32>
    %35 = arith.addf %28, %34 : vector<192x144xf32>
    %36 = vector.extract_strided_slice %35 {offsets = [0, 0], sizes = [192, 72], strides = [1, 1]} : vector<192x144xf32> to vector<192x72xf32>
    %37 = vector.extract_strided_slice %35 {offsets = [0, 72], sizes = [192, 72], strides = [1, 1]} : vector<192x144xf32> to vector<192x72xf32>
    %38 = arith.maximumf %36, %37 : vector<192x72xf32>
    %39 = vector.shape_cast %38 : vector<192x72xf32> to vector<8x24x72xf32>
    %c0_30 = arith.constant 0 : index
    %c0_31 = arith.constant 0 : index
    %c0_32 = arith.constant 0 : index
    %40 = vector.load %arg14[%c0_30, %c0_31, %c0_32] : memref<8x24x72xf32, #tpu.memory_space<vmem>>, vector<8x24x72xf32>
    tpu.vector_store %arg14[%c0_30, %c0_31, %c0_32], %39 {strides = array<i32>} : memref<8x24x72xf32, #tpu.memory_space<vmem>>, vector<8x24x72xf32>,
    %c0_33 = arith.constant 0 : index
    %c0_34 = arith.constant 0 : index
    %c0_35 = arith.constant 0 : index
    %41 = tpu.strided_load %arg14[%c0_33, %c0_34, %c0_35] {strides = array<i32: 1, 2, 1>} : memref<8x24x72xf32, #tpu.memory_space<vmem>>, vector<8x12x72xf32>
    %c0_36 = arith.constant 0 : index
    %c1_37 = arith.constant 1 : index
    %c0_38 = arith.constant 0 : index
    %42 = tpu.strided_load %arg14[%c0_36, %c1_37, %c0_38] {strides = array<i32: 1, 2, 1>} : memref<8x24x72xf32, #tpu.memory_space<vmem>>, vector<8x12x72xf32>
    %43 = arith.maximumf %41, %42 : vector<8x12x72xf32>
    %c0_39 = arith.constant 0 : index
    %c0_40 = arith.constant 0 : index
    %44 = vector.load %arg4[%c0_39, %c0_40] : memref<1x72xf32, #tpu.memory_space<vmem>>, vector<1x72xf32>
    %45 = vector.shape_cast %44 : vector<1x72xf32> to vector<1x1x72xf32>
    %46 = vector.broadcast %45 : vector<1x1x72xf32> to vector<8x12x72xf32>
    %47 = arith.addf %43, %46 : vector<8x12x72xf32>
    %cst_41 = arith.constant 0.000000e+00 : f32
    %48 = vector.broadcast %cst_41 : f32 to vector<8x12x72xf32>
    %49 = arith.maximumf %47, %48 : vector<8x12x72xf32>
    %c0_42 = arith.constant 0 : index
    %c0_43 = arith.constant 0 : index
    %c0_44 = arith.constant 0 : index
    %50 = vector.load %arg15[%c0_42, %c0_43, %c0_44] : memref<8x12x72xf32, #tpu.memory_space<vmem>>, vector<8x12x72xf32>
    tpu.vector_store %arg15[%c0_42, %c0_43, %c0_44], %49 {strides = array<i32>} : memref<8x12x72xf32, #tpu.memory_space<vmem>>, vector<8x12x72xf32>,
    %cst_45 = arith.constant 0.000000e+00 : f32
    %51 = vector.broadcast %cst_45 : f32 to vector<64x128xf32>
    %c0_46 = arith.constant 0 : index
    %c0_47 = arith.constant 0 : index
    %c0_48 = arith.constant 0 : index
    %52 = vector.load %arg15[%c0_46, %c0_47, %c0_48] : memref<8x12x72xf32, #tpu.memory_space<vmem>>, vector<8x8x72xf32>
    %53 = vector.shape_cast %52 : vector<8x8x72xf32> to vector<64x72xf32>
    %54 = arith.truncf %53 : vector<64x72xf32> to vector<64x72xbf16>
    %c0_49 = arith.constant 0 : index
    %c0_50 = arith.constant 0 : index
    %c0_51 = arith.constant 0 : index
    %55 = vector.load %arg5[%c0_49, %c0_50, %c0_51] : memref<5x72x128xbf16, #tpu.memory_space<vmem>>, vector<1x72x128xbf16>
    %56 = vector.shape_cast %55 : vector<1x72x128xbf16> to vector<72x128xbf16>
    %cst_52 = arith.constant dense<0.000000e+00> : vector<64x128xf32>
    %57 = tpu.matmul %54, %56, %cst_52 {dimension_numbers = #tpu.dot_dimension_numbers<[1], [0], [0], [1], [0, 0, 1, 1], [], []>} : vector<64x72xbf16>, vector<72x128xbf16>, vector<64x128xf32> -> vector<64x128xf32>
    %58 = arith.addf %51, %57 : vector<64x128xf32>
    %c0_53 = arith.constant 0 : index
    %c1_54 = arith.constant 1 : index
    %c0_55 = arith.constant 0 : index
    %59 = vector.load %arg15[%c0_53, %c1_54, %c0_55] : memref<8x12x72xf32, #tpu.memory_space<vmem>>, vector<8x8x72xf32>
    %60 = vector.shape_cast %59 : vector<8x8x72xf32> to vector<64x72xf32>
    %61 = arith.truncf %60 : vector<64x72xf32> to vector<64x72xbf16>
    %c1_56 = arith.constant 1 : index
    %c0_57 = arith.constant 0 : index
    %c0_58 = arith.constant 0 : index
    %62 = vector.load %arg5[%c1_56, %c0_57, %c0_58] : memref<5x72x128xbf16, #tpu.memory_space<vmem>>, vector<1x72x128xbf16>
    %63 = vector.shape_cast %62 : vector<1x72x128xbf16> to vector<72x128xbf16>
    %cst_59 = arith.constant dense<0.000000e+00> : vector<64x128xf32>
    %64 = tpu.matmul %61, %63, %cst_59 {dimension_numbers = #tpu.dot_dimension_numbers<[1], [0], [0], [1], [0, 0, 1, 1], [], []>} : vector<64x72xbf16>, vector<72x128xbf16>, vector<64x128xf32> -> vector<64x128xf32>
    %65 = arith.addf %58, %64 : vector<64x128xf32>
    %c0_60 = arith.constant 0 : index
    %c2_61 = arith.constant 2 : index
    %c0_62 = arith.constant 0 : index
    %66 = vector.load %arg15[%c0_60, %c2_61, %c0_62] : memref<8x12x72xf32, #tpu.memory_space<vmem>>, vector<8x8x72xf32>
    %67 = vector.shape_cast %66 : vector<8x8x72xf32> to vector<64x72xf32>
    %68 = arith.truncf %67 : vector<64x72xf32> to vector<64x72xbf16>
    %c2_63 = arith.constant 2 : index
    %c0_64 = arith.constant 0 : index
    %c0_65 = arith.constant 0 : index
    %69 = vector.load %arg5[%c2_63, %c0_64, %c0_65] : memref<5x72x128xbf16, #tpu.memory_space<vmem>>, vector<1x72x128xbf16>
    %70 = vector.shape_cast %69 : vector<1x72x128xbf16> to vector<72x128xbf16>
    %cst_66 = arith.constant dense<0.000000e+00> : vector<64x128xf32>
    %71 = tpu.matmul %68, %70, %cst_66 {dimension_numbers = #tpu.dot_dimension_numbers<[1], [0], [0], [1], [0, 0, 1, 1], [], []>} : vector<64x72xbf16>, vector<72x128xbf16>, vector<64x128xf32> -> vector<64x128xf32>
    %72 = arith.addf %65, %71 : vector<64x128xf32>
    %c0_67 = arith.constant 0 : index
    %c3_68 = arith.constant 3 : index
    %c0_69 = arith.constant 0 : index
    %73 = vector.load %arg15[%c0_67, %c3_68, %c0_69] : memref<8x12x72xf32, #tpu.memory_space<vmem>>, vector<8x8x72xf32>
    %74 = vector.shape_cast %73 : vector<8x8x72xf32> to vector<64x72xf32>
    %75 = arith.truncf %74 : vector<64x72xf32> to vector<64x72xbf16>
    %c3_70 = arith.constant 3 : index
    %c0_71 = arith.constant 0 : index
    %c0_72 = arith.constant 0 : index
    %76 = vector.load %arg5[%c3_70, %c0_71, %c0_72] : memref<5x72x128xbf16, #tpu.memory_space<vmem>>, vector<1x72x128xbf16>
    %77 = vector.shape_cast %76 : vector<1x72x128xbf16> to vector<72x128xbf16>
    %cst_73 = arith.constant dense<0.000000e+00> : vector<64x128xf32>
    %78 = tpu.matmul %75, %77, %cst_73 {dimension_numbers = #tpu.dot_dimension_numbers<[1], [0], [0], [1], [0, 0, 1, 1], [], []>} : vector<64x72xbf16>, vector<72x128xbf16>, vector<64x128xf32> -> vector<64x128xf32>
    %79 = arith.addf %72, %78 : vector<64x128xf32>
    %c0_74 = arith.constant 0 : index
    %c4_75 = arith.constant 4 : index
    %c0_76 = arith.constant 0 : index
    %80 = vector.load %arg15[%c0_74, %c4_75, %c0_76] : memref<8x12x72xf32, #tpu.memory_space<vmem>>, vector<8x8x72xf32>
    %81 = vector.shape_cast %80 : vector<8x8x72xf32> to vector<64x72xf32>
    %82 = arith.truncf %81 : vector<64x72xf32> to vector<64x72xbf16>
    %c4_77 = arith.constant 4 : index
    %c0_78 = arith.constant 0 : index
    %c0_79 = arith.constant 0 : index
    %83 = vector.load %arg5[%c4_77, %c0_78, %c0_79] : memref<5x72x128xbf16, #tpu.memory_space<vmem>>, vector<1x72x128xbf16>
    %84 = vector.shape_cast %83 : vector<1x72x128xbf16> to vector<72x128xbf16>
    %cst_80 = arith.constant dense<0.000000e+00> : vector<64x128xf32>
    %85 = tpu.matmul %82, %84, %cst_80 {dimension_numbers = #tpu.dot_dimension_numbers<[1], [0], [0], [1], [0, 0, 1, 1], [], []>} : vector<64x72xbf16>, vector<72x128xbf16>, vector<64x128xf32> -> vector<64x128xf32>
    %86 = arith.addf %79, %85 : vector<64x128xf32>
    %87 = vector.extract_strided_slice %86 {offsets = [0, 0], sizes = [64, 64], strides = [1, 1]} : vector<64x128xf32> to vector<64x64xf32>
    %88 = vector.extract_strided_slice %86 {offsets = [0, 64], sizes = [64, 64], strides = [1, 1]} : vector<64x128xf32> to vector<64x64xf32>
    %89 = arith.maximumf %87, %88 : vector<64x64xf32>
    %90 = vector.shape_cast %89 : vector<64x64xf32> to vector<8x8x64xf32>
    %cst_81 = arith.constant 0.000000e+00 : f32
    %91 = vector.broadcast %cst_81 : f32 to vector<192x144xf32>
    %c0_82 = arith.constant 0 : index
    %c0_83 = arith.constant 0 : index
    %c0_84 = arith.constant 0 : index
    %92 = vector.load %arg2[%c0_82, %c0_83, %c0_84] : memref<8x28x28xf32, #tpu.memory_space<vmem>>, vector<8x24x28xf32>
    %93 = vector.shape_cast %92 : vector<8x24x28xf32> to vector<192x28xf32>
    %94 = arith.truncf %93 : vector<192x28xf32> to vector<192x28xbf16>
    %c0_85 = arith.constant 0 : index
    %c0_86 = arith.constant 0 : index
    %c0_87 = arith.constant 0 : index
    %95 = vector.load %arg3[%c0_85, %c0_86, %c0_87] : memref<5x28x144xbf16, #tpu.memory_space<vmem>>, vector<1x28x144xbf16>
    %96 = vector.shape_cast %95 : vector<1x28x144xbf16> to vector<28x144xbf16>
    %cst_88 = arith.constant dense<0.000000e+00> : vector<192x144xf32>
    %97 = tpu.matmul %94, %96, %cst_88 {dimension_numbers = #tpu.dot_dimension_numbers<[1], [0], [0], [1], [0, 0, 1, 1], [], []>} : vector<192x28xbf16>, vector<28x144xbf16>, vector<192x144xf32> -> vector<192x144xf32>
    %98 = arith.addf %91, %97 : vector<192x144xf32>
    %c0_89 = arith.constant 0 : index
    %c1_90 = arith.constant 1 : index
    %c0_91 = arith.constant 0 : index
    %99 = vector.load %arg2[%c0_89, %c1_90, %c0_91] : memref<8x28x28xf32, #tpu.memory_space<vmem>>, vector<8x24x28xf32>
    %100 = vector.shape_cast %99 : vector<8x24x28xf32> to vector<192x28xf32>
    %101 = arith.truncf %100 : vector<192x28xf32> to vector<192x28xbf16>
    %c1_92 = arith.constant 1 : index
    %c0_93 = arith.constant 0 : index
    %c0_94 = arith.constant 0 : index
    %102 = vector.load %arg3[%c1_92, %c0_93, %c0_94] : memref<5x28x144xbf16, #tpu.memory_space<vmem>>, vector<1x28x144xbf16>
    %103 = vector.shape_cast %102 : vector<1x28x144xbf16> to vector<28x144xbf16>
    %cst_95 = arith.constant dense<0.000000e+00> : vector<192x144xf32>
    %104 = tpu.matmul %101, %103, %cst_95 {dimension_numbers = #tpu.dot_dimension_numbers<[1], [0], [0], [1], [0, 0, 1, 1], [], []>} : vector<192x28xbf16>, vector<28x144xbf16>, vector<192x144xf32> -> vector<192x144xf32>
    %105 = arith.addf %98, %104 : vector<192x144xf32>
    %c0_96 = arith.constant 0 : index
    %c2_97 = arith.constant 2 : index
    %c0_98 = arith.constant 0 : index
    %106 = vector.load %arg2[%c0_96, %c2_97, %c0_98] : memref<8x28x28xf32, #tpu.memory_space<vmem>>, vector<8x24x28xf32>
    %107 = vector.shape_cast %106 : vector<8x24x28xf32> to vector<192x28xf32>
    %108 = arith.truncf %107 : vector<192x28xf32> to vector<192x28xbf16>
    %c2_99 = arith.constant 2 : index
    %c0_100 = arith.constant 0 : index
    %c0_101 = arith.constant 0 : index
    %109 = vector.load %arg3[%c2_99, %c0_100, %c0_101] : memref<5x28x144xbf16, #tpu.memory_space<vmem>>, vector<1x28x144xbf16>
    %110 = vector.shape_cast %109 : vector<1x28x144xbf16> to vector<28x144xbf16>
    %cst_102 = arith.constant dense<0.000000e+00> : vector<192x144xf32>
    %111 = tpu.matmul %108, %110, %cst_102 {dimension_numbers = #tpu.dot_dimension_numbers<[1], [0], [0], [1], [0, 0, 1, 1], [], []>} : vector<192x28xbf16>, vector<28x144xbf16>, vector<192x144xf32> -> vector<192x144xf32>
    %112 = arith.addf %105, %111 : vector<192x144xf32>
    %c0_103 = arith.constant 0 : index
    %c3_104 = arith.constant 3 : index
    %c0_105 = arith.constant 0 : index
    %113 = vector.load %arg2[%c0_103, %c3_104, %c0_105] : memref<8x28x28xf32, #tpu.memory_space<vmem>>, vector<8x24x28xf32>
    %114 = vector.shape_cast %113 : vector<8x24x28xf32> to vector<192x28xf32>
    %115 = arith.truncf %114 : vector<192x28xf32> to vector<192x28xbf16>
    %c3_106 = arith.constant 3 : index
    %c0_107 = arith.constant 0 : index
    %c0_108 = arith.constant 0 : index
    %116 = vector.load %arg3[%c3_106, %c0_107, %c0_108] : memref<5x28x144xbf16, #tpu.memory_space<vmem>>, vector<1x28x144xbf16>
    %117 = vector.shape_cast %116 : vector<1x28x144xbf16> to vector<28x144xbf16>
    %cst_109 = arith.constant dense<0.000000e+00> : vector<192x144xf32>
    %118 = tpu.matmul %115, %117, %cst_109 {dimension_numbers = #tpu.dot_dimension_numbers<[1], [0], [0], [1], [0, 0, 1, 1], [], []>} : vector<192x28xbf16>, vector<28x144xbf16>, vector<192x144xf32> -> vector<192x144xf32>
    %119 = arith.addf %112, %118 : vector<192x144xf32>
    %c0_110 = arith.constant 0 : index
    %c4_111 = arith.constant 4 : index
    %c0_112 = arith.constant 0 : index
    %120 = vector.load %arg2[%c0_110, %c4_111, %c0_112] : memref<8x28x28xf32, #tpu.memory_space<vmem>>, vector<8x24x28xf32>
    %121 = vector.shape_cast %120 : vector<8x24x28xf32> to vector<192x28xf32>
    %122 = arith.truncf %121 : vector<192x28xf32> to vector<192x28xbf16>
    %c4_113 = arith.constant 4 : index
    %c0_114 = arith.constant 0 : index
    %c0_115 = arith.constant 0 : index
    %123 = vector.load %arg3[%c4_113, %c0_114, %c0_115] : memref<5x28x144xbf16, #tpu.memory_space<vmem>>, vector<1x28x144xbf16>
    %124 = vector.shape_cast %123 : vector<1x28x144xbf16> to vector<28x144xbf16>
    %cst_116 = arith.constant dense<0.000000e+00> : vector<192x144xf32>
    %125 = tpu.matmul %122, %124, %cst_116 {dimension_numbers = #tpu.dot_dimension_numbers<[1], [0], [0], [1], [0, 0, 1, 1], [], []>} : vector<192x28xbf16>, vector<28x144xbf16>, vector<192x144xf32> -> vector<192x144xf32>
    %126 = arith.addf %119, %125 : vector<192x144xf32>
    %127 = vector.extract_strided_slice %126 {offsets = [0, 0], sizes = [192, 72], strides = [1, 1]} : vector<192x144xf32> to vector<192x72xf32>
    %128 = vector.extract_strided_slice %126 {offsets = [0, 72], sizes = [192, 72], strides = [1, 1]} : vector<192x144xf32> to vector<192x72xf32>
    %129 = arith.maximumf %127, %128 : vector<192x72xf32>
    %130 = vector.shape_cast %129 : vector<192x72xf32> to vector<8x24x72xf32>
    %c0_117 = arith.constant 0 : index
    %c0_118 = arith.constant 0 : index
    %c0_119 = arith.constant 0 : index
    %131 = vector.load %arg14[%c0_117, %c0_118, %c0_119] : memref<8x24x72xf32, #tpu.memory_space<vmem>>, vector<8x24x72xf32>
    tpu.vector_store %arg14[%c0_117, %c0_118, %c0_119], %130 {strides = array<i32>} : memref<8x24x72xf32, #tpu.memory_space<vmem>>, vector<8x24x72xf32>,
    %c0_120 = arith.constant 0 : index
    %c0_121 = arith.constant 0 : index
    %c0_122 = arith.constant 0 : index
    %132 = tpu.strided_load %arg14[%c0_120, %c0_121, %c0_122] {strides = array<i32: 1, 2, 1>} : memref<8x24x72xf32, #tpu.memory_space<vmem>>, vector<8x12x72xf32>
    %c0_123 = arith.constant 0 : index
    %c1_124 = arith.constant 1 : index
    %c0_125 = arith.constant 0 : index
    %133 = tpu.strided_load %arg14[%c0_123, %c1_124, %c0_125] {strides = array<i32: 1, 2, 1>} : memref<8x24x72xf32, #tpu.memory_space<vmem>>, vector<8x12x72xf32>
    %134 = arith.maximumf %132, %133 : vector<8x12x72xf32>
    %c0_126 = arith.constant 0 : index
    %c0_127 = arith.constant 0 : index
    %135 = vector.load %arg4[%c0_126, %c0_127] : memref<1x72xf32, #tpu.memory_space<vmem>>, vector<1x72xf32>
    %136 = vector.shape_cast %135 : vector<1x72xf32> to vector<1x1x72xf32>
    %137 = vector.broadcast %136 : vector<1x1x72xf32> to vector<8x12x72xf32>
    %138 = arith.addf %134, %137 : vector<8x12x72xf32>
    %cst_128 = arith.constant 0.000000e+00 : f32
    %139 = vector.broadcast %cst_128 : f32 to vector<8x12x72xf32>
    %140 = arith.maximumf %138, %139 : vector<8x12x72xf32>
    %c0_129 = arith.constant 0 : index
    %c0_130 = arith.constant 0 : index
    %c0_131 = arith.constant 0 : index
    %141 = vector.load %arg15[%c0_129, %c0_130, %c0_131] : memref<8x12x72xf32, #tpu.memory_space<vmem>>, vector<8x12x72xf32>
    tpu.vector_store %arg15[%c0_129, %c0_130, %c0_131], %140 {strides = array<i32>} : memref<8x12x72xf32, #tpu.memory_space<vmem>>, vector<8x12x72xf32>,
    %cst_132 = arith.constant 0.000000e+00 : f32
    %142 = vector.broadcast %cst_132 : f32 to vector<64x128xf32>
    %c0_133 = arith.constant 0 : index
    %c0_134 = arith.constant 0 : index
    %c0_135 = arith.constant 0 : index
    %143 = vector.load %arg15[%c0_133, %c0_134, %c0_135] : memref<8x12x72xf32, #tpu.memory_space<vmem>>, vector<8x8x72xf32>
    %144 = vector.shape_cast %143 : vector<8x8x72xf32> to vector<64x72xf32>
    %145 = arith.truncf %144 : vector<64x72xf32> to vector<64x72xbf16>
    %c0_136 = arith.constant 0 : index
    %c0_137 = arith.constant 0 : index
    %c0_138 = arith.constant 0 : index
    %146 = vector.load %arg5[%c0_136, %c0_137, %c0_138] : memref<5x72x128xbf16, #tpu.memory_space<vmem>>, vector<1x72x128xbf16>
    %147 = vector.shape_cast %146 : vector<1x72x128xbf16> to vector<72x128xbf16>
    %cst_139 = arith.constant dense<0.000000e+00> : vector<64x128xf32>
    %148 = tpu.matmul %145, %147, %cst_139 {dimension_numbers = #tpu.dot_dimension_numbers<[1], [0], [0], [1], [0, 0, 1, 1], [], []>} : vector<64x72xbf16>, vector<72x128xbf16>, vector<64x128xf32> -> vector<64x128xf32>
    %149 = arith.addf %142, %148 : vector<64x128xf32>
    %c0_140 = arith.constant 0 : index
    %c1_141 = arith.constant 1 : index
    %c0_142 = arith.constant 0 : index
    %150 = vector.load %arg15[%c0_140, %c1_141, %c0_142] : memref<8x12x72xf32, #tpu.memory_space<vmem>>, vector<8x8x72xf32>
    %151 = vector.shape_cast %150 : vector<8x8x72xf32> to vector<64x72xf32>
    %152 = arith.truncf %151 : vector<64x72xf32> to vector<64x72xbf16>
    %c1_143 = arith.constant 1 : index
    %c0_144 = arith.constant 0 : index
    %c0_145 = arith.constant 0 : index
    %153 = vector.load %arg5[%c1_143, %c0_144, %c0_145] : memref<5x72x128xbf16, #tpu.memory_space<vmem>>, vector<1x72x128xbf16>
    %154 = vector.shape_cast %153 : vector<1x72x128xbf16> to vector<72x128xbf16>
    %cst_146 = arith.constant dense<0.000000e+00> : vector<64x128xf32>
    %155 = tpu.matmul %152, %154, %cst_146 {dimension_numbers = #tpu.dot_dimension_numbers<[1], [0], [0], [1], [0, 0, 1, 1], [], []>} : vector<64x72xbf16>, vector<72x128xbf16>, vector<64x128xf32> -> vector<64x128xf32>
    %156 = arith.addf %149, %155 : vector<64x128xf32>
    %c0_147 = arith.constant 0 : index
    %c2_148 = arith.constant 2 : index
    %c0_149 = arith.constant 0 : index
    %157 = vector.load %arg15[%c0_147, %c2_148, %c0_149] : memref<8x12x72xf32, #tpu.memory_space<vmem>>, vector<8x8x72xf32>
    %158 = vector.shape_cast %157 : vector<8x8x72xf32> to vector<64x72xf32>
    %159 = arith.truncf %158 : vector<64x72xf32> to vector<64x72xbf16>
    %c2_150 = arith.constant 2 : index
    %c0_151 = arith.constant 0 : index
    %c0_152 = arith.constant 0 : index
    %160 = vector.load %arg5[%c2_150, %c0_151, %c0_152] : memref<5x72x128xbf16, #tpu.memory_space<vmem>>, vector<1x72x128xbf16>
    %161 = vector.shape_cast %160 : vector<1x72x128xbf16> to vector<72x128xbf16>
    %cst_153 = arith.constant dense<0.000000e+00> : vector<64x128xf32>
    %162 = tpu.matmul %159, %161, %cst_153 {dimension_numbers = #tpu.dot_dimension_numbers<[1], [0], [0], [1], [0, 0, 1, 1], [], []>} : vector<64x72xbf16>, vector<72x128xbf16>, vector<64x128xf32> -> vector<64x128xf32>
    %163 = arith.addf %156, %162 : vector<64x128xf32>
    %c0_154 = arith.constant 0 : index
    %c3_155 = arith.constant 3 : index
    %c0_156 = arith.constant 0 : index
    %164 = vector.load %arg15[%c0_154, %c3_155, %c0_156] : memref<8x12x72xf32, #tpu.memory_space<vmem>>, vector<8x8x72xf32>
    %165 = vector.shape_cast %164 : vector<8x8x72xf32> to vector<64x72xf32>
    %166 = arith.truncf %165 : vector<64x72xf32> to vector<64x72xbf16>
    %c3_157 = arith.constant 3 : index
    %c0_158 = arith.constant 0 : index
    %c0_159 = arith.constant 0 : index
    %167 = vector.load %arg5[%c3_157, %c0_158, %c0_159] : memref<5x72x128xbf16, #tpu.memory_space<vmem>>, vector<1x72x128xbf16>
    %168 = vector.shape_cast %167 : vector<1x72x128xbf16> to vector<72x128xbf16>
    %cst_160 = arith.constant dense<0.000000e+00> : vector<64x128xf32>
    %169 = tpu.matmul %166, %168, %cst_160 {dimension_numbers = #tpu.dot_dimension_numbers<[1], [0], [0], [1], [0, 0, 1, 1], [], []>} : vector<64x72xbf16>, vector<72x128xbf16>, vector<64x128xf32> -> vector<64x128xf32>
    %170 = arith.addf %163, %169 : vector<64x128xf32>
    %c0_161 = arith.constant 0 : index
    %c4_162 = arith.constant 4 : index
    %c0_163 = arith.constant 0 : index
    %171 = vector.load %arg15[%c0_161, %c4_162, %c0_163] : memref<8x12x72xf32, #tpu.memory_space<vmem>>, vector<8x8x72xf32>
    %172 = vector.shape_cast %171 : vector<8x8x72xf32> to vector<64x72xf32>
    %173 = arith.truncf %172 : vector<64x72xf32> to vector<64x72xbf16>
    %c4_164 = arith.constant 4 : index
    %c0_165 = arith.constant 0 : index
    %c0_166 = arith.constant 0 : index
    %174 = vector.load %arg5[%c4_164, %c0_165, %c0_166] : memref<5x72x128xbf16, #tpu.memory_space<vmem>>, vector<1x72x128xbf16>
    %175 = vector.shape_cast %174 : vector<1x72x128xbf16> to vector<72x128xbf16>
    %cst_167 = arith.constant dense<0.000000e+00> : vector<64x128xf32>
    %176 = tpu.matmul %173, %175, %cst_167 {dimension_numbers = #tpu.dot_dimension_numbers<[1], [0], [0], [1], [0, 0, 1, 1], [], []>} : vector<64x72xbf16>, vector<72x128xbf16>, vector<64x128xf32> -> vector<64x128xf32>
    %177 = arith.addf %170, %176 : vector<64x128xf32>
    %178 = vector.extract_strided_slice %177 {offsets = [0, 0], sizes = [64, 64], strides = [1, 1]} : vector<64x128xf32> to vector<64x64xf32>
    %179 = vector.extract_strided_slice %177 {offsets = [0, 64], sizes = [64, 64], strides = [1, 1]} : vector<64x128xf32> to vector<64x64xf32>
    %180 = arith.maximumf %178, %179 : vector<64x64xf32>
    %181 = vector.shape_cast %180 : vector<64x64xf32> to vector<8x8x64xf32>
    %c0_168 = arith.constant 0 : index
    %c0_169 = arith.constant 0 : index
    %182 = vector.load %arg6[%c0_168, %c0_169] : memref<1x64xf32, #tpu.memory_space<vmem>>, vector<1x64xf32>
    %cst_170 = arith.constant 0.000000e+00 : f32
    %183 = vector.broadcast %cst_170 : f32 to vector<8x128xf32>
    %184 = vector.extract_strided_slice %90 {offsets = [0, 0, 0], sizes = [8, 1, 64], strides = [1, 1, 1]} : vector<8x8x64xf32> to vector<8x1x64xf32>
    %185 = vector.shape_cast %184 : vector<8x1x64xf32> to vector<8x64xf32>
    %186 = vector.extract_strided_slice %90 {offsets = [0, 1, 0], sizes = [8, 1, 64], strides = [1, 1, 1]} : vector<8x8x64xf32> to vector<8x1x64xf32>
    %187 = vector.shape_cast %186 : vector<8x1x64xf32> to vector<8x64xf32>
    %188 = arith.maximumf %185, %187 : vector<8x64xf32>
    %189 = vector.broadcast %182 : vector<1x64xf32> to vector<8x64xf32>
    %190 = arith.addf %188, %189 : vector<8x64xf32>
    %cst_171 = arith.constant 0.000000e+00 : f32
    %191 = vector.broadcast %cst_171 : f32 to vector<8x64xf32>
    %192 = arith.maximumf %190, %191 : vector<8x64xf32>
    %193 = vector.extract_strided_slice %181 {offsets = [0, 0, 0], sizes = [8, 1, 64], strides = [1, 1, 1]} : vector<8x8x64xf32> to vector<8x1x64xf32>
    %194 = vector.shape_cast %193 : vector<8x1x64xf32> to vector<8x64xf32>
    %195 = vector.extract_strided_slice %181 {offsets = [0, 1, 0], sizes = [8, 1, 64], strides = [1, 1, 1]} : vector<8x8x64xf32> to vector<8x1x64xf32>
    %196 = vector.shape_cast %195 : vector<8x1x64xf32> to vector<8x64xf32>
    %197 = arith.maximumf %194, %196 : vector<8x64xf32>
    %198 = vector.broadcast %182 : vector<1x64xf32> to vector<8x64xf32>
    %199 = arith.addf %197, %198 : vector<8x64xf32>
    %cst_172 = arith.constant 0.000000e+00 : f32
    %200 = vector.broadcast %cst_172 : f32 to vector<8x64xf32>
    %201 = arith.maximumf %199, %200 : vector<8x64xf32>
    %202 = arith.addf %192, %201 : vector<8x64xf32>
    %203 = arith.truncf %202 : vector<8x64xf32> to vector<8x64xbf16>
    %c0_173 = arith.constant 0 : index
    %c0_174 = arith.constant 0 : index
    %c0_175 = arith.constant 0 : index
    %204 = vector.load %arg7[%c0_173, %c0_174, %c0_175] : memref<4x64x128xbf16, #tpu.memory_space<vmem>>, vector<1x64x128xbf16>
    %205 = vector.shape_cast %204 : vector<1x64x128xbf16> to vector<64x128xbf16>
    %cst_176 = arith.constant dense<0.000000e+00> : vector<8x128xf32>
    %206 = tpu.matmul %203, %205, %cst_176 {dimension_numbers = #tpu.dot_dimension_numbers<[1], [0], [0], [1], [0, 0, 1, 1], [], []>} : vector<8x64xbf16>, vector<64x128xbf16>, vector<8x128xf32> -> vector<8x128xf32>
    %207 = arith.addf %183, %206 : vector<8x128xf32>
    %208 = vector.extract_strided_slice %90 {offsets = [0, 2, 0], sizes = [8, 1, 64], strides = [1, 1, 1]} : vector<8x8x64xf32> to vector<8x1x64xf32>
    %209 = vector.shape_cast %208 : vector<8x1x64xf32> to vector<8x64xf32>
    %210 = vector.extract_strided_slice %90 {offsets = [0, 3, 0], sizes = [8, 1, 64], strides = [1, 1, 1]} : vector<8x8x64xf32> to vector<8x1x64xf32>
    %211 = vector.shape_cast %210 : vector<8x1x64xf32> to vector<8x64xf32>
    %212 = arith.maximumf %209, %211 : vector<8x64xf32>
    %213 = vector.broadcast %182 : vector<1x64xf32> to vector<8x64xf32>
    %214 = arith.addf %212, %213 : vector<8x64xf32>
    %cst_177 = arith.constant 0.000000e+00 : f32
    %215 = vector.broadcast %cst_177 : f32 to vector<8x64xf32>
    %216 = arith.maximumf %214, %215 : vector<8x64xf32>
    %217 = vector.extract_strided_slice %181 {offsets = [0, 2, 0], sizes = [8, 1, 64], strides = [1, 1, 1]} : vector<8x8x64xf32> to vector<8x1x64xf32>
    %218 = vector.shape_cast %217 : vector<8x1x64xf32> to vector<8x64xf32>
    %219 = vector.extract_strided_slice %181 {offsets = [0, 3, 0], sizes = [8, 1, 64], strides = [1, 1, 1]} : vector<8x8x64xf32> to vector<8x1x64xf32>
    %220 = vector.shape_cast %219 : vector<8x1x64xf32> to vector<8x64xf32>
    %221 = arith.maximumf %218, %220 : vector<8x64xf32>
    %222 = vector.broadcast %182 : vector<1x64xf32> to vector<8x64xf32>
    %223 = arith.addf %221, %222 : vector<8x64xf32>
    %cst_178 = arith.constant 0.000000e+00 : f32
    %224 = vector.broadcast %cst_178 : f32 to vector<8x64xf32>
    %225 = arith.maximumf %223, %224 : vector<8x64xf32>
    %226 = arith.addf %216, %225 : vector<8x64xf32>
    %227 = arith.truncf %226 : vector<8x64xf32> to vector<8x64xbf16>
    %c1_179 = arith.constant 1 : index
    %c0_180 = arith.constant 0 : index
    %c0_181 = arith.constant 0 : index
    %228 = vector.load %arg7[%c1_179, %c0_180, %c0_181] : memref<4x64x128xbf16, #tpu.memory_space<vmem>>, vector<1x64x128xbf16>
    %229 = vector.shape_cast %228 : vector<1x64x128xbf16> to vector<64x128xbf16>
    %cst_182 = arith.constant dense<0.000000e+00> : vector<8x128xf32>
    %230 = tpu.matmul %227, %229, %cst_182 {dimension_numbers = #tpu.dot_dimension_numbers<[1], [0], [0], [1], [0, 0, 1, 1], [], []>} : vector<8x64xbf16>, vector<64x128xbf16>, vector<8x128xf32> -> vector<8x128xf32>
    %231 = arith.addf %207, %230 : vector<8x128xf32>
    %232 = vector.extract_strided_slice %90 {offsets = [0, 4, 0], sizes = [8, 1, 64], strides = [1, 1, 1]} : vector<8x8x64xf32> to vector<8x1x64xf32>
    %233 = vector.shape_cast %232 : vector<8x1x64xf32> to vector<8x64xf32>
    %234 = vector.extract_strided_slice %90 {offsets = [0, 5, 0], sizes = [8, 1, 64], strides = [1, 1, 1]} : vector<8x8x64xf32> to vector<8x1x64xf32>
    %235 = vector.shape_cast %234 : vector<8x1x64xf32> to vector<8x64xf32>
    %236 = arith.maximumf %233, %235 : vector<8x64xf32>
    %237 = vector.broadcast %182 : vector<1x64xf32> to vector<8x64xf32>
    %238 = arith.addf %236, %237 : vector<8x64xf32>
    %cst_183 = arith.constant 0.000000e+00 : f32
    %239 = vector.broadcast %cst_183 : f32 to vector<8x64xf32>
    %240 = arith.maximumf %238, %239 : vector<8x64xf32>
    %241 = vector.extract_strided_slice %181 {offsets = [0, 4, 0], sizes = [8, 1, 64], strides = [1, 1, 1]} : vector<8x8x64xf32> to vector<8x1x64xf32>
    %242 = vector.shape_cast %241 : vector<8x1x64xf32> to vector<8x64xf32>
    %243 = vector.extract_strided_slice %181 {offsets = [0, 5, 0], sizes = [8, 1, 64], strides = [1, 1, 1]} : vector<8x8x64xf32> to vector<8x1x64xf32>
    %244 = vector.shape_cast %243 : vector<8x1x64xf32> to vector<8x64xf32>
    %245 = arith.maximumf %242, %244 : vector<8x64xf32>
    %246 = vector.broadcast %182 : vector<1x64xf32> to vector<8x64xf32>
    %247 = arith.addf %245, %246 : vector<8x64xf32>
    %cst_184 = arith.constant 0.000000e+00 : f32
    %248 = vector.broadcast %cst_184 : f32 to vector<8x64xf32>
    %249 = arith.maximumf %247, %248 : vector<8x64xf32>
    %250 = arith.addf %240, %249 : vector<8x64xf32>
    %251 = arith.truncf %250 : vector<8x64xf32> to vector<8x64xbf16>
    %c2_185 = arith.constant 2 : index
    %c0_186 = arith.constant 0 : index
    %c0_187 = arith.constant 0 : index
    %252 = vector.load %arg7[%c2_185, %c0_186, %c0_187] : memref<4x64x128xbf16, #tpu.memory_space<vmem>>, vector<1x64x128xbf16>
    %253 = vector.shape_cast %252 : vector<1x64x128xbf16> to vector<64x128xbf16>
    %cst_188 = arith.constant dense<0.000000e+00> : vector<8x128xf32>
    %254 = tpu.matmul %251, %253, %cst_188 {dimension_numbers = #tpu.dot_dimension_numbers<[1], [0], [0], [1], [0, 0, 1, 1], [], []>} : vector<8x64xbf16>, vector<64x128xbf16>, vector<8x128xf32> -> vector<8x128xf32>
    %255 = arith.addf %231, %254 : vector<8x128xf32>
    %256 = vector.extract_strided_slice %90 {offsets = [0, 6, 0], sizes = [8, 1, 64], strides = [1, 1, 1]} : vector<8x8x64xf32> to vector<8x1x64xf32>
    %257 = vector.shape_cast %256 : vector<8x1x64xf32> to vector<8x64xf32>
    %258 = vector.extract_strided_slice %90 {offsets = [0, 7, 0], sizes = [8, 1, 64], strides = [1, 1, 1]} : vector<8x8x64xf32> to vector<8x1x64xf32>
    %259 = vector.shape_cast %258 : vector<8x1x64xf32> to vector<8x64xf32>
    %260 = arith.maximumf %257, %259 : vector<8x64xf32>
    %261 = vector.broadcast %182 : vector<1x64xf32> to vector<8x64xf32>
    %262 = arith.addf %260, %261 : vector<8x64xf32>
    %cst_189 = arith.constant 0.000000e+00 : f32
    %263 = vector.broadcast %cst_189 : f32 to vector<8x64xf32>
    %264 = arith.maximumf %262, %263 : vector<8x64xf32>
    %265 = vector.extract_strided_slice %181 {offsets = [0, 6, 0], sizes = [8, 1, 64], strides = [1, 1, 1]} : vector<8x8x64xf32> to vector<8x1x64xf32>
    %266 = vector.shape_cast %265 : vector<8x1x64xf32> to vector<8x64xf32>
    %267 = vector.extract_strided_slice %181 {offsets = [0, 7, 0], sizes = [8, 1, 64], strides = [1, 1, 1]} : vector<8x8x64xf32> to vector<8x1x64xf32>
    %268 = vector.shape_cast %267 : vector<8x1x64xf32> to vector<8x64xf32>
    %269 = arith.maximumf %266, %268 : vector<8x64xf32>
    %270 = vector.broadcast %182 : vector<1x64xf32> to vector<8x64xf32>
    %271 = arith.addf %269, %270 : vector<8x64xf32>
    %cst_190 = arith.constant 0.000000e+00 : f32
    %272 = vector.broadcast %cst_190 : f32 to vector<8x64xf32>
    %273 = arith.maximumf %271, %272 : vector<8x64xf32>
    %274 = arith.addf %264, %273 : vector<8x64xf32>
    %275 = arith.truncf %274 : vector<8x64xf32> to vector<8x64xbf16>
    %c3_191 = arith.constant 3 : index
    %c0_192 = arith.constant 0 : index
    %c0_193 = arith.constant 0 : index
    %276 = vector.load %arg7[%c3_191, %c0_192, %c0_193] : memref<4x64x128xbf16, #tpu.memory_space<vmem>>, vector<1x64x128xbf16>
    %277 = vector.shape_cast %276 : vector<1x64x128xbf16> to vector<64x128xbf16>
    %cst_194 = arith.constant dense<0.000000e+00> : vector<8x128xf32>
    %278 = tpu.matmul %275, %277, %cst_194 {dimension_numbers = #tpu.dot_dimension_numbers<[1], [0], [0], [1], [0, 0, 1, 1], [], []>} : vector<8x64xbf16>, vector<64x128xbf16>, vector<8x128xf32> -> vector<8x128xf32>
    %279 = arith.addf %255, %278 : vector<8x128xf32>
    %c0_195 = arith.constant 0 : index
    %c0_196 = arith.constant 0 : index
    %280 = vector.load %arg8[%c0_195, %c0_196] : memref<1x128xf32, #tpu.memory_space<vmem>>, vector<1x128xf32>
    %281 = vector.broadcast %280 : vector<1x128xf32> to vector<8x128xf32>
    %282 = arith.addf %279, %281 : vector<8x128xf32>
    %cst_197 = arith.constant 0.000000e+00 : f32
    %283 = vector.broadcast %cst_197 : f32 to vector<8x128xf32>
    %284 = arith.maximumf %282, %283 : vector<8x128xf32>
    %285 = arith.truncf %284 : vector<8x128xf32> to vector<8x128xbf16>
    %c0_198 = arith.constant 0 : index
    %c0_199 = arith.constant 0 : index
    %286 = vector.load %arg9[%c0_198, %c0_199] : memref<128x128xbf16, #tpu.memory_space<vmem>>, vector<128x128xbf16>
    %cst_200 = arith.constant dense<0.000000e+00> : vector<8x128xf32>
    %287 = tpu.matmul %285, %286, %cst_200 {dimension_numbers = #tpu.dot_dimension_numbers<[1], [0], [0], [1], [0, 0, 1, 1], [], []>} : vector<8x128xbf16>, vector<128x128xbf16>, vector<8x128xf32> -> vector<8x128xf32>
    %c0_201 = arith.constant 0 : index
    %c0_202 = arith.constant 0 : index
    %288 = vector.load %arg10[%c0_201, %c0_202] : memref<1x128xf32, #tpu.memory_space<vmem>>, vector<1x128xf32>
    %289 = vector.broadcast %288 : vector<1x128xf32> to vector<8x128xf32>
    %290 = arith.addf %287, %289 : vector<8x128xf32>
    %cst_203 = arith.constant 0.000000e+00 : f32
    %291 = vector.broadcast %cst_203 : f32 to vector<8x128xf32>
    %292 = arith.maximumf %290, %291 : vector<8x128xf32>
    %293 = arith.truncf %292 : vector<8x128xf32> to vector<8x128xbf16>
    %c0_204 = arith.constant 0 : index
    %c0_205 = arith.constant 0 : index
    %294 = vector.load %arg11[%c0_204, %c0_205] : memref<128x128xbf16, #tpu.memory_space<vmem>>, vector<128x128xbf16>
    %cst_206 = arith.constant dense<0.000000e+00> : vector<8x128xf32>
    %295 = tpu.matmul %293, %294, %cst_206 {dimension_numbers = #tpu.dot_dimension_numbers<[1], [0], [0], [1], [0, 0, 1, 1], [], []>} : vector<8x128xbf16>, vector<128x128xbf16>, vector<8x128xf32> -> vector<8x128xf32>
    %c0_207 = arith.constant 0 : index
    %c0_208 = arith.constant 0 : index
    %296 = vector.load %arg12[%c0_207, %c0_208] : memref<1x128xf32, #tpu.memory_space<vmem>>, vector<1x128xf32>
    %297 = vector.broadcast %296 : vector<1x128xf32> to vector<8x128xf32>
    %298 = arith.addf %295, %297 : vector<8x128xf32>
    %cst_209 = arith.constant dense<0xFF800000> : vector<8xf32>
    %299 = vector.multi_reduction <maximumf>, %298, %cst_209 [1] : vector<8x128xf32> to vector<8xf32>
    %300 = vector.shape_cast %299 : vector<8xf32> to vector<8x1xf32>
    %301 = vector.broadcast %300 : vector<8x1xf32> to vector<8x128xf32>
    %302 = arith.subf %298, %301 : vector<8x128xf32>
    %303 = math.exp %302 : vector<8x128xf32>
    %cst_210 = arith.constant dense<0.000000e+00> : vector<8xf32>
    %304 = vector.multi_reduction <add>, %303, %cst_210 [1] : vector<8x128xf32> to vector<8xf32>
    %305 = vector.shape_cast %304 : vector<8xf32> to vector<8x1xf32>
    %306 = tpu.reciprocal %305 {approx = true} : vector<8x1xf32> -> vector<8x1xf32>
    %307 = vector.broadcast %306 : vector<8x1xf32> to vector<8x128xf32>
    %308 = arith.mulf %303, %307 : vector<8x128xf32>
    %c0_211 = arith.constant 0 : index
    %c0_212 = arith.constant 0 : index
    %309 = vector.load %arg13[%c0_211, %c0_212] : memref<8x128xf32, #tpu.memory_space<vmem>>, vector<8x128xf32>
    tpu.vector_store %arg13[%c0_211, %c0_212], %308 {strides = array<i32>} : memref<8x128xf32, #tpu.memory_space<vmem>>, vector<8x128xf32>,
    return
  }
  func.func @transform_0(%arg0: i32) -> (i32, i32, i32) {
    %c0_i32 = arith.constant 0 : i32
    %c0_i32_0 = arith.constant 0 : i32
    %c0_i32_1 = arith.constant 0 : i32
    return %arg0, %c0_i32, %c0_i32_0 : i32, i32, i32
  }
  func.func @transform_1(%arg0: i32) -> (i32, i32, i32) {
    %c0_i32 = arith.constant 0 : i32
    %c0_i32_0 = arith.constant 0 : i32
    %c0_i32_1 = arith.constant 0 : i32
    return %arg0, %c0_i32, %c0_i32_0 : i32, i32, i32
  }
  func.func @transform_2(%arg0: i32) -> (i32, i32, i32) {
    %c0_i32 = arith.constant 0 : i32
    %c0_i32_0 = arith.constant 0 : i32
    %c0_i32_1 = arith.constant 0 : i32
    %c0_i32_2 = arith.constant 0 : i32
    return %c0_i32, %c0_i32_0, %c0_i32_1 : i32, i32, i32
  }
  func.func @transform_3(%arg0: i32) -> (i32, i32) {
    %c0_i32 = arith.constant 0 : i32
    %c0_i32_0 = arith.constant 0 : i32
    %c0_i32_1 = arith.constant 0 : i32
    return %c0_i32, %c0_i32_0 : i32, i32
  }
  func.func @transform_4(%arg0: i32) -> (i32, i32, i32) {
    %c0_i32 = arith.constant 0 : i32
    %c0_i32_0 = arith.constant 0 : i32
    %c0_i32_1 = arith.constant 0 : i32
    %c0_i32_2 = arith.constant 0 : i32
    return %c0_i32, %c0_i32_0, %c0_i32_1 : i32, i32, i32
  }
  func.func @transform_5(%arg0: i32) -> (i32, i32) {
    %c0_i32 = arith.constant 0 : i32
    %c0_i32_0 = arith.constant 0 : i32
    %c0_i32_1 = arith.constant 0 : i32
    return %c0_i32, %c0_i32_0 : i32, i32
  }
  func.func @transform_6(%arg0: i32) -> (i32, i32, i32) {
    %c0_i32 = arith.constant 0 : i32
    %c0_i32_0 = arith.constant 0 : i32
    %c0_i32_1 = arith.constant 0 : i32
    %c0_i32_2 = arith.constant 0 : i32
    return %c0_i32, %c0_i32_0, %c0_i32_1 : i32, i32, i32
  }
  func.func @transform_7(%arg0: i32) -> (i32, i32) {
    %c0_i32 = arith.constant 0 : i32
    %c0_i32_0 = arith.constant 0 : i32
    %c0_i32_1 = arith.constant 0 : i32
    return %c0_i32, %c0_i32_0 : i32, i32
  }
  func.func @transform_8(%arg0: i32) -> (i32, i32) {
    %c0_i32 = arith.constant 0 : i32
    %c0_i32_0 = arith.constant 0 : i32
    %c0_i32_1 = arith.constant 0 : i32
    return %c0_i32, %c0_i32_0 : i32, i32
  }
  func.func @transform_9(%arg0: i32) -> (i32, i32) {
    %c0_i32 = arith.constant 0 : i32
    %c0_i32_0 = arith.constant 0 : i32
    %c0_i32_1 = arith.constant 0 : i32
    return %c0_i32, %c0_i32_0 : i32, i32
  }
  func.func @transform_10(%arg0: i32) -> (i32, i32) {
    %c0_i32 = arith.constant 0 : i32
    %c0_i32_0 = arith.constant 0 : i32
    %c0_i32_1 = arith.constant 0 : i32
    return %c0_i32, %c0_i32_0 : i32, i32
  }
  func.func @transform_11(%arg0: i32) -> (i32, i32) {
    %c0_i32 = arith.constant 0 : i32
    %c0_i32_0 = arith.constant 0 : i32
    %c0_i32_1 = arith.constant 0 : i32
    return %c0_i32, %c0_i32_0 : i32, i32
  }
  func.func @transform_12(%arg0: i32) -> (i32, i32) {
    %c0_i32 = arith.constant 0 : i32
    %c0_i32_0 = arith.constant 0 : i32
    return %arg0, %c0_i32 : i32, i32
  }
}

</mosaic_0001>

<bundles_post_ra>
// kernel: separate_baseline_forward.1
= control target key start
LH: loop header
LB: loop body
LE: loop exit
PB: predicated region body
PF: predicated region fallthrough
CT: control target
= control target key end

     0   :  { %v7191_v1 = vmov 0   ;;  %vm178_vm0 = vcmask 1045504   ;;  %vm141_vm1 = vcmask 228352   ;;  %s7192_s13 = smov 56   ;;  %vm1916_vm2 = vcmask 1043456   ;;  %s7193_s26 = smov 64   ;;  %s9312_s2 = inlined_call_operand.vmem [shape: bf16[5,28,144], index: 2, kind: input, shape index: {}]   ;;  %s9313_s0 = inlined_call_operand.vmem [shape: f32[8,28,28], index: 0, kind: input, shape index: {}]   ;;  %s9314_s4 = inlined_call_operand.vmem [shape: bf16[5,72,128], index: 4, kind: input, shape index: {}]   ;;  %s9315_s3 = inlined_call_operand.vmem [shape: f32[1,72], index: 3, kind: input, shape index: {}]   ;;  %s9316_s1 = inlined_call_operand.vmem [shape: f32[8,28,28], index: 1, kind: input, shape index: {}]   ;;  %s9317_s6 = inlined_call_operand.vmem [shape: bf16[4,64,128], index: 6, kind: input, shape index: {}]   ;;  %s9318_s8 = inlined_call_operand.vmem [shape: bf16[128,128], index: 8, kind: input, shape index: {}]   ;;  %s9319_s5 = inlined_call_operand.vmem [shape: f32[1,64], index: 5, kind: input, shape index: {}]   ;;  %s9320_s10 = inlined_call_operand.vmem [shape: bf16[128,128], index: 10, kind: input, shape index: {}]   ;;  %s9321_s7 = inlined_call_operand.vmem [shape: f32[1,128], index: 7, kind: input, shape index: {}]   ;;  %s9322_s9 = inlined_call_operand.vmem [shape: f32[1,128], index: 9, kind: input, shape index: {}]   ;;  %s9323_s11 = inlined_call_operand.vmem [shape: f32[1,128], index: 11, kind: input, shape index: {}]   ;;  %s9324_s12 = inlined_call_operand.vmem [shape: f32[8,128], index: 12, kind: output, shape index: {}]  }
   0x1   :  { %v7044_v0 = vld [vmem:[%s9312_s2 + $0x24] ss:$8 sps:$4 sm:$0xff]   ;;  %217 = vmatprep.mubr.bf16.mxu0 %v7191_v1  ;;  %v7046_v2 = vld [vmem:[%s9312_s2 + $0x20] ss:$8 sps:$4 sm:$0xff]   ;;  %v84_v13 = vld [vmem:[%s9313_s0 + $0x11] sm:$0xff]  ;;  %vm1601_vm3 = vcmask 457728  }
   0x2   :  { %185 = vmatprep.subr.bf16.mxu0 %v7044_v0  ;;  %v7047_v3 = vld [vmem:[%s9312_s2 + $0x34] ss:$8 sps:$4 sm:$0x3f]   ;;  %v7049_v4 = vld [vmem:[%s9312_s2 + $0x30] ss:$8 sps:$4 sm:$0x3f]  }
   0x3   :  { %186 = vmatpush1.bf16.msra.mxu0 %v7046_v2  ;;  %v82_v5 = vld [vmem:[%s9313_s0 + $0x1] sm:$0xff]  ;;  %v83_v6 = vld [vmem:[%s9313_s0 + $0x9] sm:$0xff]  ;;  %v180_v7 = vsel %vm178_vm0, %v7049_v4, 0  ;;  %v7053_v11 = vld [vmem:[%s9312_s2 + $0x14] ss:$8 sps:$4 sm:$0x3f]  }
   0x4   :  { %5763 = vmatprep.subr.msk.bf16.mxu0 %vm178_vm0, %v7047_v3  ;;  %v7052_v8 = vld [vmem:[%s9312_s2 + $0x4] ss:$8 sps:$4 sm:$0xff]   ;;  %v106_v9 = vpack.c.bf16 %v83_v6, %v82_v5  ;;  %v7050_v10 = vld [vmem:[%s9312_s2] ss:$8 sps:$4 sm:$0xff]   ;;  %v87_v19 = vld [vmem:[%s9313_s0 + $0x31] sm:$0xff]  ;;  %vm1674_vm4 = vcmask 588800  }
   0x5   :  { %v7055_v12 = vld [vmem:[%s9312_s2 + $0x10] ss:$8 sps:$4 sm:$0x3f]   ;;  %v85_v14 = vld [vmem:[%s9313_s0 + $0x21] sm:$0xff]  ;;  %vm1818_vm5 = vcmask 584704   ;;  %vm7195_vm6 = vmmov 0  }
   0x6   :  { %v393_v15 = vsel %vm178_vm0, %v7055_v12, 0  ;;  %v107_v16 = vpack.c.bf16 %v85_v14, %v84_v13  ;;  %v7058_v17 = vld [vmem:[%s9312_s2 + $0x44] ss:$8 sps:$4 sm:$0xff]   ;;  %v90_v24 = vld [vmem:[%s9313_s0 + $0x51] sm:$0xff]  ;;  %v7056_v51 = vld [vmem:[%s9312_s2 + $0x40] ss:$8 sps:$4 sm:$0xff]  }
   0x7   :  { %188 = vmatpush1.bf16.msra.mxu0 %v180_v7  ;;  %v86_v18 = vld [vmem:[%s9313_s0 + $0x29] sm:$0xff]  ;;  %v88_v21 = vld [vmem:[%s9313_s0 + $0x41] sm:$0xff]  ;;  %v93_v28 = vld [vmem:[%s9313_s0 + $0x71] sm:$0xff]  ;;  %vm5153_vm7 = vcmask 1041409   ;;  %vm5155_vm8 = vcmask 1042434   ;;  %vm5158_vm9 = vcmask 1043459  }
   0x8   :  { %398 = vmatprep.subr.bf16.mxu0 %v7052_v8  ;;  %v108_v20 = vpack.c.bf16 %v87_v19, %v86_v18  ;;  %v89_v22 = vld [vmem:[%s9313_s0 + $0x49] sm:$0xff]  ;;  %v91_v25 = vld [vmem:[%s9313_s0 + $0x61] sm:$0xff]  ;;  %v96_v33 = vld [vmem:[%s9313_s0 + $0x91] sm:$0xff]  ;;  %vm5161_vm10 = vcmask 1044484   ;;  %vm5164_vm11 = vcmask 1045509   ;;  %vm5167_vm12 = vcmask 1046534  }
   0x9   :  { %v109_v23 = vpack.c.bf16 %v89_v22, %v88_v21  ;;  %v110_v26 = vpack.c.bf16 %v91_v25, %v90_v24  ;;  %v92_v27 = vld [vmem:[%s9313_s0 + $0x69] sm:$0xff]  ;;  %v94_v30 = vld [vmem:[%s9313_s0 + $0x81] sm:$0xff]  ;;  %v99_v37 = vld [vmem:[%s9313_s0 + $0xb1] sm:$0xff]  ;;  %vm5170_vm13 = vcmask 1047559   ;;  %vm5197_vm14 = vcmask 523264  }
   0xa   :  { %5764 = vmatmul.mubr.msk.bf16.vlgmr.msra.gmra.mrb[0].mxu0 %vm141_vm1, %v106_v9  ;;  %v111_v29 = vpack.c.bf16 %v93_v28, %v92_v27  ;;  %v95_v31 = vld [vmem:[%s9313_s0 + $0x89] sm:$0xff]  ;;  %v97_v34 = vld [vmem:[%s9313_s0 + $0xa1] sm:$0xff]  ;;  %v102_v42 = vld [vmem:[%s9313_s0 + $0xd1] sm:$0xff] }
   0xb   :  { %399 = vmatpush1.bf16.msra.mxu0 %v7050_v10  ;;  %227 = vmatprep.mubr.bf16.mxu0 %v7191_v1  ;;  %v112_v32 = vpack.c.bf16 %v95_v31, %v94_v30  ;;  %v113_v35 = vpack.c.bf16 %v97_v34, %v96_v33  ;;  %v98_v36 = vld [vmem:[%s9313_s0 + $0xa9] sm:$0xff]  ;;  %v100_v39 = vld [vmem:[%s9313_s0 + $0xc1] sm:$0xff]  ;;  %v105_v46 = vld [vmem:[%s9313_s0 + $0xf1] sm:$0xff] }
   0xc   :  { %5780 = vmatprep.subr.msk.bf16.mxu0 %vm178_vm0, %v7053_v11  ;;  %v114_v38 = vpack.c.bf16 %v99_v37, %v98_v36  ;;  %v101_v40 = vld [vmem:[%s9313_s0 + $0xc9] sm:$0xff]  ;;  %v103_v43 = vld [vmem:[%s9313_s0 + $0xe1] sm:$0xff]  ;;  %v7059_v52 = vld [vmem:[%s9312_s2 + $0x54] ss:$8 sps:$4 sm:$0x3f]  }
   0xd   :  { %v115_v41 = vpack.c.bf16 %v101_v40, %v100_v39  ;;  %v116_v44 = vpack.c.bf16 %v103_v43, %v102_v42  ;;  %v104_v45 = vld [vmem:[%s9313_s0 + $0xe9] sm:$0xff]  ;;  %v42_v48 = vld [vmem:[%s9313_s0] sm:$0xff]  ;;  %v7065_v30 = vld [vmem:[%s9312_s2 + $0x74] ss:$8 sps:$4 sm:$0x3f]  }
   0xe   :  { %v117_v47 = vpack.c.bf16 %v105_v46, %v104_v45  ;;  %v43_v49 = vld [vmem:[%s9313_s0 + $0x8] sm:$0xff]  ;;  %v7061_v53 = vld [vmem:[%s9312_s2 + $0x50] ss:$8 sps:$4 sm:$0x3f]   ;;  %v45_v55 = vld [vmem:[%s9313_s0 + $0x20] sm:$0xff] }
   0xf   :  { %401 = vmatpush1.bf16.msra.mxu0 %v393_v15  ;;  %v66_v50 = vpack.c.bf16 %v43_v49, %v42_v48  ;;  %v44_v54 = vld [vmem:[%s9313_s0 + $0x10] sm:$0xff]  ;;  %v647_v56 = vsel %vm178_vm0, %v7061_v53, 0  ;;  %v7064_v57 = vld [vmem:[%s9312_s2 + $0x64] ss:$8 sps:$4 sm:$0xff]  }
  0x10   :  { %652 = vmatprep.subr.bf16.mxu0 %v7058_v17  ;;  %v67_v58 = vpack.c.bf16 %v45_v55, %v44_v54  ;;  %v46_v59 = vld [vmem:[%s9313_s0 + $0x28] sm:$0xff]  ;;  %v47_v60 = vld [vmem:[%s9313_s0 + $0x30] sm:$0xff]  ;;  %v48_v62 = vld [vmem:[%s9313_s0 + $0x40] sm:$0xff] }
  0x11   :  { %v68_v61 = vpack.c.bf16 %v47_v60, %v46_v59  ;;  %v49_v63 = vld [vmem:[%s9313_s0 + $0x48] sm:$0xff]  ;;  %v50_v2 = vld [vmem:[%s9313_s0 + $0x50] sm:$0xff]  ;;  %v51_v3 = vld [vmem:[%s9313_s0 + $0x60] sm:$0xff] }
  0x12   :  { %5765 = vmatmul.mubr.msk.bf16.gmra.mrb[4].mxu0 %vm141_vm1, %v107_v16  ;;  %v69_v0 = vpack.c.bf16 %v49_v63, %v48_v62  ;;  %v70_v4 = vpack.c.bf16 %v51_v3, %v50_v2  ;;  %v52_v5 = vld [vmem:[%s9313_s0 + $0x68] sm:$0xff]  ;;  %v53_v6 = vld [vmem:[%s9313_s0 + $0x70] sm:$0xff]  ;;  %v54_v8 = vld [vmem:[%s9313_s0 + $0x80] sm:$0xff] }
  0x13   :  { %237 = vmatprep.mubr.bf16.mxu0 %v7191_v1  ;;  %v71_v7 = vpack.c.bf16 %v53_v6, %v52_v5  ;;  %v55_v9 = vld [vmem:[%s9313_s0 + $0x88] sm:$0xff]  ;;  %v56_v11 = vld [vmem:[%s9313_s0 + $0x90] sm:$0xff]  ;;  %v57_v12 = vld [vmem:[%s9313_s0 + $0xa0] sm:$0xff] }
  0x14   :  { %v72_v10 = vpack.c.bf16 %v55_v9, %v54_v8  ;;  %v73_v13 = vpack.c.bf16 %v57_v12, %v56_v11  ;;  %v58_v14 = vld [vmem:[%s9313_s0 + $0xa8] sm:$0xff]  ;;  %v59_v15 = vld [vmem:[%s9313_s0 + $0xb0] sm:$0xff]  ;;  %v60_v17 = vld [vmem:[%s9313_s0 + $0xc0] sm:$0xff] }
  0x15   :  { %v74_v16 = vpack.c.bf16 %v59_v15, %v58_v14  ;;  %v61_v18 = vld [vmem:[%s9313_s0 + $0xc8] sm:$0xff]  ;;  %v63_v21 = vld [vmem:[%s9313_s0 + $0xe0] sm:$0xff]  ;;  %v65_v24 = vld [vmem:[%s9313_s0 + $0xf0] sm:$0xff] }
  0x16   :  { %v75_v19 = vpack.c.bf16 %v61_v18, %v60_v17  ;;  %v552_v27 = vld [vmem:[%s9313_s0 + $0xa] sm:$0xff]  ;;  %v554_v33 = vld [vmem:[%s9313_s0 + $0x22] sm:$0xff]  ;;  %v559_v43 = vld [vmem:[%s9313_s0 + $0x52] sm:$0xff] }
  0x17   :  { %v7067_v31 = vld [vmem:[%s9312_s2 + $0x70] ss:$8 sps:$4 sm:$0x3f]   ;;  %v557_v40 = vld [vmem:[%s9313_s0 + $0x42] sm:$0xff] }
  0x18   :  { %v949_v34 = vsel %vm178_vm0, %v7067_v31, 0  ;;  %v555_v37 = vld [vmem:[%s9313_s0 + $0x2a] sm:$0xff]  ;;  %v563_v49 = vld [vmem:[%s9313_s0 + $0x82] sm:$0xff]  ;;  %v574_v2 = vld [vmem:[%s9313_s0 + $0xf2] sm:$0xff] }
  0x19   :  { %v561_v46 = vld [vmem:[%s9313_s0 + $0x6a] sm:$0xff]  ;;  %v566_v53 = vld [vmem:[%s9313_s0 + $0xa2] sm:$0xff]  ;;  %v7071_v8 = vld [vmem:[%s9312_s2 + $0x94] ss:$8 sps:$4 sm:$0x3f]  }
  0x1a   :  { %5766 = vmatmul.mubr.msk.bf16.gmra.mrb[8].mxu0 %vm141_vm1, %v108_v20  ;;  %v62_v20 = vld [vmem:[%s9313_s0 + $0xd0] sm:$0xff]  ;;  %v572_v62 = vld [vmem:[%s9313_s0 + $0xe2] sm:$0xff] }
  0x1b   :  { %247 = vmatprep.mubr.bf16.mxu0 %v7191_v1  ;;  %v76_v22 = vpack.c.bf16 %v63_v21, %v62_v20  ;;  %v567_v55 = vld [vmem:[%s9313_s0 + $0xaa] sm:$0xff]  ;;  %v858_v15 = vld [vmem:[%s9313_s0 + $0x33] sm:$0xff] }
  0x1c   :  { %v570_v59 = vld [vmem:[%s9313_s0 + $0xca] sm:$0xff]  ;;  %v861_v20 = vld [vmem:[%s9313_s0 + $0x53] sm:$0xff] }
  0x1d   :  { %v854_v5 = vld [vmem:[%s9313_s0 + $0xb] sm:$0xff]  ;;  %v856_v11 = vld [vmem:[%s9313_s0 + $0x23] sm:$0xff] }
  0x1e   :  { %v7073_v9 = vld [vmem:[%s9312_s2 + $0x90] ss:$8 sps:$4 sm:$0x3f]   ;;  %v859_v17 = vld [vmem:[%s9313_s0 + $0x43] sm:$0xff] }
  0x1f   :  { %v1251_v12 = vsel %vm178_vm0, %v7073_v9, 0  ;;  %v857_v14 = vld [vmem:[%s9313_s0 + $0x2b] sm:$0xff]  ;;  %v862_v21 = vld [vmem:[%s9313_s0 + $0x63] sm:$0xff] }
  0x20   :  { %v860_v18 = vld [vmem:[%s9313_s0 + $0x4b] sm:$0xff] }
  0x21   :  { %v1174_v9 = vld [vmem:[%s9313_s0 + $0xcc] sm:$0xff] }
  0x22   :  { %5767 = vmatmul.mubr.msk.bf16.gmra.mrb[12].mxu0 %vm141_vm1, %v109_v23  ;;  %v64_v23 = vld [vmem:[%s9313_s0 + $0xe8] sm:$0xff] }
  0x23   :  { %257 = vmatprep.mubr.bf16.mxu0 %v7191_v1  ;;  %v77_v25 = vpack.c.bf16 %v65_v24, %v64_v23  ;;  %v863_v23 = vld [vmem:[%s9313_s0 + $0x6b] sm:$0xff]  ;;  %v864_v24 = vld [vmem:[%s9313_s0 + $0x73] sm:$0xff] }
  0x2a   :  { %5768 = vmatmul.mubr.msk.bf16.gmra.mrb[16].mxu0 %vm141_vm1, %v110_v26  ;;  %v551_v26 = vld [vmem:[%s9313_s0 + $0x2] sm:$0xff] }
  0x2b   :  { %267 = vmatprep.mubr.bf16.mxu0 %v7191_v1  ;;  %v575_v28 = vpack.c.bf16 %v552_v27, %v551_v26  ;;  %v865_v26 = vld [vmem:[%s9313_s0 + $0x83] sm:$0xff]  ;;  %v866_v27 = vld [vmem:[%s9313_s0 + $0x8b] sm:$0xff] }
  0x32   :  { %5769 = vmatmul.mubr.msk.bf16.gmra.mrb[20].mxu0 %vm141_vm1, %v111_v29  ;;  %v7062_v29 = vld [vmem:[%s9312_s2 + $0x60] ss:$8 sps:$4 sm:$0xff]  }
  0x33   :  { %277 = vmatprep.mubr.bf16.mxu0 %v7191_v1 }
  0x3a   :  { %5770 = vmatmul.mubr.msk.bf16.gmra.mrb[24].mxu0 %vm141_vm1, %v112_v32  ;;  %v553_v32 = vld [vmem:[%s9313_s0 + $0x12] sm:$0xff] }
  0x3b   :  { %287 = vmatprep.mubr.bf16.mxu0 %v7191_v1  ;;  %v576_v36 = vpack.c.bf16 %v554_v33, %v553_v32  ;;  %v869_v32 = vld [vmem:[%s9313_s0 + $0xab] sm:$0xff]  ;;  %v870_v33 = vld [vmem:[%s9313_s0 + $0xb3] sm:$0xff] }
  0x42   :  { %5771 = vmatmul.mubr.msk.bf16.gmra.mrb[28].mxu0 %vm141_vm1, %v113_v35  ;;  %v7070_v35 = vld [vmem:[%s9312_s2 + $0x84] ss:$8 sps:$4 sm:$0xff]  }
  0x43   :  { %297 = vmatprep.mubr.bf16.mxu0 %v7191_v1 }
  0x4a   :  { %5772 = vmatmul.mubr.msk.bf16.gmra.mrb[32].mxu0 %vm141_vm1, %v114_v38  ;;  %v556_v38 = vld [vmem:[%s9313_s0 + $0x32] sm:$0xff] }
  0x4b   :  { %307 = vmatprep.mubr.bf16.mxu0 %v7191_v1  ;;  %v577_v39 = vpack.c.bf16 %v556_v38, %v555_v37  ;;  %v873_v38 = vld [vmem:[%s9313_s0 + $0xd3] sm:$0xff] }
  0x52   :  { %5773 = vmatmul.mubr.msk.bf16.gmra.mrb[36].mxu0 %vm141_vm1, %v115_v41  ;;  %v558_v41 = vld [vmem:[%s9313_s0 + $0x4a] sm:$0xff] }
  0x53   :  { %317 = vmatprep.mubr.bf16.mxu0 %v7191_v1  ;;  %v578_v42 = vpack.c.bf16 %v558_v41, %v557_v40  ;;  %v875_v41 = vld [vmem:[%s9313_s0 + $0xeb] sm:$0xff] }
  0x5a   :  { %5774 = vmatmul.mubr.msk.bf16.gmra.mrb[40].mxu0 %vm141_vm1, %v116_v44  ;;  %v560_v44 = vld [vmem:[%s9313_s0 + $0x62] sm:$0xff] }
  0x5b   :  { %327 = vmatprep.mubr.bf16.mxu0 %v7191_v1  ;;  %v579_v45 = vpack.c.bf16 %v560_v44, %v559_v43  ;;  %v1155_v44 = vld [vmem:[%s9313_s0 + $0x4] sm:$0xff] }
  0x62   :  { %5775 = vmatmul.mubr.msk.bf16.gmra.mrb[44].mxu0 %vm141_vm1, %v117_v47  ;;  %v562_v47 = vld [vmem:[%s9313_s0 + $0x72] sm:$0xff] }
  0x63   :  { %430 = vmatprep.mubr.bf16.mxu0 %v7191_v1  ;;  %v580_v48 = vpack.c.bf16 %v562_v47, %v561_v46  ;;  %v1157_v47 = vld [vmem:[%s9313_s0 + $0x14] sm:$0xff] }
  0x6a   :  { %5781 = vmatmul.mubr.msk.bf16.vlgmr.msra.gmra.mrb[0].mxu0 %vm141_vm1, %v66_v50  ;;  %v564_v50 = vld [vmem:[%s9313_s0 + $0x8a] sm:$0xff] }
  0x6b   :  { %653 = vmatpush1.bf16.msra.mxu0 %v7056_v51  ;;  %440 = vmatprep.mubr.bf16.mxu0 %v7191_v1  ;;  %v581_v51 = vpack.c.bf16 %v564_v50, %v563_v49  ;;  %v1159_v50 = vld [vmem:[%s9313_s0 + $0x2c] sm:$0xff] }
  0x6c   :  { %5801 = vmatprep.subr.msk.bf16.mxu0 %vm178_vm0, %v7059_v52  ;;  %v565_v52 = vld [vmem:[%s9313_s0 + $0x92] sm:$0xff] }
  0x6d   :  { %v582_v54 = vpack.c.bf16 %v566_v53, %v565_v52  ;;  %v1161_v53 = vld [vmem:[%s9313_s0 + $0x44] sm:$0xff] }
  0x6f   :  { %655 = vmatpush1.bf16.msra.mxu0 %v647_v56  ;;  %v568_v56 = vld [vmem:[%s9313_s0 + $0xb2] sm:$0xff] }
  0x70   :  { %954 = vmatprep.subr.bf16.mxu0 %v7064_v57  ;;  %v583_v57 = vpack.c.bf16 %v568_v56, %v567_v55  ;;  %v1163_v56 = vld [vmem:[%s9313_s0 + $0x54] sm:$0xff] }
  0x72   :  { %5782 = vmatmul.mubr.msk.bf16.gmra.mrb[4].mxu0 %vm141_vm1, %v67_v58  ;;  %v569_v58 = vld [vmem:[%s9313_s0 + $0xc2] sm:$0xff] }
  0x73   :  { %450 = vmatprep.mubr.bf16.mxu0 %v7191_v1  ;;  %v584_v60 = vpack.c.bf16 %v570_v59, %v569_v58  ;;  %v1165_v59 = vld [vmem:[%s9313_s0 + $0x6c] sm:$0xff] }
  0x7a   :  { %5783 = vmatmul.mubr.msk.bf16.gmra.mrb[8].mxu0 %vm141_vm1, %v68_v61  ;;  %v571_v61 = vld [vmem:[%s9313_s0 + $0xd2] sm:$0xff] }
  0x7b   :  { %460 = vmatprep.mubr.bf16.mxu0 %v7191_v1  ;;  %v585_v63 = vpack.c.bf16 %v572_v62, %v571_v61  ;;  %v1167_v62 = vld [vmem:[%s9313_s0 + $0x84] sm:$0xff] }
  0x82   :  { %5784 = vmatmul.mubr.msk.bf16.gmra.mrb[12].mxu0 %vm141_vm1, %v69_v0  ;;  %v573_v0 = vld [vmem:[%s9313_s0 + $0xea] sm:$0xff] }
  0x83   :  { %470 = vmatprep.mubr.bf16.mxu0 %v7191_v1  ;;  %v586_v3 = vpack.c.bf16 %v574_v2, %v573_v0  ;;  %v1169_v2 = vld [vmem:[%s9313_s0 + $0x94] sm:$0xff] }
  0x8a   :  { %5785 = vmatmul.mubr.msk.bf16.gmra.mrb[16].mxu0 %vm141_vm1, %v70_v4  ;;  %v853_v4 = vld [vmem:[%s9313_s0 + $0x3] sm:$0xff] }
  0x8b   :  { %480 = vmatprep.mubr.bf16.mxu0 %v7191_v1  ;;  %v877_v6 = vpack.c.bf16 %v854_v5, %v853_v4  ;;  %v1171_v5 = vld [vmem:[%s9313_s0 + $0xac] sm:$0xff] }
  0x92   :  { %5786 = vmatmul.mubr.msk.bf16.gmra.mrb[20].mxu0 %vm141_vm1, %v71_v7  ;;  %v7068_v7 = vld [vmem:[%s9312_s2 + $0x80] ss:$8 sps:$4 sm:$0xff]  }
  0x93   :  { %490 = vmatprep.mubr.bf16.mxu0 %v7191_v1 }
  0x9a   :  { %5787 = vmatmul.mubr.msk.bf16.gmra.mrb[24].mxu0 %vm141_vm1, %v72_v10  ;;  %v855_v10 = vld [vmem:[%s9313_s0 + $0x13] sm:$0xff] }
  0x9b   :  { %500 = vmatprep.mubr.bf16.mxu0 %v7191_v1 }
  0xa2   :  { %5788 = vmatmul.mubr.msk.bf16.gmra.mrb[28].mxu0 %vm141_vm1, %v73_v13  ;;  %v878_v13 = vpack.c.bf16 %v856_v11, %v855_v10  ;;  %v1175_v11 = vld [vmem:[%s9313_s0 + $0xd4] sm:$0xff] }
  0xa3   :  { %510 = vmatprep.mubr.bf16.mxu0 %v7191_v1 }
  0xaa   :  { %5789 = vmatmul.mubr.msk.bf16.gmra.mrb[32].mxu0 %vm141_vm1, %v74_v16  ;;  %v879_v16 = vpack.c.bf16 %v858_v15, %v857_v14  ;;  %v1177_v14 = vld [vmem:[%s9313_s0 + $0xec] sm:$0xff]  ;;  %v1178_v15 = vld [vmem:[%s9313_s0 + $0xf4] sm:$0xff] }
  0xab   :  { %520 = vmatprep.mubr.bf16.mxu0 %v7191_v1 }
  0xb2   :  { %5790 = vmatmul.mubr.msk.bf16.gmra.mrb[36].mxu0 %vm141_vm1, %v75_v19  ;;  %v880_v19 = vpack.c.bf16 %v860_v18, %v859_v17 }
  0xb3   :  { %530 = vmatprep.mubr.bf16.mxu0 %v7191_v1 }
  0xba   :  { %5791 = vmatmul.mubr.msk.bf16.gmra.mrb[40].mxu0 %vm141_vm1, %v76_v22  ;;  %v881_v22 = vpack.c.bf16 %v862_v21, %v861_v20 }
  0xbb   :  { %540 = vmatprep.mubr.bf16.mxu0 %v7191_v1 }
  0xc2   :  { %5792 = vmatmul.mubr.msk.bf16.gmra.mrb[44].mxu0 %vm141_vm1, %v77_v25  ;;  %v882_v25 = vpack.c.bf16 %v864_v24, %v863_v23 }
  0xc3   :  { %684 = vmatprep.mubr.bf16.mxu0 %v7191_v1 }
  0xca   :  { %5802 = vmatmul.mubr.msk.bf16.vlgmr.msra.gmra.mrb[0].mxu0 %vm141_vm1, %v575_v28  ;;  %v883_v28 = vpack.c.bf16 %v866_v27, %v865_v26 }
  0xcb   :  { %955 = vmatpush1.bf16.msra.mxu0 %v7062_v29  ;;  %694 = vmatprep.mubr.bf16.mxu0 %v7191_v1  ;;  %v867_v29 = vld [vmem:[%s9313_s0 + $0x93] sm:$0xff] }
  0xcc   :  { %5822 = vmatprep.subr.msk.bf16.mxu0 %vm178_vm0, %v7065_v30  ;;  %v868_v30 = vld [vmem:[%s9313_s0 + $0xa3] sm:$0xff] }
  0xcd   :  { %v884_v31 = vpack.c.bf16 %v868_v30, %v867_v29 }
  0xcf   :  { %957 = vmatpush1.bf16.msra.mxu0 %v949_v34  ;;  %v885_v34 = vpack.c.bf16 %v870_v33, %v869_v32 }
  0xd0   :  { %1256 = vmatprep.subr.bf16.mxu0 %v7070_v35  ;;  %v871_v35 = vld [vmem:[%s9313_s0 + $0xc3] sm:$0xff] }
  0xd2   :  { %5803 = vmatmul.mubr.msk.bf16.gmra.mrb[4].mxu0 %vm141_vm1, %v576_v36  ;;  %v872_v36 = vld [vmem:[%s9313_s0 + $0xcb] sm:$0xff] }
  0xd3   :  { %704 = vmatprep.mubr.bf16.mxu0 %v7191_v1  ;;  %v886_v37 = vpack.c.bf16 %v872_v36, %v871_v35 }
  0xda   :  { %5804 = vmatmul.mubr.msk.bf16.gmra.mrb[8].mxu0 %vm141_vm1, %v577_v39  ;;  %v874_v39 = vld [vmem:[%s9313_s0 + $0xe3] sm:$0xff] }
  0xdb   :  { %714 = vmatprep.mubr.bf16.mxu0 %v7191_v1  ;;  %v887_v40 = vpack.c.bf16 %v874_v39, %v873_v38 }
  0xe2   :  { %5805 = vmatmul.mubr.msk.bf16.gmra.mrb[12].mxu0 %vm141_vm1, %v578_v42  ;;  %v876_v42 = vld [vmem:[%s9313_s0 + $0xf3] sm:$0xff] }
  0xe3   :  { %724 = vmatprep.mubr.bf16.mxu0 %v7191_v1  ;;  %v888_v43 = vpack.c.bf16 %v876_v42, %v875_v41  ;;  %v7075_v42 = vld [vmem:[%s9314_s4 + $0x2c] sm:$0xff]  }
  0xea   :  { %5806 = vmatmul.mubr.msk.bf16.gmra.mrb[16].mxu0 %vm141_vm1, %v579_v45  ;;  %v1156_v45 = vld [vmem:[%s9313_s0 + $0xc] sm:$0xff] }
  0xeb   :  { %734 = vmatprep.mubr.bf16.mxu0 %v7191_v1  ;;  %v1179_v46 = vpack.c.bf16 %v1156_v45, %v1155_v44 }
  0xf2   :  { %5807 = vmatmul.mubr.msk.bf16.gmra.mrb[20].mxu0 %vm141_vm1, %v580_v48  ;;  %v1158_v48 = vld [vmem:[%s9313_s0 + $0x24] sm:$0xff] }
  0xf3   :  { %744 = vmatprep.mubr.bf16.mxu0 %v7191_v1  ;;  %v1180_v49 = vpack.c.bf16 %v1158_v48, %v1157_v47  ;;  %v7077_v48 = vld [vmem:[%s9314_s4 + $0x3c] sm:$0xff]  }
  0xfa   :  { %5808 = vmatmul.mubr.msk.bf16.gmra.mrb[24].mxu0 %vm141_vm1, %v581_v51  ;;  %v1160_v51 = vld [vmem:[%s9313_s0 + $0x34] sm:$0xff] }
  0xfb   :  { %754 = vmatprep.mubr.bf16.mxu0 %v7191_v1  ;;  %v1181_v52 = vpack.c.bf16 %v1160_v51, %v1159_v50 }
 0x102   :  { %5809 = vmatmul.mubr.msk.bf16.gmra.mrb[28].mxu0 %vm141_vm1, %v582_v54  ;;  %v1162_v54 = vld [vmem:[%s9313_s0 + $0x4c] sm:$0xff] }
 0x103   :  { %764 = vmatprep.mubr.bf16.mxu0 %v7191_v1  ;;  %v1182_v55 = vpack.c.bf16 %v1162_v54, %v1161_v53 }
 0x10a   :  { %5810 = vmatmul.mubr.msk.bf16.gmra.mrb[32].mxu0 %vm141_vm1, %v583_v57  ;;  %v1164_v57 = vld [vmem:[%s9313_s0 + $0x64] sm:$0xff] }
 0x10b   :  { %774 = vmatprep.mubr.bf16.mxu0 %v7191_v1  ;;  %v1183_v58 = vpack.c.bf16 %v1164_v57, %v1163_v56 }
 0x112   :  { %5811 = vmatmul.mubr.msk.bf16.gmra.mrb[36].mxu0 %vm141_vm1, %v584_v60  ;;  %v1166_v60 = vld [vmem:[%s9313_s0 + $0x74] sm:$0xff] }
 0x113   :  { %784 = vmatprep.mubr.bf16.mxu0 %v7191_v1  ;;  %v1184_v61 = vpack.c.bf16 %v1166_v60, %v1165_v59 }
 0x11a   :  { %5812 = vmatmul.mubr.msk.bf16.gmra.mrb[40].mxu0 %vm141_vm1, %v585_v63  ;;  %v1168_v63 = vld [vmem:[%s9313_s0 + $0x8c] sm:$0xff] }
 0x11b   :  { %794 = vmatprep.mubr.bf16.mxu0 %v7191_v1  ;;  %v1185_v0 = vpack.c.bf16 %v1168_v63, %v1167_v62 }
 0x122   :  { %5813 = vmatmul.mubr.msk.bf16.gmra.mrb[44].mxu0 %vm141_vm1, %v586_v3  ;;  %v1170_v3 = vld [vmem:[%s9313_s0 + $0xa4] sm:$0xff] }
 0x123   :  { %986 = vmatprep.mubr.bf16.mxu0 %v7191_v1  ;;  %v1186_v4 = vpack.c.bf16 %v1170_v3, %v1169_v2 }
 0x12a   :  { %5823 = vmatmul.mubr.msk.bf16.vlgmr.msra.gmra.mrb[0].mxu0 %vm141_vm1, %v877_v6  ;;  %v1172_v6 = vld [vmem:[%s9313_s0 + $0xb4] sm:$0xff] }
 0x12b   :  { %1257 = vmatpush1.bf16.msra.mxu0 %v7068_v7  ;;  %996 = vmatprep.mubr.bf16.mxu0 %v7191_v1  ;;  %v1187_v7 = vpack.c.bf16 %v1172_v6, %v1171_v5 }
 0x12c   :  { %5843 = vmatprep.subr.msk.bf16.mxu0 %vm178_vm0, %v7071_v8  ;;  %v1173_v8 = vld [vmem:[%s9313_s0 + $0xc4] sm:$0xff] }
 0x12d   :  { %v1188_v10 = vpack.c.bf16 %v1174_v9, %v1173_v8  ;;  %v7950_v8 = vld [vmem:[%s9314_s4] sm:$0xff]  }
 0x12f   :  { %1259 = vmatpush1.bf16.msra.mxu0 %v1251_v12  ;;  %v1176_v12 = vld [vmem:[%s9313_s0 + $0xe4] sm:$0xff] }
 0x132   :  { %5824 = vmatmul.mubr.msk.bf16.gmra.mrb[4].mxu0 %vm141_vm1, %v878_v13  ;;  %v1189_v13 = vpack.c.bf16 %v1176_v12, %v1175_v11 }
 0x133   :  { %1006 = vmatprep.mubr.bf16.mxu0 %v7191_v1 }
 0x13a   :  { %5825 = vmatmul.mubr.msk.bf16.gmra.mrb[8].mxu0 %vm141_vm1, %v879_v16  ;;  %v1190_v16 = vpack.c.bf16 %v1178_v15, %v1177_v14 }
 0x13b   :  { %1016 = vmatprep.mubr.bf16.mxu0 %v7191_v1 }
 0x142   :  { %5826 = vmatmul.mubr.msk.bf16.gmra.mrb[12].mxu0 %vm141_vm1, %v880_v19 }
 0x143   :  { %1026 = vmatprep.mubr.bf16.mxu0 %v7191_v1 }
 0x14a   :  { %5827 = vmatmul.mubr.msk.bf16.gmra.mrb[16].mxu0 %vm141_vm1, %v881_v22 }
 0x14b   :  { %1036 = vmatprep.mubr.bf16.mxu0 %v7191_v1 }
 0x152   :  { %5828 = vmatmul.mubr.msk.bf16.gmra.mrb[20].mxu0 %vm141_vm1, %v882_v25 }
 0x153   :  { %1046 = vmatprep.mubr.bf16.mxu0 %v7191_v1 }
 0x15a   :  { %5829 = vmatmul.mubr.msk.bf16.gmra.mrb[24].mxu0 %vm141_vm1, %v883_v28 }
 0x15b   :  { %1056 = vmatprep.mubr.bf16.mxu0 %v7191_v1 }
 0x162   :  { %5830 = vmatmul.mubr.msk.bf16.gmra.mrb[28].mxu0 %vm141_vm1, %v884_v31 }
 0x163   :  { %1066 = vmatprep.mubr.bf16.mxu0 %v7191_v1 }
 0x16a   :  { %5831 = vmatmul.mubr.msk.bf16.gmra.mrb[32].mxu0 %vm141_vm1, %v885_v34 }
 0x16b   :  { %1076 = vmatprep.mubr.bf16.mxu0 %v7191_v1 }
 0x172   :  { %5832 = vmatmul.mubr.msk.bf16.gmra.mrb[36].mxu0 %vm141_vm1, %v886_v37  ;;  %v7074_v37 = vld [vmem:[%s9314_s4 + $0x24] sm:$0xff]  }
 0x173   :  { %1086 = vmatprep.mubr.bf16.mxu0 %v7191_v1  ;;  %6313 = vmatprep.subr.bf16.mxu1 %v7074_v37 }
 0x174   :  { %6314 = vmatpush3.bf16.msra.mxu1 %v7074_v37 }
 0x175   :  { %6315 = vmatprep.subr.bf16.mxu1 %v7075_v42 }
 0x178   :  { %6316 = vmatpush3.bf16.msra.mxu1 %v7075_v42 }
 0x17a   :  { %5833 = vmatmul.mubr.msk.bf16.gmra.mrb[40].mxu0 %vm141_vm1, %v887_v40 }
 0x17b   :  { %1096 = vmatprep.mubr.bf16.mxu0 %v7191_v1 }
 0x182   :  { %5834 = vmatmul.mubr.msk.bf16.gmra.mrb[44].mxu0 %vm141_vm1, %v888_v43  ;;  %v7076_v43 = vld [vmem:[%s9314_s4 + $0x34] sm:$0xff]  }
 0x183   :  { %1288 = vmatprep.mubr.bf16.mxu0 %v7191_v1  ;;  %6317 = vmatprep.subr.bf16.mxu1 %v7076_v43 }
 0x184   :  { %6318 = vmatpush3.bf16.msra.mxu1 %v7076_v43 }
 0x185   :  { %6319 = vmatprep.subr.bf16.mxu1 %v7077_v48 }
 0x188   :  { %6320 = vmatpush3.bf16.msra.mxu1 %v7077_v48 }
 0x18a   :  { %5844 = vmatmul.mubr.msk.bf16.vlgmr.msra.gmra.mrb[0].mxu0 %vm141_vm1, %v1179_v46 }
 0x18b   :  { %1298 = vmatprep.mubr.bf16.mxu0 %v7191_v1 }
 0x192   :  { %5845 = vmatmul.mubr.msk.bf16.gmra.mrb[4].mxu0 %vm141_vm1, %v1180_v49  ;;  %v7078_v49 = vld [vmem:[%s9314_s4 + $0x44] ss:$0 sps:$4 sm:$0xff]  }
 0x193   :  { %1308 = vmatprep.mubr.bf16.mxu0 %v7191_v1  ;;  %7029 = vmatprep.subr.msk.bf16.mxu1 %vm1916_vm2, %v7078_v49 }
 0x19a   :  { %5846 = vmatmul.mubr.msk.bf16.gmra.mrb[8].mxu0 %vm141_vm1, %v1181_v52  ;;  %v1918_v52 = vsel %vm1916_vm2, %v7078_v49, 0 }
 0x19b   :  { %1318 = vmatprep.mubr.bf16.mxu0 %v7191_v1  ;;  %6322 = vmatpush3.bf16.msra.mxu1 %v1918_v52 }
 0x19c   :  { %6331 = vmatprep.subr.bf16.mxu1 %v7950_v8 }
 0x1a2   :  { %5847 = vmatmul.mubr.msk.bf16.gmra.mrb[12].mxu0 %vm141_vm1, %v1182_v55 }
 0x1a3   :  { %1328 = vmatprep.mubr.bf16.mxu0 %v7191_v1 }
 0x1aa   :  { %5848 = vmatmul.mubr.msk.bf16.gmra.mrb[16].mxu0 %vm141_vm1, %v1183_v58 }
 0x1ab   :  { %1338 = vmatprep.mubr.bf16.mxu0 %v7191_v1 }
 0x1b2   :  { %5849 = vmatmul.mubr.msk.bf16.gmra.mrb[20].mxu0 %vm141_vm1, %v1184_v61 }
 0x1b3   :  { %1348 = vmatprep.mubr.bf16.mxu0 %v7191_v1 }
 0x1ba   :  { %5850 = vmatmul.mubr.msk.bf16.gmra.mrb[24].mxu0 %vm141_vm1, %v1185_v0 }
 0x1bb   :  { %1358 = vmatprep.mubr.bf16.mxu0 %v7191_v1 }
 0x1c2   :  { %5851 = vmatmul.mubr.msk.bf16.gmra.mrb[28].mxu0 %vm141_vm1, %v1186_v4 }
 0x1c3   :  { %1368 = vmatprep.mubr.bf16.mxu0 %v7191_v1 }
 0x1ca   :  { %5852 = vmatmul.mubr.msk.bf16.gmra.mrb[32].mxu0 %vm141_vm1, %v1187_v7 }
 0x1cb   :  { %1378 = vmatprep.mubr.bf16.mxu0 %v7191_v1 }
 0x1d2   :  { %5853 = vmatmul.mubr.msk.bf16.gmra.mrb[36].mxu0 %vm141_vm1, %v1188_v10 }
 0x1d3   :  { %1388 = vmatprep.mubr.bf16.mxu0 %v7191_v1 }
 0x1da   :  { %5854 = vmatmul.mubr.msk.bf16.gmra.mrb[40].mxu0 %vm141_vm1, %v1189_v13 }
 0x1db   :  { %1398 = vmatprep.mubr.bf16.mxu0 %v7191_v1 }
 0x1e2   :  { %5855 = vmatmul.mubr.msk.bf16.gmra.mrb[44].mxu0 %vm141_vm1, %v1190_v16 }
 0x25d   :  { %v7811_v17 = vpop.f32.mrb[0].mxu0 }
 0x25e   :  { %1505 = vrot.lane.b32.xlu0 %v7811_v17, %s7192_s13  ;;  %v1292_v18 = vpop.f32.mrb[1].mxu0 }
 0x25f   :  { %v7815_v19 = vpop.f32.mrb[2].mxu0 }
 0x260   :  { %1509 = vrot.lane.b32.xlu1 %v7815_v19, %s7192_s13  ;;  %v1296_v20 = vpop.f32.mrb[3].mxu0 }
 0x262   :  { %1507 = vrot.lane.b32.xlu0 %v1292_v18, %s7192_s13 }
 0x264   :  { %1511 = vrot.lane.b32.xlu1 %v1296_v20, %s7192_s13 }
 0x265   :  { %v7821_v21 = vpop.f32.mrb[4].mxu0 }
 0x266   :  { %1513 = vrot.lane.b32.xlu0 %v7821_v21, %s7192_s13  ;;  %v1302_v22 = vpop.f32.mrb[5].mxu0 }
 0x267   :  { %v7825_v23 = vpop.f32.mrb[6].mxu0 }
 0x268   :  { %1515 = vrot.lane.b32.xlu1 %v1302_v22, %s7192_s13  ;;  %v1306_v24 = vpop.f32.mrb[7].mxu0 }
 0x26a   :  { %1517 = vrot.lane.b32.xlu0 %v7825_v23, %s7192_s13 }
 0x26c   :  { %1519 = vrot.lane.b32.xlu1 %v1306_v24, %s7192_s13 }
 0x26d   :  { %v7831_v25 = vpop.f32.mrb[8].mxu0 }
 0x26e   :  { %1521 = vrot.lane.b32.xlu0 %v7831_v25, %s7192_s13  ;;  %v1312_v26 = vpop.f32.mrb[9].mxu0 }
 0x26f   :  { %v7835_v27 = vpop.f32.mrb[10].mxu0 }
 0x270   :  { %1523 = vrot.lane.b32.xlu1 %v1312_v26, %s7192_s13  ;;  %v1316_v28 = vpop.f32.mrb[11].mxu0 }
 0x272   :  { %1525 = vrot.lane.b32.xlu0 %v7835_v27, %s7192_s13 }
 0x274   :  { %1527 = vrot.lane.b32.xlu1 %v1316_v28, %s7192_s13 }
 0x275   :  { %v7841_v29 = vpop.f32.mrb[12].mxu0 }
 0x276   :  { %1529 = vrot.lane.b32.xlu0 %v7841_v29, %s7192_s13  ;;  %v1322_v30 = vpop.f32.mrb[13].mxu0 }
 0x277   :  { %v7845_v31 = vpop.f32.mrb[14].mxu0 }
 0x278   :  { %1531 = vrot.lane.b32.xlu1 %v1322_v30, %s7192_s13  ;;  %v1326_v32 = vpop.f32.mrb[15].mxu0 }
 0x27a   :  { %1533 = vrot.lane.b32.xlu0 %v7845_v31, %s7192_s13 }
 0x27c   :  { %1535 = vrot.lane.b32.xlu1 %v1326_v32, %s7192_s13 }
 0x27d   :  { %v7851_v33 = vpop.f32.mrb[16].mxu0 }
 0x27e   :  { %1537 = vrot.lane.b32.xlu0 %v7851_v33, %s7192_s13  ;;  %v1332_v34 = vpop.f32.mrb[17].mxu0 }
 0x27f   :  { %v7855_v35 = vpop.f32.mrb[18].mxu0 }
 0x280   :  { %1539 = vrot.lane.b32.xlu1 %v1332_v34, %s7192_s13  ;;  %v1336_v36 = vpop.f32.mrb[19].mxu0 }
 0x282   :  { %1541 = vrot.lane.b32.xlu0 %v7855_v35, %s7192_s13 }
 0x284   :  { %1543 = vrot.lane.b32.xlu1 %v1336_v36, %s7192_s13 }
 0x285   :  { %v7864_v38 = vpop.f32.mrb[20].mxu0 }
 0x286   :  { %1545 = vrot.lane.b32.xlu0 %v7864_v38, %s7192_s13  ;;  %v1342_v39 = vpop.f32.mrb[21].mxu0 }
 0x287   :  { %v7868_v40 = vpop.f32.mrb[22].mxu0 }
 0x288   :  { %1547 = vrot.lane.b32.xlu1 %v1342_v39, %s7192_s13  ;;  %v1346_v41 = vpop.f32.mrb[23].mxu0 }
 0x28a   :  { %1549 = vrot.lane.b32.xlu0 %v7868_v40, %s7192_s13 }
 0x28c   :  { %1551 = vrot.lane.b32.xlu1 %v1346_v41, %s7192_s13 }
 0x28d   :  { %v7880_v44 = vpop.f32.mrb[24].mxu0 }
 0x28e   :  { %1553 = vrot.lane.b32.xlu0 %v7880_v44, %s7192_s13  ;;  %v1352_v45 = vpop.f32.mrb[25].mxu0 }
 0x28f   :  { %v7884_v46 = vpop.f32.mrb[26].mxu0 }
 0x290   :  { %1555 = vrot.lane.b32.xlu1 %v1352_v45, %s7192_s13  ;;  %v1356_v47 = vpop.f32.mrb[27].mxu0 }
 0x292   :  { %1557 = vrot.lane.b32.xlu0 %v7884_v46, %s7192_s13 }
 0x294   :  { %1559 = vrot.lane.b32.xlu1 %v1356_v47, %s7192_s13 }
 0x295   :  { %v7896_v50 = vpop.f32.mrb[28].mxu0 }
 0x296   :  { %1561 = vrot.lane.b32.xlu0 %v7896_v50, %s7192_s13  ;;  %v1362_v51 = vpop.f32.mrb[29].mxu0 }
 0x297   :  { %v7902_v53 = vpop.f32.mrb[30].mxu0 }
 0x298   :  { %1563 = vrot.lane.b32.xlu1 %v1362_v51, %s7192_s13  ;;  %v1366_v54 = vpop.f32.mrb[31].mxu0 }
 0x29a   :  { %1565 = vrot.lane.b32.xlu0 %v7902_v53, %s7192_s13 }
 0x29c   :  { %1567 = vrot.lane.b32.xlu1 %v1366_v54, %s7192_s13 }
 0x29d   :  { %v7908_v55 = vpop.f32.mrb[32].mxu0 }
 0x29e   :  { %1569 = vrot.lane.b32.xlu0 %v7908_v55, %s7192_s13  ;;  %v1372_v56 = vpop.f32.mrb[33].mxu0 }
 0x29f   :  { %v7912_v57 = vpop.f32.mrb[34].mxu0 }
 0x2a0   :  { %1571 = vrot.lane.b32.xlu1 %v1372_v56, %s7192_s13  ;;  %v1376_v58 = vpop.f32.mrb[35].mxu0 }
 0x2a2   :  { %1573 = vrot.lane.b32.xlu0 %v7912_v57, %s7192_s13 }
 0x2a4   :  { %1575 = vrot.lane.b32.xlu1 %v1376_v58, %s7192_s13 }
 0x2a5   :  { %v7918_v59 = vpop.f32.mrb[36].mxu0 }
 0x2a6   :  { %1577 = vrot.lane.b32.xlu0 %v7918_v59, %s7192_s13  ;;  %v1382_v60 = vpop.f32.mrb[37].mxu0 }
 0x2a7   :  { %v7922_v61 = vpop.f32.mrb[38].mxu0 }
 0x2a8   :  { %1579 = vrot.lane.b32.xlu1 %v1382_v60, %s7192_s13  ;;  %v1386_v62 = vpop.f32.mrb[39].mxu0 }
 0x2aa   :  { %1581 = vrot.lane.b32.xlu0 %v7922_v61, %s7192_s13 }
 0x2ac   :  { %1583 = vrot.lane.b32.xlu1 %v1386_v62, %s7192_s13 }
 0x2ad   :  { %v7928_v63 = vpop.f32.mrb[40].mxu0 }
 0x2ae   :  { %1585 = vrot.lane.b32.xlu0 %v7928_v63, %s7192_s13  ;;  %v1392_v0 = vpop.f32.mrb[41].mxu0 }
 0x2af   :  { %v7932_v2 = vpop.f32.mrb[42].mxu0 }
 0x2b0   :  { %1587 = vrot.lane.b32.xlu1 %v1392_v0, %s7192_s13  ;;  %v1396_v3 = vpop.f32.mrb[43].mxu0 }
 0x2b2   :  { %1589 = vrot.lane.b32.xlu0 %v7932_v2, %s7192_s13 }
 0x2b4   :  { %1591 = vrot.lane.b32.xlu1 %v1396_v3, %s7192_s13 }
 0x2b5   :  { %v7938_v4 = vpop.f32.mrb[44].mxu0 }
 0x2b6   :  { %1593 = vrot.lane.b32.xlu0 %v7938_v4, %s7192_s13  ;;  %v1402_v5 = vpop.f32.mrb[45].mxu0 }
 0x2b7   :  { %v7942_v6 = vpop.f32.mrb[46].mxu0 }
 0x2b8   :  { %1595 = vrot.lane.b32.xlu1 %v1402_v5, %s7192_s13  ;;  %v1406_v7 = vpop.f32.mrb[47].mxu0 }
 0x2ba   :  { %1597 = vrot.lane.b32.xlu0 %v7942_v6, %s7192_s13 }
 0x2bc   :  { %1599 = vrot.lane.b32.xlu1 %v1406_v7, %s7192_s13 }
 0x2d0   :  { %v1506_v9 = vpop.permute.xlu0 %1505 }
 0x2d2   :  { %v1510_v10 = vpop.permute.xlu1 %1509 }
 0x2d4   :  { %v1508_v11 = vpop.permute.xlu0 %1507 }
 0x2d5   :  { %v1602_v12 = vsel %vm1601_vm3, %v1506_v9, %v1508_v11 }
 0x2d6   :  { %v1650_v13 = vmax.f32 %v7811_v17, %v1602_v12  ;;  %v1512_v14 = vpop.permute.xlu1 %1511 }
 0x2d7   :  { %v1603_v15 = vsel %vm1601_vm3, %v1510_v10, %v1512_v14 }
 0x2d8   :  { %1675 = vst.msk [vmem:[#allocation2] sm:$0xff] %vm1674_vm4, %v1650_v13  ;;  %v1651_v16 = vmax.f32 %v7815_v19, %v1603_v15  ;;  %v1514_v18 = vpop.permute.xlu0 %1513  ;;  %v7968_v19 = vld [vmem:[%s9315_s3] ss:$0 sm:$0xff] }
 0x2da   :  { %1676 = vst.msk [vmem:[#allocation2 + $0x8] sm:$0xff] %vm1674_vm4, %v1651_v16  ;;  %v1516_v20 = vpop.permute.xlu1 %1515 }
 0x2db   :  { %v1604_v22 = vsel %vm1601_vm3, %v1514_v18, %v1516_v20 }
 0x2dc   :  { %v1652_v24 = vmax.f32 %v7821_v21, %v1604_v22  ;;  %v1518_v26 = vpop.permute.xlu0 %1517 }
 0x2de   :  { %1677 = vst.msk [vmem:[#allocation2 + $0x10] sm:$0xff] %vm1674_vm4, %v1652_v24  ;;  %v1520_v28 = vpop.permute.xlu1 %1519 }
 0x2df   :  { %v1605_v17 = vsel %vm1601_vm3, %v1518_v26, %v1520_v28 }
 0x2e0   :  { %v1653_v30 = vmax.f32 %v7825_v23, %v1605_v17  ;;  %v1522_v32 = vpop.permute.xlu0 %1521 }
 0x2e1   :  { %v1699_v34 = vld [vmem:[#allocation2] ss:$2 sm:$0xff]  ;;  %v1731_v36 = vld [vmem:[#allocation2 + $0x1] ss:$2 sm:$0xff] }
 0x2e2   :  { %v1762_v37 = vmax.f32 %v1699_v34, %v1731_v36  ;;  %1678 = vst.msk [vmem:[#allocation2 + $0x18] sm:$0xff] %vm1674_vm4, %v1653_v30  ;;  %v1524_v21 = vpop.permute.xlu1 %1523 }
 0x2e3   :  { %v1606_v39 = vsel %vm1601_vm3, %v1522_v32, %v1524_v21 }
 0x2e4   :  { %v1654_v41 = vmax.f32 %v7831_v25, %v1606_v39  ;;  %v1526_v42 = vpop.permute.xlu0 %1525  ;;  %v1785_v43 = vadd.f32 %v7968_v19, %v1762_v37 }
 0x2e5   :  { %v1701_v23 = vld [vmem:[#allocation2 + $0x10] ss:$2 sm:$0xf]  ;;  %v1733_v45 = vld [vmem:[#allocation2 + $0x11] ss:$2 sm:$0xf] }
 0x2e6   :  { %v1763_v47 = vmax.f32 %v1701_v23, %v1733_v45  ;;  %1679 = vst.msk [vmem:[#allocation2 + $0x20] sm:$0xff] %vm1674_vm4, %v1654_v41  ;;  %v1528_v48 = vpop.permute.xlu1 %1527  ;;  %v1801_v49 = vmax.f32 %v1785_v43, 0.0 }
 0x2e7   :  { %v1607_v51 = vsel %vm1601_vm3, %v1526_v42, %v1528_v48 }
 0x2e8   :  { %v1655_v52 = vmax.f32 %v7835_v27, %v1607_v51  ;;  %v1530_v54 = vpop.permute.xlu0 %1529  ;;  %v1786_v56 = vadd.f32 %v7968_v19, %v1763_v47  ;;  %1817 = vst.msk [vmem:[#allocation3] sm:$0xff] %vm1674_vm4, %v1801_v49 }
 0x2ea   :  { %1680 = vst.msk [vmem:[#allocation2 + $0x28] sm:$0xff] %vm1674_vm4, %v1655_v52  ;;  %v1532_v25 = vpop.permute.xlu1 %1531  ;;  %v1802_v58 = vmax.f32 %v1786_v56, 0.0 }
 0x2eb   :  { %v1608_v60 = vsel %vm1601_vm3, %v1530_v54, %v1532_v25 }
 0x2ec   :  { %v1656_v62 = vmax.f32 %v7841_v29, %v1608_v60  ;;  %v1534_v0 = vpop.permute.xlu0 %1533  ;;  %1819 = vst.msk [vmem:[#allocation3 + $0x8] sm:$0xf] %vm1818_vm5, %v1802_v58 }
 0x2ed   :  { %v1703_v3 = vld [vmem:[#allocation2 + $0x18] ss:$2 sm:$0xff]  ;;  %v1735_v5 = vld [vmem:[#allocation2 + $0x19] ss:$2 sm:$0xff] }
 0x2ee   :  { %v1764_v27 = vmax.f32 %v1703_v3, %v1735_v5  ;;  %1681 = vst.msk [vmem:[#allocation2 + $0x30] sm:$0xff] %vm1674_vm4, %v1656_v62  ;;  %v1536_v7 = vpop.permute.xlu1 %1535 }
 0x2ef   :  { %v1609_v9 = vsel %vm1601_vm3, %v1534_v0, %v1536_v7 }
 0x2f0   :  { %v1657_v10 = vmax.f32 %v7845_v31, %v1609_v9  ;;  %v1538_v11 = vpop.permute.xlu0 %1537  ;;  %v1787_v12 = vadd.f32 %v7968_v19, %v1764_v27 }
 0x2f1   :  { %v1705_v13 = vld [vmem:[#allocation2 + $0x28] ss:$2 sm:$0xf]  ;;  %v1737_v14 = vld [vmem:[#allocation2 + $0x29] ss:$2 sm:$0xf] }
 0x2f2   :  { %v1765_v15 = vmax.f32 %v1705_v13, %v1737_v14  ;;  %1682 = vst.msk [vmem:[#allocation2 + $0x38] sm:$0xff] %vm1674_vm4, %v1657_v10  ;;  %v1540_v29 = vpop.permute.xlu1 %1539  ;;  %v1803_v16 = vmax.f32 %v1787_v12, 0.0 }
 0x2f3   :  { %v1610_v18 = vsel %vm1601_vm3, %v1538_v11, %v1540_v29  ;;  %v1855_v48 = vld [vmem:[#allocation3 + $0x1] sm:$0xff] }
 0x2f4   :  { %v1658_v20 = vmax.f32 %v7851_v33, %v1610_v18  ;;  %v1542_v22 = vpop.permute.xlu0 %1541  ;;  %v1788_v24 = vadd.f32 %v7968_v19, %v1765_v15  ;;  %1820 = vst.msk [vmem:[#allocation3 + $0x10] sm:$0xff] %vm1674_vm4, %v1803_v16 }
 0x2f6   :  { %1683 = vst.msk [vmem:[#allocation2 + $0x40] sm:$0xff] %vm1674_vm4, %v1658_v20  ;;  %v1544_v31 = vpop.permute.xlu1 %1543  ;;  %v1804_v26 = vmax.f32 %v1788_v24, 0.0 }
 0x2f7   :  { %v1611_v28 = vsel %vm1601_vm3, %v1542_v22, %v1544_v31 }
 0x2f8   :  { %v1659_v17 = vmax.f32 %v7855_v35, %v1611_v28  ;;  %v1546_v30 = vpop.permute.xlu0 %1545  ;;  %1821 = vst.msk [vmem:[#allocation3 + $0x18] sm:$0xf] %vm1818_vm5, %v1804_v26 }
 0x2f9   :  { %v1707_v32 = vld [vmem:[#allocation2 + $0x30] ss:$2 sm:$0xff]  ;;  %v1739_v34 = vld [vmem:[#allocation2 + $0x31] ss:$2 sm:$0xff] }
 0x2fa   :  { %v1766_v36 = vmax.f32 %v1707_v32, %v1739_v34  ;;  %1684 = vst.msk [vmem:[#allocation2 + $0x48] sm:$0xff] %vm1674_vm4, %v1659_v17  ;;  %v1548_v33 = vpop.permute.xlu1 %1547 }
 0x2fb   :  { %v1612_v37 = vsel %vm1601_vm3, %v1546_v30, %v1548_v33 }
 0x2fc   :  { %v1789_v21 = vadd.f32 %v7968_v19, %v1766_v36  ;;  %v1660_v39 = vmax.f32 %v7864_v38, %v1612_v37  ;;  %v1550_v41 = vpop.permute.xlu0 %1549 }
 0x2fd   :  { %v1709_v42 = vld [vmem:[#allocation2 + $0x40] ss:$2 sm:$0xf]  ;;  %v1741_v43 = vld [vmem:[#allocation2 + $0x41] ss:$2 sm:$0xf] }
 0x2fe   :  { %v1805_v23 = vmax.f32 %v1789_v21, 0.0  ;;  %v1767_v35 = vmax.f32 %v1709_v42, %v1741_v43  ;;  %1685 = vst.msk [vmem:[#allocation2 + $0x50] sm:$0xff] %vm1674_vm4, %v1660_v39  ;;  %v1552_v45 = vpop.permute.xlu1 %1551 }
 0x2ff   :  { %v1613_v47 = vsel %vm1601_vm3, %v1550_v41, %v1552_v45  ;;  %v1856_v49 = vld [vmem:[#allocation3 + $0x11] sm:$0xff] }
 0x300   :  { %1822 = vst.msk [vmem:[#allocation3 + $0x20] sm:$0xff] %vm1674_vm4, %v1805_v23  ;;  %v1790_v51 = vadd.f32 %v7968_v19, %v1767_v35  ;;  %v1661_v52 = vmax.f32 %v7868_v40, %v1613_v47  ;;  %v1554_v54 = vpop.permute.xlu0 %1553  ;;  %v1863_v38 = vpack.c.bf16 %v1856_v49, %v1855_v48  ;;  %v7080_v47 = vld [vmem:[%s9314_s4 + $0x8] sm:$0xff]  }
 0x302   :  { %v1806_v56 = vmax.f32 %v1790_v51, 0.0  ;;  %1686 = vst.msk [vmem:[#allocation2 + $0x58] sm:$0xff] %vm1674_vm4, %v1661_v52  ;;  %6323 = vmatprep.mubr.msk.bf16.mxu1 %vm1674_vm4, %v1863_v38  ;;  %v1556_v25 = vpop.permute.xlu1 %1555 }
 0x303   :  { %v1614_v58 = vsel %vm1601_vm3, %v1554_v54, %v1556_v25  ;;  %v7081_v54 = vld [vmem:[%s9314_s4 + $0x10] sm:$0xff]  }
 0x304   :  { %1823 = vst.msk [vmem:[#allocation3 + $0x28] sm:$0xf] %vm1818_vm5, %v1806_v56  ;;  %v1662_v60 = vmax.f32 %v7880_v44, %v1614_v58  ;;  %v1558_v62 = vpop.permute.xlu0 %1557 }
 0x305   :  { %v1711_v0 = vld [vmem:[#allocation2 + $0x48] ss:$2 sm:$0xff]  ;;  %v1743_v3 = vld [vmem:[#allocation2 + $0x49] ss:$2 sm:$0xff] }
 0x306   :  { %v1768_v5 = vmax.f32 %v1711_v0, %v1743_v3  ;;  %1687 = vst.msk [vmem:[#allocation2 + $0x60] sm:$0xff] %vm1674_vm4, %v1662_v60  ;;  %v1560_v40 = vpop.permute.xlu1 %1559  ;;  %v7082_v0 = vld [vmem:[%s9314_s4 + $0x18] sm:$0xff]  }
 0x307   :  { %v1615_v27 = vsel %vm1601_vm3, %v1558_v62, %v1560_v40 }
 0x308   :  { %v1791_v7 = vadd.f32 %v7968_v19, %v1768_v5  ;;  %v1663_v9 = vmax.f32 %v7884_v46, %v1615_v27  ;;  %v1562_v10 = vpop.permute.xlu0 %1561 }
 0x309   :  { %v1713_v11 = vld [vmem:[#allocation2 + $0x58] ss:$2 sm:$0xf]  ;;  %v1745_v12 = vld [vmem:[#allocation2 + $0x59] ss:$2 sm:$0xf] }
 0x30a   :  { %v1807_v13 = vmax.f32 %v1791_v7, 0.0  ;;  %v1769_v14 = vmax.f32 %v1713_v11, %v1745_v12  ;;  %1688 = vst.msk [vmem:[#allocation2 + $0x68] sm:$0xff] %vm1674_vm4, %v1663_v9  ;;  %v1564_v44 = vpop.permute.xlu1 %1563  ;;  %v7083_v12 = vld [vmem:[%s9314_s4 + $0x20] ss:$0 sps:$4 sm:$0xff]  }
 0x30b   :  { %v1616_v15 = vsel %vm1601_vm3, %v1562_v10, %v1564_v44  ;;  %v1857_v42 = vld [vmem:[#allocation3 + $0x21] sm:$0xff] }
 0x30c   :  { %1824 = vst.msk [vmem:[#allocation3 + $0x30] sm:$0xff] %vm1674_vm4, %v1807_v13  ;;  %v1792_v29 = vadd.f32 %v7968_v19, %v1769_v14  ;;  %v1664_v16 = vmax.f32 %v7896_v50, %v1616_v15  ;;  %v1566_v18 = vpop.permute.xlu0 %1565 }
 0x30e   :  { %v1808_v20 = vmax.f32 %v1792_v29, 0.0  ;;  %1689 = vst.msk [vmem:[#allocation2 + $0x70] sm:$0xff] %vm1674_vm4, %v1664_v16  ;;  %v1568_v46 = vpop.permute.xlu1 %1567  ;;  %v7084_v16 = vld [vmem:[%s9314_s4 + $0x48] sm:$0xff]  }
 0x30f   :  { %v1617_v22 = vsel %vm1601_vm3, %v1566_v18, %v1568_v46 }
 0x310   :  { %1825 = vst.msk [vmem:[#allocation3 + $0x38] sm:$0xf] %vm1818_vm5, %v1808_v20  ;;  %v1665_v24 = vmax.f32 %v7902_v53, %v1617_v22  ;;  %v1570_v31 = vpop.permute.xlu0 %1569 }
 0x311   :  { %v1715_v26 = vld [vmem:[#allocation2 + $0x60] ss:$2 sm:$0xff]  ;;  %v1747_v28 = vld [vmem:[#allocation2 + $0x61] ss:$2 sm:$0xff] }
 0x312   :  { %v1770_v17 = vmax.f32 %v1715_v26, %v1747_v28  ;;  %1690 = vst.msk [vmem:[#allocation2 + $0x78] sm:$0xff] %vm1674_vm4, %v1665_v24  ;;  %v1572_v30 = vpop.permute.xlu1 %1571 }
 0x313   :  { %v1618_v50 = vsel %vm1601_vm3, %v1570_v31, %v1572_v30 }
 0x314   :  { %v1793_v32 = vadd.f32 %v7968_v19, %v1770_v17  ;;  %v1666_v34 = vmax.f32 %v7908_v55, %v1618_v50  ;;  %v1574_v36 = vpop.permute.xlu0 %1573 }
 0x315   :  { %v1717_v33 = vld [vmem:[#allocation2 + $0x70] ss:$2 sm:$0xf]  ;;  %v1749_v37 = vld [vmem:[#allocation2 + $0x71] ss:$2 sm:$0xf] }
 0x316   :  { %v1809_v21 = vmax.f32 %v1793_v32, 0.0  ;;  %v1771_v39 = vmax.f32 %v1717_v33, %v1749_v37  ;;  %1691 = vst.msk [vmem:[#allocation2 + $0x80] sm:$0xff] %vm1674_vm4, %v1666_v34  ;;  %v1576_v53 = vpop.permute.xlu1 %1575 }
 0x317   :  { %v1619_v41 = vsel %vm1601_vm3, %v1574_v36, %v1576_v53  ;;  %v1858_v43 = vld [vmem:[#allocation3 + $0x31] sm:$0xff] }
 0x318   :  { %1826 = vst.msk [vmem:[#allocation3 + $0x40] sm:$0xff] %vm1674_vm4, %v1809_v21  ;;  %v1794_v23 = vadd.f32 %v7968_v19, %v1771_v39  ;;  %v1667_v35 = vmax.f32 %v7912_v57, %v1619_v41  ;;  %v1578_v45 = vpop.permute.xlu0 %1577  ;;  %v1864_v55 = vpack.c.bf16 %v1858_v43, %v1857_v42 }
 0x31a   :  { %v1810_v48 = vmax.f32 %v1794_v23, 0.0  ;;  %1692 = vst.msk [vmem:[#allocation2 + $0x88] sm:$0xff] %vm1674_vm4, %v1667_v35  ;;  %6324 = vmatmul.mubr.msk.bf16.vlgmr.msra.gmra.mrb[0].mxu1 %vm1674_vm4, %v1864_v55  ;;  %v1580_v49 = vpop.permute.xlu1 %1579 }
 0x31b   :  { %v1620_v51 = vsel %vm1601_vm3, %v1578_v45, %v1580_v49  ;;  %6332 = vmatpush3.bf16.msra.mxu1 %v7950_v8 }
 0x31c   :  { %1827 = vst.msk [vmem:[#allocation3 + $0x48] sm:$0xf] %vm1818_vm5, %v1810_v48  ;;  %v1668_v57 = vmax.f32 %v7918_v59, %v1620_v51  ;;  %v1582_v52 = vpop.permute.xlu0 %1581  ;;  %6333 = vmatprep.subr.bf16.mxu1 %v7080_v47  ;;  %v1835_v48 = vld [vmem:[#allocation3 + $0x10] sm:$0xff] }
 0x31d   :  { %v1719_v38 = vld [vmem:[#allocation2 + $0x78] ss:$2 sm:$0xff]  ;;  %v1751_v56 = vld [vmem:[#allocation2 + $0x79] ss:$2 sm:$0xff] }
 0x31e   :  { %v1772_v25 = vmax.f32 %v1719_v38, %v1751_v56  ;;  %1693 = vst.msk [vmem:[#allocation2 + $0x90] sm:$0xff] %vm1674_vm4, %v1668_v57  ;;  %v1584_v58 = vpop.permute.xlu1 %1583  ;;  %v1837_v38 = vld [vmem:[#allocation3 + $0x30] sm:$0xff] }
 0x31f   :  { %v1621_v60 = vsel %vm1601_vm3, %v1582_v52, %v1584_v58  ;;  %6334 = vmatpush3.bf16.msra.mxu1 %v7080_v47  ;;  %v1834_v52 = vld [vmem:[#allocation3] sm:$0xff] }
 0x320   :  { %v1795_v8 = vadd.f32 %v7968_v19, %v1772_v25  ;;  %v1669_v62 = vmax.f32 %v7922_v61, %v1621_v60  ;;  %v1586_v59 = vpop.permute.xlu0 %1585  ;;  %6335 = vmatprep.subr.bf16.mxu1 %v7081_v54  ;;  %v1836_v25 = vld [vmem:[#allocation3 + $0x20] sm:$0xff] }
 0x321   :  { %v1721_v3 = vld [vmem:[#allocation2 + $0x88] ss:$2 sm:$0xf]  ;;  %v1753_v5 = vld [vmem:[#allocation2 + $0x89] ss:$2 sm:$0xf]  ;;  %v1843_v58 = vpack.c.bf16 %v1837_v38, %v1836_v25 }
 0x322   :  { %v1811_v40 = vmax.f32 %v1795_v8, 0.0  ;;  %v1773_v27 = vmax.f32 %v1721_v3, %v1753_v5  ;;  %1694 = vst.msk [vmem:[#allocation2 + $0x98] sm:$0xff] %vm1674_vm4, %v1669_v62  ;;  %v1588_v7 = vpop.permute.xlu1 %1587  ;;  %v1838_v60 = vld [vmem:[#allocation3 + $0x40] sm:$0xff]  ;;  %v7086_v62 = vld [vmem:[%s9314_s4 + $0x58] sm:$0xff]  }
 0x323   :  { %v1622_v9 = vsel %vm1601_vm3, %v1586_v59, %v1588_v7  ;;  %6336 = vmatpush3.bf16.msra.mxu1 %v7081_v54  ;;  %v1859_v36 = vld [vmem:[#allocation3 + $0x41] sm:$0xff]  ;;  %v1842_v54 = vpack.c.bf16 %v1835_v48, %v1834_v52  ;;  %v7104_v52 = vld [vmem:[%s9312_s2 + $0x30] ss:$8 sps:$4 sm:$0x3f]  }
 0x324   :  { %1828 = vst.msk [vmem:[#allocation3 + $0x50] sm:$0xff] %vm1674_vm4, %v1811_v40  ;;  %v1796_v61 = vadd.f32 %v7968_v19, %v1773_v27  ;;  %v1670_v10 = vmax.f32 %v7928_v63, %v1622_v9  ;;  %v1590_v11 = vpop.permute.xlu0 %1589  ;;  %6337 = vmatprep.subr.bf16.mxu1 %v7082_v0  ;;  %v2025_v63 = vsel %vm1916_vm2, %v7083_v12, 0  ;;  %v2092_v40 = vld [vmem:[#allocation3 + $0x2] sm:$0xff]  ;;  %v2678_v38 = vsel %vm178_vm0, %v7104_v52, 0 }
 0x325   :  { %v7087_v27 = vld [vmem:[%s9314_s4 + $0x60] sm:$0xff]   ;;  %v7088_v9 = vld [vmem:[%s9314_s4 + $0x68] ss:$0 sps:$4 sm:$0xff]  }
 0x326   :  { %v1812_v13 = vmax.f32 %v1796_v61, 0.0  ;;  %1695 = vst.msk [vmem:[#allocation2 + $0xa0] sm:$0xff] %vm1674_vm4, %v1670_v10  ;;  %v1592_v14 = vpop.permute.xlu1 %1591  ;;  %v2154_v61 = vsel %vm1916_vm2, %v7088_v9, 0  ;;  %v7089_v10 = vld [vmem:[%s9314_s4 + $0x6c] sm:$0xff]   ;;  %v7099_v48 = vld [vmem:[%s9312_s2 + $0x20] ss:$8 sps:$4 sm:$0xff]  }
 0x327   :  { %v1623_v44 = vsel %vm1601_vm3, %v1590_v11, %v1592_v14  ;;  %6338 = vmatpush3.bf16.msra.mxu1 %v7082_v0  ;;  %v2093_v0 = vld [vmem:[#allocation3 + $0x12] sm:$0xff]  ;;  %v2550_v52 = vld [vmem:[%s9316_s1 + $0x48] sm:$0xff] }
 0x328   :  { %1829 = vst.msk [vmem:[#allocation3 + $0x58] sm:$0xf] %vm1818_vm5, %v1812_v13  ;;  %v1671_v15 = vmax.f32 %v7932_v2, %v1623_v44  ;;  %v1594_v29 = vpop.permute.xlu0 %1593  ;;  %7030 = vmatprep.subr.msk.bf16.mxu1 %vm1916_vm2, %v7083_v12  ;;  %v2100_v7 = vpack.c.bf16 %v2093_v0, %v2092_v40  ;;  %v2095_v11 = vld [vmem:[#allocation3 + $0x32] sm:$0xff]  ;;  %v2094_v13 = vld [vmem:[#allocation3 + $0x22] sm:$0xff] }
 0x329   :  { %v1723_v18 = vld [vmem:[#allocation2 + $0x90] ss:$2 sm:$0xff]  ;;  %v1755_v20 = vld [vmem:[#allocation2 + $0x91] ss:$2 sm:$0xff]  ;;  %v2101_v14 = vpack.c.bf16 %v2095_v11, %v2094_v13  ;;  %v2096_v44 = vld [vmem:[#allocation3 + $0x42] sm:$0xff] }
 0x32a   :  { %v1774_v46 = vmax.f32 %v1723_v18, %v1755_v20  ;;  %1696 = vst.msk [vmem:[#allocation2 + $0xa8] sm:$0xff] %vm1674_vm4, %v1671_v15  ;;  %v1596_v22 = vpop.permute.xlu1 %1595  ;;  %v7090_v15 = vld [vmem:[%s9314_s4 + $0x74] sm:$0xff]   ;;  %v2586_v40 = vld [vmem:[%s9316_s1 + $0x21] sm:$0xff]  ;;  %v2590_v13 = vld [vmem:[%s9316_s1 + $0x49] sm:$0xff] }
 0x32b   :  { %v1624_v24 = vsel %vm1601_vm3, %v1594_v29, %v1596_v22  ;;  %6340 = vmatpush3.bf16.msra.mxu1 %v2025_v63  ;;  %v1839_v56 = vld [vmem:[#allocation3 + $0x50] sm:$0xff]  ;;  %v7091_v63 = vld [vmem:[%s9314_s4 + $0x7c] sm:$0xff]  }
 0x32c   :  { %v1797_v2 = vadd.f32 %v7968_v19, %v1774_v46  ;;  %v1672_v31 = vmax.f32 %v7938_v4, %v1624_v24  ;;  %6349 = vmatprep.subr.bf16.mxu1 %v7084_v16  ;;  %v1598_v50 = vpop.permute.xlu0 %1597  ;;  %v1844_v8 = vpack.c.bf16 %v1839_v56, %v1838_v60  ;;  %v2230_v18 = vld [vmem:[#allocation3 + $0x13] sm:$0xff]  ;;  %v2229_v22 = vld [vmem:[#allocation3 + $0x3] sm:$0xff] }
 0x32d   :  { %v1725_v26 = vld [vmem:[#allocation2 + $0xa0] ss:$2 sm:$0xf]  ;;  %v1757_v28 = vld [vmem:[#allocation2 + $0xa1] ss:$2 sm:$0xf] }
 0x32e   :  { %v1813_v17 = vmax.f32 %v1797_v2, 0.0  ;;  %v1775_v30 = vmax.f32 %v1725_v26, %v1757_v28  ;;  %1697 = vst.msk [vmem:[#allocation2 + $0xb0] sm:$0xff] %vm1674_vm4, %v1672_v31  ;;  %v1600_v32 = vpop.permute.xlu1 %1599  ;;  %v7092_v24 = vld [vmem:[%s9314_s4 + $0x84] sm:$0xff]   ;;  %v2237_v2 = vpack.c.bf16 %v2230_v18, %v2229_v22  ;;  %v7093_v31 = vld [vmem:[%s9314_s4 + $0x8c] ss:$0 sps:$4 sm:$0xff]   ;;  %v7094_v28 = vld [vmem:[%s9314_s4 + $0x90] sm:$0xff]  }
 0x32f   :  { %v1625_v34 = vsel %vm1601_vm3, %v1598_v50, %v1600_v32  ;;  %v1860_v33 = vld [vmem:[#allocation3 + $0x51] sm:$0xff]  ;;  %v2291_v26 = vsel %vm1916_vm2, %v7093_v31, 0  ;;  %v2231_v50 = vld [vmem:[#allocation3 + $0x23] sm:$0xff] }
 0x330   :  { %1830 = vst.msk [vmem:[#allocation3 + $0x60] sm:$0xff] %vm1674_vm4, %v1813_v17  ;;  %v1798_v37 = vadd.f32 %v7968_v19, %v1775_v30  ;;  %v1673_v21 = vmax.f32 %v7942_v6, %v1625_v34  ;;  %v1865_v4 = vpack.c.bf16 %v1860_v33, %v1859_v36  ;;  %v2097_v12 = vld [vmem:[#allocation3 + $0x52] sm:$0xff]  ;;  %v2233_v34 = vld [vmem:[#allocation3 + $0x43] sm:$0xff] }
 0x331   :  { %v2102_v29 = vpack.c.bf16 %v2097_v12, %v2096_v44  ;;  %v2232_v17 = vld [vmem:[#allocation3 + $0x33] sm:$0xff]  ;;  %v7107_v56 = vld [vmem:[%s9312_s2 + $0x4] ss:$8 sps:$4 sm:$0xff]  }
 0x332   :  { %v1814_v39 = vmax.f32 %v1798_v37, 0.0  ;;  %1698 = vst.msk [vmem:[#allocation2 + $0xb8] sm:$0xff] %vm1674_vm4, %v1673_v21  ;;  %6327 = vmatprep.mubr.msk.bf16.mxu1 %vm1674_vm4, %v1865_v4  ;;  %v2234_v30 = vld [vmem:[#allocation3 + $0x53] sm:$0xff]  ;;  %v2238_v32 = vpack.c.bf16 %v2232_v17, %v2231_v50  ;;  %v7096_v37 = vld [vmem:[%s9314_s4 + $0xa0] sm:$0xff]   ;;  %v2602_v50 = vld [vmem:[%s9316_s1 + $0xc9] sm:$0xff] }
 0x333   :  { %v7095_v36 = vld [vmem:[%s9314_s4 + $0x98] sm:$0xff]   ;;  %v2239_v33 = vpack.c.bf16 %v2234_v30, %v2233_v34  ;;  %v2589_v12 = vld [vmem:[%s9316_s1 + $0x41] sm:$0xff] }
 0x334   :  { %1831 = vst.msk [vmem:[#allocation3 + $0x68] sm:$0xf] %vm1818_vm5, %v1814_v39  ;;  %v2367_v4 = vld [vmem:[#allocation3 + $0x14] sm:$0xff]  ;;  %v2601_v30 = vld [vmem:[%s9316_s1 + $0xc1] sm:$0xff] }
 0x335   :  { %v1727_v53 = vld [vmem:[#allocation2 + $0xa8] ss:$2 sm:$0xff]  ;;  %v1759_v41 = vld [vmem:[#allocation2 + $0xa9] ss:$2 sm:$0xff] }
 0x336   :  { %v1776_v42 = vmax.f32 %v1727_v53, %v1759_v41  ;;  %v2366_v41 = vld [vmem:[#allocation3 + $0x4] sm:$0xff]  ;;  %v7108_v0 = vld [vmem:[%s9312_s2 + $0x14] ss:$8 sps:$4 sm:$0x3f]  }
 0x337   :  { %v1840_v3 = vld [vmem:[#allocation3 + $0x60] sm:$0xff]  ;;  %v2591_v44 = vld [vmem:[%s9316_s1 + $0x51] sm:$0xff] }
 0x338   :  { %v1799_v43 = vadd.f32 %v7968_v19, %v1776_v42  ;;  %v7097_v42 = vld [vmem:[%s9314_s4 + $0xa8] sm:$0xff]   ;;  %v2603_v34 = vld [vmem:[%s9316_s1 + $0xd1] sm:$0xff] }
 0x339   :  { %v1729_v23 = vld [vmem:[#allocation2 + $0xb8] ss:$2 sm:$0xf]  ;;  %v1761_v35 = vld [vmem:[#allocation2 + $0xb9] ss:$2 sm:$0xf] }
 0x33a   :  { %v1815_v45 = vmax.f32 %v1799_v43, 0.0  ;;  %v1777_v55 = vmax.f32 %v1729_v23, %v1761_v35  ;;  %v2374_v43 = vpack.c.bf16 %v2367_v4, %v2366_v41  ;;  %v7098_v23 = vld [vmem:[%s9314_s4 + $0xb0] ss:$0 sps:$4 sm:$0xff]  }
 0x33b   :  { %v1861_v49 = vld [vmem:[#allocation3 + $0x61] sm:$0xff]  ;;  %v2428_v35 = vsel %vm1916_vm2, %v7098_v23, 0 }
 0x33c   :  { %1832 = vst.msk [vmem:[#allocation3 + $0x70] sm:$0xff] %vm1674_vm4, %v1815_v45  ;;  %v1800_v6 = vadd.f32 %v7968_v19, %v1777_v55  ;;  %v7085_v19 = vld [vmem:[%s9314_s4 + $0x50] sm:$0xff]   ;;  %v2098_v20 = vld [vmem:[#allocation3 + $0x62] sm:$0xff] }
 0x33d   :  { %v2235_v39 = vld [vmem:[#allocation3 + $0x63] sm:$0xff]  ;;  %v2369_v55 = vld [vmem:[#allocation3 + $0x34] sm:$0xff] }
 0x33e   :  { %v1816_v47 = vmax.f32 %v1800_v6, 0.0  ;;  %v7101_v45 = vld [vmem:[%s9312_s2 + $0x24] ss:$8 sps:$4 sm:$0xff]   ;;  %v2371_v6 = vld [vmem:[#allocation3 + $0x54] sm:$0xff] }
 0x340   :  { %1833 = vst.msk [vmem:[#allocation3 + $0x78] sm:$0xf] %vm1818_vm5, %v1816_v47  ;;  %v2368_v47 = vld [vmem:[#allocation3 + $0x24] sm:$0xff] }
 0x343   :  { %v1841_v59 = vld [vmem:[#allocation3 + $0x70] sm:$0xff] }
 0x344   :  { %v1845_v5 = vpack.c.bf16 %v1841_v59, %v1840_v3  ;;  %v7105_v59 = vld [vmem:[%s9312_s2] ss:$8 sps:$4 sm:$0xff]   ;;  %v7110_v3 = vld [vmem:[%s9312_s2 + $0x10] ss:$8 sps:$4 sm:$0x3f]  }
 0x347   :  { %v1862_v51 = vld [vmem:[#allocation3 + $0x71] sm:$0xff] }
 0x348   :  { %v1866_v57 = vpack.c.bf16 %v1862_v51, %v1861_v49  ;;  %v2236_v21 = vld [vmem:[#allocation3 + $0x73] sm:$0xff]  ;;  %v2375_v51 = vpack.c.bf16 %v2369_v55, %v2368_v47 }
 0x349   :  { %v2240_v53 = vpack.c.bf16 %v2236_v21, %v2235_v39  ;;  %v7102_v49 = vld [vmem:[%s9312_s2 + $0x34] ss:$8 sps:$4 sm:$0x3f]   ;;  %v2543_v39 = vld [vmem:[%s9316_s1] sm:$0xff] }
 0x34a   :  { %6328 = vmatmul.mubr.msk.bf16.gmra.mrb[4].mxu1 %vm1674_vm4, %v1866_v57  ;;  %v2370_v57 = vld [vmem:[#allocation3 + $0x44] sm:$0xff]  ;;  %v2373_v25 = vld [vmem:[#allocation3 + $0x74] sm:$0xff] }
 0x34b   :  { %6341 = vmatprep.mubr.msk.bf16.mxu1 %vm1674_vm4, %v1842_v54  ;;  %v2376_v54 = vpack.c.bf16 %v2371_v6, %v2370_v57  ;;  %v2606_v21 = vld [vmem:[%s9316_s1 + $0xf1] sm:$0xff]  ;;  %v7119_v6 = vld [vmem:[%s9312_s2 + $0x64] ss:$8 sps:$4 sm:$0xff]  }
 0x34c   :  { %v2549_v57 = vld [vmem:[%s9316_s1 + $0x40] sm:$0xff] }
 0x352   :  { %6342 = vmatmul.mubr.msk.bf16.vlgmr.msra.gmra.mrb[0].mxu1 %vm1674_vm4, %v1843_v58  ;;  %v2372_v58 = vld [vmem:[#allocation3 + $0x64] sm:$0xff] }
 0x353   :  { %6350 = vmatpush3.bf16.msra.mxu1 %v7084_v16  ;;  %6345 = vmatprep.mubr.msk.bf16.mxu1 %vm1674_vm4, %v1844_v8  ;;  %v2099_v16 = vld [vmem:[#allocation3 + $0x72] sm:$0xff]  ;;  %v2377_v60 = vpack.c.bf16 %v2373_v25, %v2372_v58  ;;  %v2584_v8 = vld [vmem:[%s9316_s1 + $0x9] sm:$0xff] }
 0x354   :  { %6351 = vmatprep.subr.bf16.mxu1 %v7085_v19  ;;  %v2103_v46 = vpack.c.bf16 %v2099_v16, %v2098_v20  ;;  %v2594_v16 = vld [vmem:[%s9316_s1 + $0x71] sm:$0xff]  ;;  %v2595_v20 = vld [vmem:[%s9316_s1 + $0x81] sm:$0xff] }
 0x355   :  { %v2553_v58 = vld [vmem:[%s9316_s1 + $0x68] sm:$0xff] }
 0x357   :  { %6352 = vmatpush3.bf16.msra.mxu1 %v7085_v19  ;;  %v2583_v19 = vld [vmem:[%s9316_s1 + $0x1] sm:$0xff] }
 0x358   :  { %6353 = vmatprep.subr.bf16.mxu1 %v7086_v62 }
 0x35a   :  { %6346 = vmatmul.mubr.msk.bf16.gmra.mrb[4].mxu1 %vm1674_vm4, %v1845_v5  ;;  %v2585_v5 = vld [vmem:[%s9316_s1 + $0x11] sm:$0xff] }
 0x35b   :  { %6354 = vmatpush3.bf16.msra.mxu1 %v7086_v62  ;;  %6359 = vmatprep.mubr.msk.bf16.mxu1 %vm1674_vm4, %v2100_v7  ;;  %v2607_v62 = vpack.c.bf16 %v2584_v8, %v2583_v19  ;;  %v7113_v7 = vld [vmem:[%s9312_s2 + $0x44] ss:$8 sps:$4 sm:$0xff]  }
 0x35c   :  { %6355 = vmatprep.subr.bf16.mxu1 %v7087_v27  ;;  %v2555_v8 = vld [vmem:[%s9316_s1 + $0x80] sm:$0xff] }
 0x35f   :  { %6356 = vmatpush3.bf16.msra.mxu1 %v7087_v27  ;;  %v2891_v27 = vsel %vm178_vm0, %v7110_v3, 0  ;;  %v2558_v3 = vld [vmem:[%s9316_s1 + $0xa0] sm:$0xff] }
 0x360   :  { %7031 = vmatprep.subr.msk.bf16.mxu1 %vm1916_vm2, %v7088_v9  ;;  %v2608_v9 = vpack.c.bf16 %v2586_v40, %v2585_v5  ;;  %v2559_v40 = vld [vmem:[%s9316_s1 + $0xa8] sm:$0xff] }
 0x363   :  { %6358 = vmatpush3.bf16.msra.mxu1 %v2154_v61  ;;  %v2587_v61 = vld [vmem:[%s9316_s1 + $0x29] sm:$0xff] }
 0x364   :  { %6367 = vmatprep.subr.bf16.mxu1 %v7089_v10 }
 0x366   :  { %6360 = vmatmul.mubr.msk.bf16.vlgmr.msra.gmra.mrb[0].mxu1 %vm1674_vm4, %v2101_v14  ;;  %v2610_v14 = vpack.c.bf16 %v2590_v13, %v2589_v12  ;;  %v2564_v12 = vld [vmem:[%s9316_s1 + $0xe0] sm:$0xff] }
 0x367   :  { %6363 = vmatprep.mubr.msk.bf16.mxu1 %vm1674_vm4, %v2102_v29  ;;  %6368 = vmatpush3.bf16.msra.mxu1 %v7089_v10  ;;  %v2588_v10 = vld [vmem:[%s9316_s1 + $0x31] sm:$0xff] }
 0x368   :  { %6369 = vmatprep.subr.bf16.mxu1 %v7090_v15  ;;  %v2609_v11 = vpack.c.bf16 %v2588_v10, %v2587_v61  ;;  %v2562_v61 = vld [vmem:[%s9316_s1 + $0xc8] sm:$0xff] }
 0x36b   :  { %6370 = vmatpush3.bf16.msra.mxu1 %v7090_v15  ;;  %v2592_v15 = vld [vmem:[%s9316_s1 + $0x61] sm:$0xff] }
 0x36c   :  { %6371 = vmatprep.subr.bf16.mxu1 %v7091_v63  ;;  %v2611_v29 = vpack.c.bf16 %v2592_v15, %v2591_v44  ;;  %v2566_v44 = vld [vmem:[%s9316_s1 + $0xf0] sm:$0xff] }
 0x36e   :  { %6364 = vmatmul.mubr.msk.bf16.gmra.mrb[4].mxu1 %vm1674_vm4, %v2103_v46  ;;  %v2596_v46 = vld [vmem:[%s9316_s1 + $0x89] sm:$0xff] }
 0x36f   :  { %6372 = vmatpush3.bf16.msra.mxu1 %v7091_v63  ;;  %6377 = vmatprep.mubr.msk.bf16.mxu1 %vm1674_vm4, %v2237_v2  ;;  %v2593_v63 = vld [vmem:[%s9316_s1 + $0x69] sm:$0xff]  ;;  %v2613_v22 = vpack.c.bf16 %v2596_v46, %v2595_v20  ;;  %v2598_v2 = vld [vmem:[%s9316_s1 + $0xa1] sm:$0xff]  ;;  %v7120_v20 = vld [vmem:[%s9312_s2 + $0x74] ss:$8 sps:$4 sm:$0x3f]  }
 0x370   :  { %6373 = vmatprep.subr.bf16.mxu1 %v7092_v24  ;;  %v2612_v18 = vpack.c.bf16 %v2594_v16, %v2593_v63  ;;  %v3050_v63 = vld [vmem:[%s9316_s1 + $0xa] sm:$0xff] }
 0x371   :  { %v7122_v46 = vld [vmem:[%s9312_s2 + $0x70] ss:$8 sps:$4 sm:$0x3f]  }
 0x373   :  { %6374 = vmatpush3.bf16.msra.mxu1 %v7092_v24  ;;  %v2597_v24 = vld [vmem:[%s9316_s1 + $0x91] sm:$0xff] }
 0x374   :  { %7032 = vmatprep.subr.msk.bf16.mxu1 %vm1916_vm2, %v7093_v31  ;;  %v2614_v31 = vpack.c.bf16 %v2598_v2, %v2597_v24  ;;  %v3052_v24 = vld [vmem:[%s9316_s1 + $0x22] sm:$0xff]  ;;  %v3445_v2 = vsel %vm178_vm0, %v7122_v46, 0  ;;  %v3360_v46 = vld [vmem:[%s9316_s1 + $0x6b] sm:$0xff] }
 0x377   :  { %6376 = vmatpush3.bf16.msra.mxu1 %v2291_v26  ;;  %v2599_v26 = vld [vmem:[%s9316_s1 + $0xa9] sm:$0xff] }
 0x378   :  { %6385 = vmatprep.subr.bf16.mxu1 %v7094_v28 }
 0x37a   :  { %6378 = vmatmul.mubr.msk.bf16.vlgmr.msra.gmra.mrb[0].mxu1 %vm1674_vm4, %v2238_v32  ;;  %v2616_v32 = vpack.c.bf16 %v2602_v50, %v2601_v30 }
 0x37b   :  { %6381 = vmatprep.mubr.msk.bf16.mxu1 %vm1674_vm4, %v2239_v33  ;;  %6386 = vmatpush3.bf16.msra.mxu1 %v7094_v28  ;;  %v2600_v28 = vld [vmem:[%s9316_s1 + $0xb1] sm:$0xff] }
 0x37c   :  { %6387 = vmatprep.subr.bf16.mxu1 %v7095_v36  ;;  %v2615_v17 = vpack.c.bf16 %v2600_v28, %v2599_v26 }
 0x37f   :  { %6388 = vmatpush3.bf16.msra.mxu1 %v7095_v36  ;;  %v2604_v36 = vld [vmem:[%s9316_s1 + $0xe1] sm:$0xff] }
 0x380   :  { %6389 = vmatprep.subr.bf16.mxu1 %v7096_v37  ;;  %v2617_v33 = vpack.c.bf16 %v2604_v36, %v2603_v34  ;;  %v3054_v34 = vld [vmem:[%s9316_s1 + $0x32] sm:$0xff] }
 0x382   :  { %6382 = vmatmul.mubr.msk.bf16.gmra.mrb[4].mxu1 %vm1674_vm4, %v2240_v53  ;;  %v2544_v53 = vld [vmem:[%s9316_s1 + $0x8] sm:$0xff] }
 0x383   :  { %6390 = vmatpush3.bf16.msra.mxu1 %v7096_v37  ;;  %6395 = vmatprep.mubr.msk.bf16.mxu1 %vm1674_vm4, %v2374_v43  ;;  %v2605_v37 = vld [vmem:[%s9316_s1 + $0xe9] sm:$0xff]  ;;  %v2567_v41 = vpack.c.bf16 %v2544_v53, %v2543_v39  ;;  %v7114_v43 = vld [vmem:[%s9312_s2 + $0x54] ss:$8 sps:$4 sm:$0x3f]  }
 0x384   :  { %6391 = vmatprep.subr.bf16.mxu1 %v7097_v42  ;;  %v2618_v4 = vpack.c.bf16 %v2606_v21, %v2605_v37  ;;  %v3055_v39 = vld [vmem:[%s9316_s1 + $0x42] sm:$0xff]  ;;  %v3056_v53 = vld [vmem:[%s9316_s1 + $0x4a] sm:$0xff] }
 0x387   :  { %6392 = vmatpush3.bf16.msra.mxu1 %v7097_v42  ;;  %v7111_v42 = vld [vmem:[%s9312_s2 + $0x40] ss:$8 sps:$4 sm:$0xff]  }
 0x388   :  { %7033 = vmatprep.subr.msk.bf16.mxu1 %vm1916_vm2, %v7098_v23  ;;  %v7116_v23 = vld [vmem:[%s9312_s2 + $0x50] ss:$8 sps:$4 sm:$0x3f]  }
 0x389   :  { %v3144_v55 = vsel %vm178_vm0, %v7116_v23, 0 }
 0x38b   :  { %6394 = vmatpush3.bf16.msra.mxu1 %v2428_v35  ;;  %v2545_v35 = vld [vmem:[%s9316_s1 + $0x10] sm:$0xff] }
 0x38c   :  { %2683 = vmatprep.subr.bf16.mxu1 %v7101_v45  ;;  %v2546_v45 = vld [vmem:[%s9316_s1 + $0x20] sm:$0xff] }
 0x38d   :  { %v2568_v47 = vpack.c.bf16 %v2546_v45, %v2545_v35  ;;  %v3059_v35 = vld [vmem:[%s9316_s1 + $0x6a] sm:$0xff]  ;;  %v3060_v45 = vld [vmem:[%s9316_s1 + $0x72] sm:$0xff] }
 0x38e   :  { %6396 = vmatmul.mubr.msk.bf16.vlgmr.msra.gmra.mrb[0].mxu1 %vm1674_vm4, %v2375_v51 }
 0x38f   :  { %6399 = vmatprep.mubr.msk.bf16.mxu1 %vm1674_vm4, %v2376_v54  ;;  %2684 = vmatpush1.bf16.msra.mxu1 %v7099_v48  ;;  %v2547_v48 = vld [vmem:[%s9316_s1 + $0x28] sm:$0xff]  ;;  %v2570_v54 = vpack.c.bf16 %v2550_v52, %v2549_v57 }
 0x390   :  { %5946 = vmatprep.subr.msk.bf16.mxu1 %vm178_vm0, %v7102_v49  ;;  %v2548_v49 = vld [vmem:[%s9316_s1 + $0x30] sm:$0xff] }
 0x391   :  { %v2569_v51 = vpack.c.bf16 %v2548_v49, %v2547_v48  ;;  %v3063_v49 = vld [vmem:[%s9316_s1 + $0x92] sm:$0xff]  ;;  %v3065_v52 = vld [vmem:[%s9316_s1 + $0xaa] sm:$0xff] }
 0x393   :  { %2686 = vmatpush1.bf16.msra.mxu1 %v2678_v38  ;;  %v2551_v38 = vld [vmem:[%s9316_s1 + $0x50] sm:$0xff] }
 0x394   :  { %2896 = vmatprep.subr.bf16.mxu1 %v7107_v56  ;;  %v2552_v56 = vld [vmem:[%s9316_s1 + $0x60] sm:$0xff] }
 0x395   :  { %v2571_v25 = vpack.c.bf16 %v2552_v56, %v2551_v38  ;;  %v3067_v56 = vld [vmem:[%s9316_s1 + $0xc2] sm:$0xff] }
 0x396   :  { %6400 = vmatmul.mubr.msk.bf16.gmra.mrb[4].mxu1 %vm1674_vm4, %v2377_v60  ;;  %v2554_v60 = vld [vmem:[%s9316_s1 + $0x70] sm:$0xff] }
 0x397   :  { %2715 = vmatprep.mubr.bf16.mxu1 %v7191_v1  ;;  %v2572_v19 = vpack.c.bf16 %v2554_v60, %v2553_v58  ;;  %v3069_v60 = vld [vmem:[%s9316_s1 + $0xd2] sm:$0xff] }
 0x39e   :  { %5947 = vmatmul.mubr.msk.bf16.vlgmr.msra.gmra.mrb[8].mxu1 %vm141_vm1, %v2607_v62  ;;  %v2556_v62 = vld [vmem:[%s9316_s1 + $0x88] sm:$0xff] }
 0x39f   :  { %2897 = vmatpush1.bf16.msra.mxu1 %v7105_v59  ;;  %2725 = vmatprep.mubr.bf16.mxu1 %v7191_v1  ;;  %v2573_v59 = vpack.c.bf16 %v2556_v62, %v2555_v8  ;;  %v3071_v62 = vld [vmem:[%s9316_s1 + $0xea] sm:$0xff] }
 0x3a0   :  { %5963 = vmatprep.subr.msk.bf16.mxu1 %vm178_vm0, %v7108_v0  ;;  %v2557_v0 = vld [vmem:[%s9316_s1 + $0x90] sm:$0xff] }
 0x3a1   :  { %v2574_v5 = vpack.c.bf16 %v2558_v3, %v2557_v0  ;;  %v3350_v3 = vld [vmem:[%s9316_s1 + $0x3] sm:$0xff] }
 0x3a3   :  { %2899 = vmatpush1.bf16.msra.mxu1 %v2891_v27  ;;  %v2560_v27 = vld [vmem:[%s9316_s1 + $0xb0] sm:$0xff] }
 0x3a4   :  { %3149 = vmatprep.subr.bf16.mxu1 %v7113_v7  ;;  %v2575_v7 = vpack.c.bf16 %v2560_v27, %v2559_v40  ;;  %v7123_v27 = vld [vmem:[%s9312_s2 + $0x80] ss:$8 sps:$4 sm:$0xff]  }
 0x3a6   :  { %5948 = vmatmul.mubr.msk.bf16.gmra.mrb[12].mxu1 %vm141_vm1, %v2608_v9  ;;  %v2561_v9 = vld [vmem:[%s9316_s1 + $0xc0] sm:$0xff] }
 0x3a7   :  { %2735 = vmatprep.mubr.bf16.mxu1 %v7191_v1  ;;  %v2576_v10 = vpack.c.bf16 %v2562_v61, %v2561_v9  ;;  %v7128_v9 = vld [vmem:[%s9312_s2 + $0x90] ss:$8 sps:$4 sm:$0x3f]  }
 0x3a8   :  { %v3352_v61 = vld [vmem:[%s9316_s1 + $0x13] sm:$0xff] }
 0x3ae   :  { %5949 = vmatmul.mubr.msk.bf16.gmra.mrb[16].mxu1 %vm141_vm1, %v2609_v11  ;;  %v2563_v11 = vld [vmem:[%s9316_s1 + $0xd0] sm:$0xff] }
 0x3af   :  { %2745 = vmatprep.mubr.bf16.mxu1 %v7191_v1  ;;  %v2577_v13 = vpack.c.bf16 %v2564_v12, %v2563_v11  ;;  %v3746_v11 = vsel %vm178_vm0, %v7128_v9, 0 }
 0x3b6   :  { %5950 = vmatmul.mubr.msk.bf16.gmra.mrb[20].mxu1 %vm141_vm1, %v2610_v14  ;;  %v2565_v14 = vld [vmem:[%s9316_s1 + $0xe8] sm:$0xff] }
 0x3b7   :  { %2755 = vmatprep.mubr.bf16.mxu1 %v7191_v1  ;;  %v2578_v15 = vpack.c.bf16 %v2566_v44, %v2565_v14  ;;  %v3355_v14 = vld [vmem:[%s9316_s1 + $0x33] sm:$0xff] }
 0x3be   :  { %5951 = vmatmul.mubr.msk.bf16.gmra.mrb[24].mxu1 %vm141_vm1, %v2611_v29  ;;  %v3049_v29 = vld [vmem:[%s9316_s1 + $0x2] sm:$0xff] }
 0x3bf   :  { %2765 = vmatprep.mubr.bf16.mxu1 %v7191_v1  ;;  %v3073_v16 = vpack.c.bf16 %v3050_v63, %v3049_v29  ;;  %v3357_v29 = vld [vmem:[%s9316_s1 + $0x4b] sm:$0xff] }
 0x3c6   :  { %5952 = vmatmul.mubr.msk.bf16.gmra.mrb[28].mxu1 %vm141_vm1, %v2612_v18  ;;  %v7117_v18 = vld [vmem:[%s9312_s2 + $0x60] ss:$8 sps:$4 sm:$0xff]  }
 0x3c7   :  { %2775 = vmatprep.mubr.bf16.mxu1 %v7191_v1 }
 0x3ce   :  { %5953 = vmatmul.mubr.msk.bf16.gmra.mrb[32].mxu1 %vm141_vm1, %v2613_v22  ;;  %v3051_v22 = vld [vmem:[%s9316_s1 + $0x12] sm:$0xff] }
 0x3cf   :  { %2785 = vmatprep.mubr.bf16.mxu1 %v7191_v1 }
 0x3d6   :  { %5954 = vmatmul.mubr.msk.bf16.gmra.mrb[36].mxu1 %vm141_vm1, %v2614_v31  ;;  %v7125_v31 = vld [vmem:[%s9312_s2 + $0x84] ss:$8 sps:$4 sm:$0xff]  }
 0x3d7   :  { %2795 = vmatprep.mubr.bf16.mxu1 %v7191_v1 }
 0x3de   :  { %5955 = vmatmul.mubr.msk.bf16.gmra.mrb[40].mxu1 %vm141_vm1, %v2615_v17  ;;  %v3074_v17 = vpack.c.bf16 %v3052_v24, %v3051_v22  ;;  %v3361_v22 = vld [vmem:[%s9316_s1 + $0x73] sm:$0xff] }
 0x3df   :  { %2805 = vmatprep.mubr.bf16.mxu1 %v7191_v1  ;;  %v3379_v24 = vpack.c.bf16 %v3361_v22, %v3360_v46  ;;  %v3674_v46 = vld [vmem:[%s9316_s1 + $0xf4] sm:$0xff] }
 0x3e6   :  { %5956 = vmatmul.mubr.msk.bf16.gmra.mrb[44].mxu1 %vm141_vm1, %v2616_v32  ;;  %v3053_v32 = vld [vmem:[%s9316_s1 + $0x2a] sm:$0xff] }
 0x3e7   :  { %2815 = vmatprep.mubr.bf16.mxu1 %v7191_v1  ;;  %v3075_v37 = vpack.c.bf16 %v3054_v34, %v3053_v32  ;;  %v3364_v32 = vld [vmem:[%s9316_s1 + $0x93] sm:$0xff]  ;;  %v3365_v34 = vld [vmem:[%s9316_s1 + $0xa3] sm:$0xff] }
 0x3ee   :  { %5957 = vmatmul.mubr.msk.bf16.gmra.mrb[48].mxu1 %vm141_vm1, %v2617_v33 }
 0x3ef   :  { %2825 = vmatprep.mubr.bf16.mxu1 %v7191_v1 }
 0x3f6   :  { %5958 = vmatmul.mubr.msk.bf16.gmra.mrb[52].mxu1 %vm141_vm1, %v2618_v4 }
 0x3f7   :  { %2928 = vmatprep.mubr.bf16.mxu1 %v7191_v1 }
 0x3fe   :  { %5964 = vmatmul.mubr.msk.bf16.vlgmr.msra.gmra.mrb[8].mxu1 %vm141_vm1, %v2567_v41  ;;  %v3076_v41 = vpack.c.bf16 %v3056_v53, %v3055_v39  ;;  %v3366_v39 = vld [vmem:[%s9316_s1 + $0xab] sm:$0xff]  ;;  %v3367_v53 = vld [vmem:[%s9316_s1 + $0xb3] sm:$0xff] }
 0x3ff   :  { %3150 = vmatpush1.bf16.msra.mxu1 %v7111_v42  ;;  %2938 = vmatprep.mubr.bf16.mxu1 %v7191_v1  ;;  %v3057_v42 = vld [vmem:[%s9316_s1 + $0x52] sm:$0xff] }
 0x400   :  { %5984 = vmatprep.subr.msk.bf16.mxu1 %vm178_vm0, %v7114_v43  ;;  %v3058_v43 = vld [vmem:[%s9316_s1 + $0x62] sm:$0xff] }
 0x401   :  { %v3077_v23 = vpack.c.bf16 %v3058_v43, %v3057_v42  ;;  %v3368_v42 = vld [vmem:[%s9316_s1 + $0xc3] sm:$0xff]  ;;  %v3369_v43 = vld [vmem:[%s9316_s1 + $0xcb] sm:$0xff] }
 0x403   :  { %3152 = vmatpush1.bf16.msra.mxu1 %v3144_v55  ;;  %v3078_v55 = vpack.c.bf16 %v3060_v45, %v3059_v35  ;;  %v3370_v35 = vld [vmem:[%s9316_s1 + $0xd3] sm:$0xff]  ;;  %v3371_v45 = vld [vmem:[%s9316_s1 + $0xe3] sm:$0xff] }
 0x404   :  { %3450 = vmatprep.subr.bf16.mxu1 %v7119_v6  ;;  %v3061_v6 = vld [vmem:[%s9316_s1 + $0x82] sm:$0xff] }
 0x406   :  { %5965 = vmatmul.mubr.msk.bf16.gmra.mrb[12].mxu1 %vm141_vm1, %v2568_v47  ;;  %v3062_v47 = vld [vmem:[%s9316_s1 + $0x8a] sm:$0xff] }
 0x407   :  { %2948 = vmatprep.mubr.bf16.mxu1 %v7191_v1  ;;  %v3079_v48 = vpack.c.bf16 %v3062_v47, %v3061_v6  ;;  %v3372_v6 = vld [vmem:[%s9316_s1 + $0xeb] sm:$0xff]  ;;  %v3373_v47 = vld [vmem:[%s9316_s1 + $0xf3] sm:$0xff] }
 0x40e   :  { %5966 = vmatmul.mubr.msk.bf16.gmra.mrb[16].mxu1 %vm141_vm1, %v2569_v51  ;;  %v3064_v51 = vld [vmem:[%s9316_s1 + $0xa2] sm:$0xff] }
 0x40f   :  { %2958 = vmatprep.mubr.bf16.mxu1 %v7191_v1  ;;  %v3080_v57 = vpack.c.bf16 %v3064_v51, %v3063_v49  ;;  %v3651_v49 = vld [vmem:[%s9316_s1 + $0x4] sm:$0xff]  ;;  %v3652_v51 = vld [vmem:[%s9316_s1 + $0xc] sm:$0xff] }
 0x416   :  { %5967 = vmatmul.mubr.msk.bf16.gmra.mrb[20].mxu1 %vm141_vm1, %v2570_v54  ;;  %v3066_v54 = vld [vmem:[%s9316_s1 + $0xb2] sm:$0xff] }
 0x417   :  { %2968 = vmatprep.mubr.bf16.mxu1 %v7191_v1  ;;  %v3081_v38 = vpack.c.bf16 %v3066_v54, %v3065_v52  ;;  %v3653_v52 = vld [vmem:[%s9316_s1 + $0x14] sm:$0xff]  ;;  %v3654_v54 = vld [vmem:[%s9316_s1 + $0x24] sm:$0xff] }
 0x41e   :  { %5968 = vmatmul.mubr.msk.bf16.gmra.mrb[24].mxu1 %vm141_vm1, %v2571_v25  ;;  %v3068_v25 = vld [vmem:[%s9316_s1 + $0xca] sm:$0xff] }
 0x41f   :  { %2978 = vmatprep.mubr.bf16.mxu1 %v7191_v1  ;;  %v3082_v58 = vpack.c.bf16 %v3068_v25, %v3067_v56  ;;  %v3655_v56 = vld [vmem:[%s9316_s1 + $0x2c] sm:$0xff]  ;;  %v3656_v25 = vld [vmem:[%s9316_s1 + $0x34] sm:$0xff] }
 0x426   :  { %5969 = vmatmul.mubr.msk.bf16.gmra.mrb[28].mxu1 %vm141_vm1, %v2572_v19  ;;  %v3070_v19 = vld [vmem:[%s9316_s1 + $0xe2] sm:$0xff] }
 0x427   :  { %2988 = vmatprep.mubr.bf16.mxu1 %v7191_v1  ;;  %v3083_v8 = vpack.c.bf16 %v3070_v19, %v3069_v60  ;;  %v3657_v60 = vld [vmem:[%s9316_s1 + $0x44] sm:$0xff]  ;;  %v3658_v19 = vld [vmem:[%s9316_s1 + $0x4c] sm:$0xff] }
 0x42e   :  { %5970 = vmatmul.mubr.msk.bf16.gmra.mrb[32].mxu1 %vm141_vm1, %v2573_v59  ;;  %v3072_v59 = vld [vmem:[%s9316_s1 + $0xf2] sm:$0xff] }
 0x42f   :  { %2998 = vmatprep.mubr.bf16.mxu1 %v7191_v1  ;;  %v3084_v0 = vpack.c.bf16 %v3072_v59, %v3071_v62  ;;  %v3659_v62 = vld [vmem:[%s9316_s1 + $0x54] sm:$0xff]  ;;  %v3660_v59 = vld [vmem:[%s9316_s1 + $0x64] sm:$0xff] }
 0x436   :  { %5971 = vmatmul.mubr.msk.bf16.gmra.mrb[36].mxu1 %vm141_vm1, %v2574_v5  ;;  %v3351_v5 = vld [vmem:[%s9316_s1 + $0xb] sm:$0xff] }
 0x437   :  { %3008 = vmatprep.mubr.bf16.mxu1 %v7191_v1  ;;  %v3374_v40 = vpack.c.bf16 %v3351_v5, %v3350_v3  ;;  %v3661_v3 = vld [vmem:[%s9316_s1 + $0x6c] sm:$0xff]  ;;  %v3662_v5 = vld [vmem:[%s9316_s1 + $0x74] sm:$0xff] }
 0x43e   :  { %5972 = vmatmul.mubr.msk.bf16.gmra.mrb[40].mxu1 %vm141_vm1, %v2575_v7  ;;  %v7126_v7 = vld [vmem:[%s9312_s2 + $0x94] ss:$8 sps:$4 sm:$0x3f]  }
 0x43f   :  { %3018 = vmatprep.mubr.bf16.mxu1 %v7191_v1 }
 0x446   :  { %5973 = vmatmul.mubr.msk.bf16.gmra.mrb[44].mxu1 %vm141_vm1, %v2576_v10  ;;  %v3353_v10 = vld [vmem:[%s9316_s1 + $0x23] sm:$0xff] }
 0x447   :  { %3028 = vmatprep.mubr.bf16.mxu1 %v7191_v1  ;;  %v3375_v12 = vpack.c.bf16 %v3353_v10, %v3352_v61  ;;  %v3665_v61 = vld [vmem:[%s9316_s1 + $0x94] sm:$0xff]  ;;  %v3666_v10 = vld [vmem:[%s9316_s1 + $0xa4] sm:$0xff] }
 0x44e   :  { %5974 = vmatmul.mubr.msk.bf16.gmra.mrb[48].mxu1 %vm141_vm1, %v2577_v13  ;;  %v3354_v13 = vld [vmem:[%s9316_s1 + $0x2b] sm:$0xff] }
 0x44f   :  { %3038 = vmatprep.mubr.bf16.mxu1 %v7191_v1  ;;  %v3376_v44 = vpack.c.bf16 %v3355_v14, %v3354_v13  ;;  %v3668_v13 = vld [vmem:[%s9316_s1 + $0xb4] sm:$0xff] }
 0x456   :  { %5975 = vmatmul.mubr.msk.bf16.gmra.mrb[52].mxu1 %vm141_vm1, %v2578_v15  ;;  %v3356_v15 = vld [vmem:[%s9316_s1 + $0x43] sm:$0xff] }
 0x457   :  { %3181 = vmatprep.mubr.bf16.mxu1 %v7191_v1  ;;  %v3377_v63 = vpack.c.bf16 %v3357_v29, %v3356_v15  ;;  %v3670_v15 = vld [vmem:[%s9316_s1 + $0xcc] sm:$0xff] }
 0x45e   :  { %5985 = vmatmul.mubr.msk.bf16.vlgmr.msra.gmra.mrb[8].mxu1 %vm141_vm1, %v3073_v16  ;;  %v3358_v16 = vld [vmem:[%s9316_s1 + $0x53] sm:$0xff] }
 0x45f   :  { %3451 = vmatpush1.bf16.msra.mxu1 %v7117_v18  ;;  %3191 = vmatprep.mubr.bf16.mxu1 %v7191_v1  ;;  %v3359_v18 = vld [vmem:[%s9316_s1 + $0x63] sm:$0xff] }
 0x460   :  { %6005 = vmatprep.subr.msk.bf16.mxu1 %vm178_vm0, %v7120_v20  ;;  %v3378_v20 = vpack.c.bf16 %v3359_v18, %v3358_v16  ;;  %v3672_v16 = vld [vmem:[%s9316_s1 + $0xe4] sm:$0xff] }
 0x461   :  { %v8415_v26 = vpop.f32.mrb[0].mxu1 }
 0x462   :  { %v8417_v28 = vpop.f32.mrb[1].mxu1 }
 0x463   :  { %v8419_v30 = vpop.f32.mrb[2].mxu1  ;;  %3453 = vmatpush1.bf16.msra.mxu1 %v3445_v2  ;;  %v3362_v2 = vld [vmem:[%s9316_s1 + $0x83] sm:$0xff] }
 0x464   :  { %v8421_v50 = vpop.f32.mrb[3].mxu1  ;;  %3751 = vmatprep.subr.bf16.mxu1 %v7125_v31  ;;  %v3363_v31 = vld [vmem:[%s9316_s1 + $0x8b] sm:$0xff] }
 0x466   :  { %5986 = vmatmul.mubr.msk.bf16.gmra.mrb[12].mxu1 %vm141_vm1, %v3074_v17  ;;  %v3380_v17 = vpack.c.bf16 %v3363_v31, %v3362_v2 }
 0x467   :  { %3201 = vmatprep.mubr.bf16.mxu1 %v7191_v1 }
 0x469   :  { %v8431_v36 = vpop.f32.mrb[4].mxu1 }
 0x46a   :  { %v8433_v33 = vpop.f32.mrb[5].mxu1 }
 0x46b   :  { %v8435_v21 = vpop.f32.mrb[6].mxu1 }
 0x46c   :  { %v8437_v4 = vpop.f32.mrb[7].mxu1 }
 0x46e   :  { %5987 = vmatmul.mubr.msk.bf16.gmra.mrb[16].mxu1 %vm141_vm1, %v3075_v37  ;;  %v3381_v37 = vpack.c.bf16 %v3365_v34, %v3364_v32 }
 0x46f   :  { %3211 = vmatprep.mubr.bf16.mxu1 %v7191_v1 }
 0x476   :  { %5988 = vmatmul.mubr.msk.bf16.gmra.mrb[20].mxu1 %vm141_vm1, %v3076_v41  ;;  %v3382_v41 = vpack.c.bf16 %v3367_v53, %v3366_v39  ;;  %v7129_v39 = vld [vmem:[%s9314_s4 + $0x24] sm:$0xff]  }
 0x477   :  { %3221 = vmatprep.mubr.bf16.mxu1 %v7191_v1  ;;  %6403 = vmatprep.subr.bf16.mxu0 %v7129_v39 }
 0x478   :  { %6404 = vmatpush3.bf16.msra.mxu0 %v7129_v39 }
 0x47e   :  { %5989 = vmatmul.mubr.msk.bf16.gmra.mrb[24].mxu1 %vm141_vm1, %v3077_v23  ;;  %v3383_v23 = vpack.c.bf16 %v3369_v43, %v3368_v42 }
 0x47f   :  { %3231 = vmatprep.mubr.bf16.mxu1 %v7191_v1 }
 0x486   :  { %5990 = vmatmul.mubr.msk.bf16.gmra.mrb[28].mxu1 %vm141_vm1, %v3078_v55  ;;  %v3384_v55 = vpack.c.bf16 %v3371_v45, %v3370_v35 }
 0x487   :  { %3241 = vmatprep.mubr.bf16.mxu1 %v7191_v1 }
 0x48e   :  { %5991 = vmatmul.mubr.msk.bf16.gmra.mrb[32].mxu1 %vm141_vm1, %v3079_v48  ;;  %v3385_v48 = vpack.c.bf16 %v3373_v47, %v3372_v6 }
 0x48f   :  { %3251 = vmatprep.mubr.bf16.mxu1 %v7191_v1 }
 0x496   :  { %5992 = vmatmul.mubr.msk.bf16.gmra.mrb[36].mxu1 %vm141_vm1, %v3080_v57  ;;  %v3675_v57 = vpack.c.bf16 %v3652_v51, %v3651_v49  ;;  %v7130_v49 = vld [vmem:[%s9314_s4 + $0x2c] sm:$0xff]  }
 0x497   :  { %3261 = vmatprep.mubr.bf16.mxu1 %v7191_v1  ;;  %6405 = vmatprep.subr.bf16.mxu0 %v7130_v49 }
 0x498   :  { %6406 = vmatpush3.bf16.msra.mxu0 %v7130_v49 }
 0x49e   :  { %5993 = vmatmul.mubr.msk.bf16.gmra.mrb[40].mxu1 %vm141_vm1, %v3081_v38  ;;  %v3676_v38 = vpack.c.bf16 %v3654_v54, %v3653_v52 }
 0x49f   :  { %3271 = vmatprep.mubr.bf16.mxu1 %v7191_v1 }
 0x4a6   :  { %5994 = vmatmul.mubr.msk.bf16.gmra.mrb[44].mxu1 %vm141_vm1, %v3082_v58  ;;  %v3677_v58 = vpack.c.bf16 %v3656_v25, %v3655_v56  ;;  %v7131_v56 = vld [vmem:[%s9314_s4 + $0x34] sm:$0xff]  }
 0x4a7   :  { %3281 = vmatprep.mubr.bf16.mxu1 %v7191_v1  ;;  %6407 = vmatprep.subr.bf16.mxu0 %v7131_v56 }
 0x4a8   :  { %6408 = vmatpush3.bf16.msra.mxu0 %v7131_v56 }
 0x4ae   :  { %5995 = vmatmul.mubr.msk.bf16.gmra.mrb[48].mxu1 %vm141_vm1, %v3083_v8  ;;  %v3678_v8 = vpack.c.bf16 %v3658_v19, %v3657_v60  ;;  %v7132_v19 = vld [vmem:[%s9314_s4 + $0x3c] sm:$0xff]  }
 0x4af   :  { %3291 = vmatprep.mubr.bf16.mxu1 %v7191_v1  ;;  %6409 = vmatprep.subr.bf16.mxu0 %v7132_v19 }
 0x4b0   :  { %6410 = vmatpush3.bf16.msra.mxu0 %v7132_v19 }
 0x4b6   :  { %5996 = vmatmul.mubr.msk.bf16.gmra.mrb[52].mxu1 %vm141_vm1, %v3084_v0  ;;  %v3679_v0 = vpack.c.bf16 %v3660_v59, %v3659_v62  ;;  %v7133_v62 = vld [vmem:[%s9314_s4 + $0x44] ss:$0 sps:$4 sm:$0xff]  }
 0x4b7   :  { %3482 = vmatprep.mubr.bf16.mxu1 %v7191_v1  ;;  %7034 = vmatprep.subr.msk.bf16.mxu0 %vm1916_vm2, %v7133_v62 }
 0x4be   :  { %6006 = vmatmul.mubr.msk.bf16.vlgmr.msra.gmra.mrb[8].mxu1 %vm141_vm1, %v3374_v40  ;;  %v3680_v40 = vpack.c.bf16 %v3662_v5, %v3661_v3 }
 0x4bf   :  { %3752 = vmatpush1.bf16.msra.mxu1 %v7123_v27  ;;  %3492 = vmatprep.mubr.bf16.mxu1 %v7191_v1  ;;  %v3663_v27 = vld [vmem:[%s9316_s1 + $0x84] sm:$0xff] }
 0x4c0   :  { %6026 = vmatprep.subr.msk.bf16.mxu1 %vm178_vm0, %v7126_v7  ;;  %v3664_v7 = vld [vmem:[%s9316_s1 + $0x8c] sm:$0xff] }
 0x4c1   :  { %v3681_v9 = vpack.c.bf16 %v3664_v7, %v3663_v27 }
 0x4c3   :  { %3754 = vmatpush1.bf16.msra.mxu1 %v3746_v11  ;;  %v3682_v11 = vpack.c.bf16 %v3666_v10, %v3665_v61 }
 0x4c6   :  { %6007 = vmatmul.mubr.msk.bf16.gmra.mrb[12].mxu1 %vm141_vm1, %v3375_v12  ;;  %v3667_v12 = vld [vmem:[%s9316_s1 + $0xac] sm:$0xff] }
 0x4c7   :  { %3502 = vmatprep.mubr.bf16.mxu1 %v7191_v1  ;;  %v3683_v14 = vpack.c.bf16 %v3668_v13, %v3667_v12 }
 0x4ce   :  { %6008 = vmatmul.mubr.msk.bf16.gmra.mrb[16].mxu1 %vm141_vm1, %v3376_v44  ;;  %v3669_v44 = vld [vmem:[%s9316_s1 + $0xc4] sm:$0xff] }
 0x4cf   :  { %3512 = vmatprep.mubr.bf16.mxu1 %v7191_v1  ;;  %v3684_v29 = vpack.c.bf16 %v3670_v15, %v3669_v44 }
 0x4d6   :  { %6009 = vmatmul.mubr.msk.bf16.gmra.mrb[20].mxu1 %vm141_vm1, %v3377_v63  ;;  %v3671_v63 = vld [vmem:[%s9316_s1 + $0xd4] sm:$0xff] }
 0x4d7   :  { %3522 = vmatprep.mubr.bf16.mxu1 %v7191_v1  ;;  %v3685_v18 = vpack.c.bf16 %v3672_v16, %v3671_v63 }
 0x4de   :  { %6010 = vmatmul.mubr.msk.bf16.gmra.mrb[24].mxu1 %vm141_vm1, %v3378_v20  ;;  %v3673_v20 = vld [vmem:[%s9316_s1 + $0xec] sm:$0xff] }
 0x4df   :  { %3532 = vmatprep.mubr.bf16.mxu1 %v7191_v1  ;;  %v3686_v22 = vpack.c.bf16 %v3674_v46, %v3673_v20  ;;  %v8855_v46 = vld [vmem:[%s9314_s4] sm:$0xff]  }
 0x4e6   :  { %6011 = vmatmul.mubr.msk.bf16.gmra.mrb[28].mxu1 %vm141_vm1, %v3379_v24 }
 0x4e7   :  { %3542 = vmatprep.mubr.bf16.mxu1 %v7191_v1 }
 0x4ee   :  { %6012 = vmatmul.mubr.msk.bf16.gmra.mrb[32].mxu1 %vm141_vm1, %v3380_v17 }
 0x4ef   :  { %3552 = vmatprep.mubr.bf16.mxu1 %v7191_v1 }
 0x4f6   :  { %6013 = vmatmul.mubr.msk.bf16.gmra.mrb[36].mxu1 %vm141_vm1, %v3381_v37 }
 0x4f7   :  { %3562 = vmatprep.mubr.bf16.mxu1 %v7191_v1 }
 0x4fe   :  { %6014 = vmatmul.mubr.msk.bf16.gmra.mrb[40].mxu1 %vm141_vm1, %v3382_v41 }
 0x4ff   :  { %3572 = vmatprep.mubr.bf16.mxu1 %v7191_v1 }
 0x506   :  { %6015 = vmatmul.mubr.msk.bf16.gmra.mrb[44].mxu1 %vm141_vm1, %v3383_v23 }
 0x507   :  { %3582 = vmatprep.mubr.bf16.mxu1 %v7191_v1 }
 0x50e   :  { %6016 = vmatmul.mubr.msk.bf16.gmra.mrb[48].mxu1 %vm141_vm1, %v3384_v55 }
 0x50f   :  { %3592 = vmatprep.mubr.bf16.mxu1 %v7191_v1 }
 0x516   :  { %6017 = vmatmul.mubr.msk.bf16.gmra.mrb[52].mxu1 %vm141_vm1, %v3385_v48 }
 0x517   :  { %3783 = vmatprep.mubr.bf16.mxu1 %v7191_v1 }
 0x51e   :  { %6027 = vmatmul.mubr.msk.bf16.vlgmr.msra.gmra.mrb[8].mxu1 %vm141_vm1, %v3675_v57 }
 0x51f   :  { %3793 = vmatprep.mubr.bf16.mxu1 %v7191_v1 }
 0x526   :  { %6028 = vmatmul.mubr.msk.bf16.gmra.mrb[12].mxu1 %vm141_vm1, %v3676_v38 }
 0x527   :  { %3803 = vmatprep.mubr.bf16.mxu1 %v7191_v1 }
 0x52e   :  { %6029 = vmatmul.mubr.msk.bf16.gmra.mrb[16].mxu1 %vm141_vm1, %v3677_v58 }
 0x52f   :  { %3813 = vmatprep.mubr.bf16.mxu1 %v7191_v1 }
 0x536   :  { %6030 = vmatmul.mubr.msk.bf16.gmra.mrb[20].mxu1 %vm141_vm1, %v3678_v8 }
 0x537   :  { %3823 = vmatprep.mubr.bf16.mxu1 %v7191_v1 }
 0x53e   :  { %6031 = vmatmul.mubr.msk.bf16.gmra.mrb[24].mxu1 %vm141_vm1, %v3679_v0  ;;  %v4377_v0 = vsel %vm1916_vm2, %v7133_v62, 0 }
 0x53f   :  { %3833 = vmatprep.mubr.bf16.mxu1 %v7191_v1  ;;  %6412 = vmatpush3.bf16.msra.mxu0 %v4377_v0 }
 0x540   :  { %6421 = vmatprep.subr.bf16.mxu0 %v8855_v46 }
 0x546   :  { %6032 = vmatmul.mubr.msk.bf16.gmra.mrb[28].mxu1 %vm141_vm1, %v3680_v40 }
 0x547   :  { %3843 = vmatprep.mubr.bf16.mxu1 %v7191_v1 }
 0x54e   :  { %6033 = vmatmul.mubr.msk.bf16.gmra.mrb[32].mxu1 %vm141_vm1, %v3681_v9 }
 0x54f   :  { %3853 = vmatprep.mubr.bf16.mxu1 %v7191_v1 }
 0x556   :  { %6034 = vmatmul.mubr.msk.bf16.gmra.mrb[36].mxu1 %vm141_vm1, %v3682_v11 }
 0x557   :  { %3863 = vmatprep.mubr.bf16.mxu1 %v7191_v1 }
 0x55e   :  { %6035 = vmatmul.mubr.msk.bf16.gmra.mrb[40].mxu1 %vm141_vm1, %v3683_v14 }
 0x55f   :  { %3873 = vmatprep.mubr.bf16.mxu1 %v7191_v1 }
 0x566   :  { %6036 = vmatmul.mubr.msk.bf16.gmra.mrb[44].mxu1 %vm141_vm1, %v3684_v29 }
 0x567   :  { %3883 = vmatprep.mubr.bf16.mxu1 %v7191_v1 }
 0x56e   :  { %6037 = vmatmul.mubr.msk.bf16.gmra.mrb[48].mxu1 %vm141_vm1, %v3685_v18 }
 0x56f   :  { %3893 = vmatprep.mubr.bf16.mxu1 %v7191_v1 }
 0x576   :  { %6038 = vmatmul.mubr.msk.bf16.gmra.mrb[52].mxu1 %vm141_vm1, %v3686_v22 }
 0x5f1   :  { %v8715_v24 = vpop.f32.mrb[8].mxu1 }
 0x5f2   :  { %4000 = vrot.lane.b32.xlu0 %v8715_v24, %s7192_s13  ;;  %v3787_v2 = vpop.f32.mrb[9].mxu1 }
 0x5f3   :  { %4002 = vrot.lane.b32.xlu1 %v3787_v2, %s7192_s13  ;;  %v8720_v1 = vpop.f32.mrb[10].mxu1 }
 0x5f4   :  { %v3791_v31 = vpop.f32.mrb[11].mxu1 }
 0x5f6   :  { %4004 = vrot.lane.b32.xlu0 %v8720_v1, %s7192_s13 }
 0x5f7   :  { %4006 = vrot.lane.b32.xlu1 %v3791_v31, %s7192_s13 }
 0x5f9   :  { %v8725_v17 = vpop.f32.mrb[12].mxu1 }
 0x5fa   :  { %4008 = vrot.lane.b32.xlu0 %v8725_v17, %s7192_s13  ;;  %v3797_v32 = vpop.f32.mrb[13].mxu1 }
 0x5fb   :  { %4010 = vrot.lane.b32.xlu1 %v3797_v32, %s7192_s13  ;;  %v8730_v34 = vpop.f32.mrb[14].mxu1 }
 0x5fc   :  { %v3801_v37 = vpop.f32.mrb[15].mxu1 }
 0x5fe   :  { %4012 = vrot.lane.b32.xlu0 %v8730_v34, %s7192_s13 }
 0x5ff   :  { %4014 = vrot.lane.b32.xlu1 %v3801_v37, %s7192_s13 }
 0x601   :  { %v8738_v53 = vpop.f32.mrb[16].mxu1 }
 0x602   :  { %4016 = vrot.lane.b32.xlu0 %v8738_v53, %s7192_s13  ;;  %v3807_v41 = vpop.f32.mrb[17].mxu1 }
 0x603   :  { %4018 = vrot.lane.b32.xlu1 %v3807_v41, %s7192_s13  ;;  %v8743_v42 = vpop.f32.mrb[18].mxu1 }
 0x604   :  { %v3811_v43 = vpop.f32.mrb[19].mxu1 }
 0x606   :  { %4020 = vrot.lane.b32.xlu0 %v8743_v42, %s7192_s13 }
 0x607   :  { %4022 = vrot.lane.b32.xlu1 %v3811_v43, %s7192_s13 }
 0x609   :  { %v8748_v23 = vpop.f32.mrb[20].mxu1 }
 0x60a   :  { %4024 = vrot.lane.b32.xlu0 %v8748_v23, %s7192_s13  ;;  %v3817_v35 = vpop.f32.mrb[21].mxu1 }
 0x60b   :  { %4026 = vrot.lane.b32.xlu1 %v3817_v35, %s7192_s13  ;;  %v8753_v45 = vpop.f32.mrb[22].mxu1 }
 0x60c   :  { %v3821_v55 = vpop.f32.mrb[23].mxu1 }
 0x60e   :  { %4028 = vrot.lane.b32.xlu0 %v8753_v45, %s7192_s13 }
 0x60f   :  { %4030 = vrot.lane.b32.xlu1 %v3821_v55, %s7192_s13 }
 0x611   :  { %v8758_v6 = vpop.f32.mrb[24].mxu1 }
 0x612   :  { %4032 = vrot.lane.b32.xlu0 %v8758_v6, %s7192_s13  ;;  %v3827_v47 = vpop.f32.mrb[25].mxu1 }
 0x613   :  { %4034 = vrot.lane.b32.xlu1 %v3827_v47, %s7192_s13  ;;  %v8763_v48 = vpop.f32.mrb[26].mxu1 }
 0x614   :  { %v3831_v51 = vpop.f32.mrb[27].mxu1 }
 0x616   :  { %4036 = vrot.lane.b32.xlu0 %v8763_v48, %s7192_s13 }
 0x617   :  { %4038 = vrot.lane.b32.xlu1 %v3831_v51, %s7192_s13 }
 0x619   :  { %v8771_v57 = vpop.f32.mrb[28].mxu1 }
 0x61a   :  { %4040 = vrot.lane.b32.xlu0 %v8771_v57, %s7192_s13  ;;  %v3837_v52 = vpop.f32.mrb[29].mxu1 }
 0x61b   :  { %4042 = vrot.lane.b32.xlu1 %v3837_v52, %s7192_s13  ;;  %v8776_v54 = vpop.f32.mrb[30].mxu1 }
 0x61c   :  { %v3841_v38 = vpop.f32.mrb[31].mxu1 }
 0x61e   :  { %4044 = vrot.lane.b32.xlu0 %v8776_v54, %s7192_s13 }
 0x61f   :  { %4046 = vrot.lane.b32.xlu1 %v3841_v38, %s7192_s13 }
 0x621   :  { %v8784_v25 = vpop.f32.mrb[32].mxu1 }
 0x622   :  { %4048 = vrot.lane.b32.xlu0 %v8784_v25, %s7192_s13  ;;  %v3847_v58 = vpop.f32.mrb[33].mxu1 }
 0x623   :  { %4050 = vrot.lane.b32.xlu1 %v3847_v58, %s7192_s13  ;;  %v8789_v60 = vpop.f32.mrb[34].mxu1 }
 0x624   :  { %v3851_v8 = vpop.f32.mrb[35].mxu1 }
 0x626   :  { %4052 = vrot.lane.b32.xlu0 %v8789_v60, %s7192_s13 }
 0x627   :  { %4054 = vrot.lane.b32.xlu1 %v3851_v8, %s7192_s13 }
 0x629   :  { %v8800_v59 = vpop.f32.mrb[36].mxu1 }
 0x62a   :  { %4056 = vrot.lane.b32.xlu0 %v8800_v59, %s7192_s13  ;;  %v3857_v3 = vpop.f32.mrb[37].mxu1 }
 0x62b   :  { %4058 = vrot.lane.b32.xlu1 %v3857_v3, %s7192_s13  ;;  %v8807_v5 = vpop.f32.mrb[38].mxu1 }
 0x62c   :  { %v3861_v40 = vpop.f32.mrb[39].mxu1 }
 0x62e   :  { %4060 = vrot.lane.b32.xlu0 %v8807_v5, %s7192_s13 }
 0x62f   :  { %4062 = vrot.lane.b32.xlu1 %v3861_v40, %s7192_s13 }
 0x631   :  { %v8812_v27 = vpop.f32.mrb[40].mxu1 }
 0x632   :  { %4064 = vrot.lane.b32.xlu0 %v8812_v27, %s7192_s13  ;;  %v3867_v7 = vpop.f32.mrb[41].mxu1 }
 0x633   :  { %4066 = vrot.lane.b32.xlu1 %v3867_v7, %s7192_s13  ;;  %v8817_v9 = vpop.f32.mrb[42].mxu1 }
 0x634   :  { %v3871_v61 = vpop.f32.mrb[43].mxu1 }
 0x636   :  { %4068 = vrot.lane.b32.xlu0 %v8817_v9, %s7192_s13 }
 0x637   :  { %4070 = vrot.lane.b32.xlu1 %v3871_v61, %s7192_s13 }
 0x639   :  { %v8822_v10 = vpop.f32.mrb[44].mxu1 }
 0x63a   :  { %4072 = vrot.lane.b32.xlu0 %v8822_v10, %s7192_s13  ;;  %v3877_v11 = vpop.f32.mrb[45].mxu1 }
 0x63b   :  { %4074 = vrot.lane.b32.xlu1 %v3877_v11, %s7192_s13  ;;  %v8827_v12 = vpop.f32.mrb[46].mxu1 }
 0x63c   :  { %v3881_v13 = vpop.f32.mrb[47].mxu1 }
 0x63e   :  { %4076 = vrot.lane.b32.xlu0 %v8827_v12, %s7192_s13 }
 0x63f   :  { %4078 = vrot.lane.b32.xlu1 %v3881_v13, %s7192_s13 }
 0x641   :  { %v8832_v14 = vpop.f32.mrb[48].mxu1 }
 0x642   :  { %4080 = vrot.lane.b32.xlu0 %v8832_v14, %s7192_s13  ;;  %v3887_v44 = vpop.f32.mrb[49].mxu1 }
 0x643   :  { %4082 = vrot.lane.b32.xlu1 %v3887_v44, %s7192_s13  ;;  %v8837_v15 = vpop.f32.mrb[50].mxu1 }
 0x644   :  { %v3891_v29 = vpop.f32.mrb[51].mxu1 }
 0x646   :  { %4084 = vrot.lane.b32.xlu0 %v8837_v15, %s7192_s13 }
 0x647   :  { %4086 = vrot.lane.b32.xlu1 %v3891_v29, %s7192_s13 }
 0x649   :  { %v8842_v63 = vpop.f32.mrb[52].mxu1 }
 0x64a   :  { %4088 = vrot.lane.b32.xlu0 %v8842_v63, %s7192_s13  ;;  %v3897_v16 = vpop.f32.mrb[53].mxu1 }
 0x64b   :  { %4090 = vrot.lane.b32.xlu1 %v3897_v16, %s7192_s13  ;;  %v8847_v18 = vpop.f32.mrb[54].mxu1 }
 0x64c   :  { %v3901_v20 = vpop.f32.mrb[55].mxu1 }
 0x64e   :  { %4092 = vrot.lane.b32.xlu0 %v8847_v18, %s7192_s13 }
 0x64f   :  { %4094 = vrot.lane.b32.xlu1 %v3901_v20, %s7192_s13 }
 0x652   :  { %2511 = vrot.lane.b32.xlu0 %v8417_v28, %s7193_s26 }
 0x653   :  { %2513 = vrot.lane.b32.xlu1 %v8421_v50, %s7193_s26 }
 0x656   :  { %2517 = vrot.lane.b32.xlu0 %v8419_v30, %s7193_s26 }
 0x657   :  { %2519 = vrot.lane.b32.xlu1 %v8433_v33, %s7193_s26 }
 0x65a   :  { %2515 = vrot.lane.b32.xlu0 %v8415_v26, %s7193_s26 }
 0x65e   :  { %2521 = vrot.lane.b32.xlu0 %v8437_v4, %s7193_s26 }
 0x664   :  { %v4001_v22 = vpop.permute.xlu0 %4000 }
 0x665   :  { %v4003_v2 = vpop.permute.xlu1 %4002 }
 0x666   :  { %v4096_v31 = vsel %vm1601_vm3, %v4001_v22, %v4003_v2 }
 0x667   :  { %v4144_v32 = vmax.f32 %v8715_v24, %v4096_v31 }
 0x668   :  { %v4005_v37 = vpop.permute.xlu0 %4004 }
 0x669   :  { %4168 = vst.msk [vmem:[#allocation2] sm:$0xff] %vm1674_vm4, %v4144_v32  ;;  %v4007_v39 = vpop.permute.xlu1 %4006 }
 0x66a   :  { %v4097_v41 = vsel %vm1601_vm3, %v4005_v37, %v4007_v39 }
 0x66b   :  { %v4145_v43 = vmax.f32 %v8720_v1, %v4097_v41 }
 0x66c   :  { %v4009_v35 = vpop.permute.xlu0 %4008 }
 0x66d   :  { %4169 = vst.msk [vmem:[#allocation2 + $0x8] sm:$0xff] %vm1674_vm4, %v4145_v43  ;;  %v4011_v55 = vpop.permute.xlu1 %4010 }
 0x66e   :  { %v4098_v47 = vsel %vm1601_vm3, %v4009_v35, %v4011_v55 }
 0x66f   :  { %v4146_v49 = vmax.f32 %v8725_v17, %v4098_v47  ;;  %v8886_v17 = vld [vmem:[%s9315_s3] ss:$0 sm:$0xff] }
 0x670   :  { %v4013_v51 = vpop.permute.xlu0 %4012 }
 0x671   :  { %4170 = vst.msk [vmem:[#allocation2 + $0x10] sm:$0xff] %vm1674_vm4, %v4146_v49  ;;  %v4015_v24 = vpop.permute.xlu1 %4014 }
 0x672   :  { %v4099_v52 = vsel %vm1601_vm3, %v4013_v51, %v4015_v24 }
 0x673   :  { %v4147_v38 = vmax.f32 %v8730_v34, %v4099_v52 }
 0x674   :  { %v4192_v56 = vld [vmem:[#allocation2] ss:$2 sm:$0xff]  ;;  %v4208_v58 = vld [vmem:[#allocation2 + $0x1] ss:$2 sm:$0xff]  ;;  %v4017_v19 = vpop.permute.xlu0 %4016 }
 0x675   :  { %v4224_v1 = vmax.f32 %v4192_v56, %v4208_v58  ;;  %4171 = vst.msk [vmem:[#allocation2 + $0x18] sm:$0xff] %vm1674_vm4, %v4147_v38  ;;  %v4019_v8 = vpop.permute.xlu1 %4018 }
 0x676   :  { %v4100_v62 = vsel %vm1601_vm3, %v4017_v19, %v4019_v8 }
 0x677   :  { %v4247_v0 = vadd.f32 %v8886_v17, %v4224_v1  ;;  %v4148_v3 = vmax.f32 %v8738_v53, %v4100_v62 }
 0x678   :  { %v4193_v40 = vld [vmem:[#allocation2 + $0x10] ss:$2 sm:$0xf]  ;;  %v4209_v34 = vld [vmem:[#allocation2 + $0x11] ss:$2 sm:$0xf]  ;;  %v4021_v7 = vpop.permute.xlu0 %4020 }
 0x679   :  { %v4263_v61 = vmax.f32 %v4247_v0, 0.0  ;;  %v4225_v11 = vmax.f32 %v4193_v40, %v4209_v34  ;;  %4172 = vst.msk [vmem:[#allocation2 + $0x20] sm:$0xff] %vm1674_vm4, %v4148_v3  ;;  %v4023_v13 = vpop.permute.xlu1 %4022 }
 0x67a   :  { %v4101_v44 = vsel %vm1601_vm3, %v4021_v7, %v4023_v13 }
 0x67b   :  { %4279 = vst.msk [vmem:[#allocation3] sm:$0xff] %vm1674_vm4, %v4263_v61  ;;  %v4248_v29 = vadd.f32 %v8886_v17, %v4225_v11  ;;  %v4149_v16 = vmax.f32 %v8743_v42, %v4101_v44 }
 0x67c   :  { %v4025_v20 = vpop.permute.xlu0 %4024 }
 0x67d   :  { %v4264_v22 = vmax.f32 %v4248_v29, 0.0  ;;  %4173 = vst.msk [vmem:[#allocation2 + $0x28] sm:$0xff] %vm1674_vm4, %v4149_v16  ;;  %v4027_v53 = vpop.permute.xlu1 %4026 }
 0x67e   :  { %v4102_v2 = vsel %vm1601_vm3, %v4025_v20, %v4027_v53 }
 0x67f   :  { %4280 = vst.msk [vmem:[#allocation3 + $0x8] sm:$0xf] %vm1818_vm5, %v4264_v22  ;;  %v4150_v31 = vmax.f32 %v8748_v23, %v4102_v2 }
 0x680   :  { %v4194_v32 = vld [vmem:[#allocation2 + $0x18] ss:$2 sm:$0xff]  ;;  %v4210_v37 = vld [vmem:[#allocation2 + $0x19] ss:$2 sm:$0xff]  ;;  %v4029_v39 = vpop.permute.xlu0 %4028 }
 0x681   :  { %v4226_v41 = vmax.f32 %v4194_v32, %v4210_v37  ;;  %4174 = vst.msk [vmem:[#allocation2 + $0x30] sm:$0xff] %vm1674_vm4, %v4150_v31  ;;  %v4031_v43 = vpop.permute.xlu1 %4030 }
 0x682   :  { %v4103_v42 = vsel %vm1601_vm3, %v4029_v39, %v4031_v43 }
 0x683   :  { %v4249_v35 = vadd.f32 %v8886_v17, %v4226_v41  ;;  %v4151_v55 = vmax.f32 %v8753_v45, %v4103_v42 }
 0x684   :  { %v4195_v47 = vld [vmem:[#allocation2 + $0x28] ss:$2 sm:$0xf]  ;;  %v4211_v49 = vld [vmem:[#allocation2 + $0x29] ss:$2 sm:$0xf]  ;;  %v4033_v51 = vpop.permute.xlu0 %4032 }
 0x685   :  { %v4265_v24 = vmax.f32 %v4249_v35, 0.0  ;;  %v4227_v52 = vmax.f32 %v4195_v47, %v4211_v49  ;;  %4175 = vst.msk [vmem:[#allocation2 + $0x38] sm:$0xff] %vm1674_vm4, %v4151_v55  ;;  %v4035_v23 = vpop.permute.xlu1 %4034 }
 0x686   :  { %v4104_v38 = vsel %vm1601_vm3, %v4033_v51, %v4035_v23  ;;  %v4316_v53 = vld [vmem:[#allocation3 + $0x1] sm:$0xff] }
 0x687   :  { %4281 = vst.msk [vmem:[#allocation3 + $0x10] sm:$0xff] %vm1674_vm4, %v4265_v24  ;;  %v4250_v56 = vadd.f32 %v8886_v17, %v4227_v52  ;;  %v4152_v58 = vmax.f32 %v8758_v6, %v4104_v38 }
 0x688   :  { %v4037_v19 = vpop.permute.xlu0 %4036 }
 0x689   :  { %v4266_v1 = vmax.f32 %v4250_v56, 0.0  ;;  %4176 = vst.msk [vmem:[#allocation2 + $0x40] sm:$0xff] %vm1674_vm4, %v4152_v58  ;;  %v4039_v45 = vpop.permute.xlu1 %4038 }
 0x68a   :  { %v4105_v8 = vsel %vm1601_vm3, %v4037_v19, %v4039_v45 }
 0x68b   :  { %4282 = vst.msk [vmem:[#allocation3 + $0x18] sm:$0xf] %vm1818_vm5, %v4266_v1  ;;  %v4153_v62 = vmax.f32 %v8763_v48, %v4105_v8 }
 0x68c   :  { %v4196_v0 = vld [vmem:[#allocation2 + $0x30] ss:$2 sm:$0xff]  ;;  %v4212_v3 = vld [vmem:[#allocation2 + $0x31] ss:$2 sm:$0xff]  ;;  %v4041_v40 = vpop.permute.xlu0 %4040 }
 0x68d   :  { %v4228_v34 = vmax.f32 %v4196_v0, %v4212_v3  ;;  %4177 = vst.msk [vmem:[#allocation2 + $0x48] sm:$0xff] %vm1674_vm4, %v4153_v62  ;;  %v4043_v7 = vpop.permute.xlu1 %4042 }
 0x68e   :  { %v4106_v6 = vsel %vm1601_vm3, %v4041_v40, %v4043_v7 }
 0x68f   :  { %v4251_v61 = vadd.f32 %v8886_v17, %v4228_v34  ;;  %v4154_v11 = vmax.f32 %v8771_v57, %v4106_v6 }
 0x690   :  { %v4197_v13 = vld [vmem:[#allocation2 + $0x40] ss:$2 sm:$0xf]  ;;  %v4213_v44 = vld [vmem:[#allocation2 + $0x41] ss:$2 sm:$0xf]  ;;  %v4045_v29 = vpop.permute.xlu0 %4044 }
 0x691   :  { %v4267_v16 = vmax.f32 %v4251_v61, 0.0  ;;  %v4229_v20 = vmax.f32 %v4197_v13, %v4213_v44  ;;  %4178 = vst.msk [vmem:[#allocation2 + $0x50] sm:$0xff] %vm1674_vm4, %v4154_v11  ;;  %v4047_v48 = vpop.permute.xlu1 %4046 }
 0x692   :  { %v4107_v22 = vsel %vm1601_vm3, %v4045_v29, %v4047_v48  ;;  %v4317_v2 = vld [vmem:[#allocation3 + $0x11] sm:$0xff] }
 0x693   :  { %4283 = vst.msk [vmem:[#allocation3 + $0x20] sm:$0xff] %vm1674_vm4, %v4267_v16  ;;  %v4252_v31 = vadd.f32 %v8886_v17, %v4229_v20  ;;  %v4155_v32 = vmax.f32 %v8776_v54, %v4107_v22  ;;  %v4324_v37 = vpack.c.bf16 %v4317_v2, %v4316_v53 }
 0x694   :  { %v4049_v57 = vpop.permute.xlu0 %4048 }
 0x695   :  { %v4268_v39 = vmax.f32 %v4252_v31, 0.0  ;;  %4179 = vst.msk [vmem:[#allocation2 + $0x58] sm:$0xff] %vm1674_vm4, %v4155_v32  ;;  %6413 = vmatprep.mubr.msk.bf16.mxu0 %vm1674_vm4, %v4324_v37  ;;  %v4051_v41 = vpop.permute.xlu1 %4050 }
 0x696   :  { %v4108_v43 = vsel %vm1601_vm3, %v4049_v57, %v4051_v41 }
 0x697   :  { %4284 = vst.msk [vmem:[#allocation3 + $0x28] sm:$0xf] %vm1818_vm5, %v4268_v39  ;;  %v4156_v42 = vmax.f32 %v8784_v25, %v4108_v43 }
 0x698   :  { %v4198_v35 = vld [vmem:[#allocation2 + $0x48] ss:$2 sm:$0xff]  ;;  %v4214_v55 = vld [vmem:[#allocation2 + $0x49] ss:$2 sm:$0xff]  ;;  %v4053_v47 = vpop.permute.xlu0 %4052 }
 0x699   :  { %v4230_v49 = vmax.f32 %v4198_v35, %v4214_v55  ;;  %4180 = vst.msk [vmem:[#allocation2 + $0x60] sm:$0xff] %vm1674_vm4, %v4156_v42  ;;  %v4055_v54 = vpop.permute.xlu1 %4054  ;;  %v7136_v35 = vld [vmem:[%s9314_s4 + $0x10] sm:$0xff]  }
 0x69a   :  { %v4109_v51 = vsel %vm1601_vm3, %v4053_v47, %v4055_v54 }
 0x69b   :  { %v4253_v24 = vadd.f32 %v8886_v17, %v4230_v49  ;;  %v4157_v52 = vmax.f32 %v8789_v60, %v4109_v51 }
 0x69c   :  { %v4199_v23 = vld [vmem:[#allocation2 + $0x58] ss:$2 sm:$0xf]  ;;  %v4215_v38 = vld [vmem:[#allocation2 + $0x59] ss:$2 sm:$0xf]  ;;  %v4057_v56 = vpop.permute.xlu0 %4056 }
 0x69d   :  { %v4269_v58 = vmax.f32 %v4253_v24, 0.0  ;;  %v4231_v19 = vmax.f32 %v4199_v23, %v4215_v38  ;;  %4181 = vst.msk [vmem:[#allocation2 + $0x68] sm:$0xff] %vm1674_vm4, %v4157_v52  ;;  %v4059_v25 = vpop.permute.xlu1 %4058 }
 0x69e   :  { %v4110_v1 = vsel %vm1601_vm3, %v4057_v56, %v4059_v25  ;;  %v4318_v2 = vld [vmem:[#allocation3 + $0x21] sm:$0xff] }
 0x69f   :  { %4285 = vst.msk [vmem:[#allocation3 + $0x30] sm:$0xff] %vm1674_vm4, %v4269_v58  ;;  %v4254_v45 = vadd.f32 %v8886_v17, %v4231_v19  ;;  %v4158_v8 = vmax.f32 %v8800_v59, %v4110_v1 }
 0x6a0   :  { %v4061_v62 = vpop.permute.xlu0 %4060 }
 0x6a1   :  { %v4270_v0 = vmax.f32 %v4254_v45, 0.0  ;;  %4182 = vst.msk [vmem:[#allocation2 + $0x70] sm:$0xff] %vm1674_vm4, %v4158_v8  ;;  %v4063_v60 = vpop.permute.xlu1 %4062  ;;  %v7138_v8 = vld [vmem:[%s9314_s4 + $0x20] ss:$0 sps:$4 sm:$0xff]  }
 0x6a2   :  { %v4111_v3 = vsel %vm1601_vm3, %v4061_v62, %v4063_v60 }
 0x6a3   :  { %4286 = vst.msk [vmem:[#allocation3 + $0x38] sm:$0xf] %vm1818_vm5, %v4270_v0  ;;  %v4159_v40 = vmax.f32 %v8807_v5, %v4111_v3 }
 0x6a4   :  { %v4200_v34 = vld [vmem:[#allocation2 + $0x60] ss:$2 sm:$0xff]  ;;  %v4216_v7 = vld [vmem:[#allocation2 + $0x61] ss:$2 sm:$0xff]  ;;  %v4065_v6 = vpop.permute.xlu0 %4064 }
 0x6a5   :  { %v4232_v61 = vmax.f32 %v4200_v34, %v4216_v7  ;;  %4183 = vst.msk [vmem:[#allocation2 + $0x78] sm:$0xff] %vm1674_vm4, %v4159_v40  ;;  %v4067_v11 = vpop.permute.xlu1 %4066  ;;  %v7139_v34 = vld [vmem:[%s9314_s4 + $0x48] sm:$0xff]  }
 0x6a6   :  { %v4112_v59 = vsel %vm1601_vm3, %v4065_v6, %v4067_v11 }
 0x6a7   :  { %v4255_v13 = vadd.f32 %v8886_v17, %v4232_v61  ;;  %v4160_v44 = vmax.f32 %v8812_v27, %v4112_v59  ;;  %v7135_v27 = vld [vmem:[%s9314_s4 + $0x8] sm:$0xff]  }
 0x6a8   :  { %v4201_v29 = vld [vmem:[#allocation2 + $0x70] ss:$2 sm:$0xf]  ;;  %v4217_v16 = vld [vmem:[#allocation2 + $0x71] ss:$2 sm:$0xf]  ;;  %v4069_v20 = vpop.permute.xlu0 %4068 }
 0x6a9   :  { %v4271_v48 = vmax.f32 %v4255_v13, 0.0  ;;  %v4233_v22 = vmax.f32 %v4201_v29, %v4217_v16  ;;  %4184 = vst.msk [vmem:[#allocation2 + $0x80] sm:$0xff] %vm1674_vm4, %v4160_v44  ;;  %v4071_v5 = vpop.permute.xlu1 %4070 }
 0x6aa   :  { %v4113_v53 = vsel %vm1601_vm3, %v4069_v20, %v4071_v5  ;;  %v4319_v31 = vld [vmem:[#allocation3 + $0x31] sm:$0xff] }
 0x6ab   :  { %4287 = vst.msk [vmem:[#allocation3 + $0x40] sm:$0xff] %vm1674_vm4, %v4271_v48  ;;  %v4256_v32 = vadd.f32 %v8886_v17, %v4233_v22  ;;  %v4161_v37 = vmax.f32 %v8817_v9, %v4113_v53  ;;  %v4325_v57 = vpack.c.bf16 %v4319_v31, %v4318_v2 }
 0x6ac   :  { %v4073_v39 = vpop.permute.xlu0 %4072 }
 0x6ad   :  { %v4272_v41 = vmax.f32 %v4256_v32, 0.0  ;;  %4185 = vst.msk [vmem:[#allocation2 + $0x88] sm:$0xff] %vm1674_vm4, %v4161_v37  ;;  %6414 = vmatmul.mubr.msk.bf16.vlgmr.msra.gmra.mrb[48].mxu0 %vm1674_vm4, %v4325_v57  ;;  %v4075_v43 = vpop.permute.xlu1 %4074 }
 0x6ae   :  { %v4114_v42 = vsel %vm1601_vm3, %v4073_v39, %v4075_v43  ;;  %6422 = vmatpush3.bf16.msra.mxu0 %v8855_v46 }
 0x6af   :  { %4288 = vst.msk [vmem:[#allocation3 + $0x48] sm:$0xf] %vm1818_vm5, %v4272_v41  ;;  %v4162_v9 = vmax.f32 %v8822_v10, %v4114_v42  ;;  %6423 = vmatprep.subr.bf16.mxu0 %v7135_v27  ;;  %v7137_v10 = vld [vmem:[%s9314_s4 + $0x18] sm:$0xff]  }
 0x6b0   :  { %v4202_v55 = vld [vmem:[#allocation2 + $0x78] ss:$2 sm:$0xff]  ;;  %v4218_v47 = vld [vmem:[#allocation2 + $0x79] ss:$2 sm:$0xff]  ;;  %v4077_v49 = vpop.permute.xlu0 %4076 }
 0x6b1   :  { %v4234_v54 = vmax.f32 %v4202_v55, %v4218_v47  ;;  %4186 = vst.msk [vmem:[#allocation2 + $0x90] sm:$0xff] %vm1674_vm4, %v4162_v9  ;;  %v4079_v51 = vpop.permute.xlu1 %4078 }
 0x6b2   :  { %v4115_v24 = vsel %vm1601_vm3, %v4077_v49, %v4079_v51  ;;  %6424 = vmatpush3.bf16.msra.mxu0 %v7135_v27  ;;  %v4296_v49 = vld [vmem:[#allocation3 + $0x10] sm:$0xff] }
 0x6b3   :  { %v4257_v46 = vadd.f32 %v8886_v17, %v4234_v54  ;;  %v4163_v52 = vmax.f32 %v8827_v12, %v4115_v24  ;;  %6425 = vmatprep.subr.bf16.mxu0 %v7136_v35 }
 0x6b4   :  { %v4203_v23 = vld [vmem:[#allocation2 + $0x88] ss:$2 sm:$0xf]  ;;  %v4219_v38 = vld [vmem:[#allocation2 + $0x89] ss:$2 sm:$0xf]  ;;  %v4081_v56 = vpop.permute.xlu0 %4080 }
 0x6b5   :  { %v4273_v58 = vmax.f32 %v4257_v46, 0.0  ;;  %v4235_v19 = vmax.f32 %v4203_v23, %v4219_v38  ;;  %4187 = vst.msk [vmem:[#allocation2 + $0x98] sm:$0xff] %vm1674_vm4, %v4163_v52  ;;  %v4083_v25 = vpop.permute.xlu1 %4082  ;;  %v4295_v46 = vld [vmem:[#allocation3] sm:$0xff] }
 0x6b6   :  { %v4116_v1 = vsel %vm1601_vm3, %v4081_v56, %v4083_v25  ;;  %6426 = vmatpush3.bf16.msra.mxu0 %v7136_v35  ;;  %v4320_v2 = vld [vmem:[#allocation3 + $0x41] sm:$0xff]  ;;  %v4303_v52 = vpack.c.bf16 %v4296_v49, %v4295_v46  ;;  %v7141_v25 = vld [vmem:[%s9314_s4 + $0x58] sm:$0xff]  }
 0x6b7   :  { %4289 = vst.msk [vmem:[#allocation3 + $0x50] sm:$0xff] %vm1674_vm4, %v4273_v58  ;;  %v4258_v12 = vadd.f32 %v8886_v17, %v4235_v19  ;;  %v4164_v45 = vmax.f32 %v8832_v14, %v4116_v1  ;;  %6427 = vmatprep.subr.bf16.mxu0 %v7137_v10  ;;  %v4484_v14 = vsel %vm1916_vm2, %v7138_v8, 0  ;;  %v4297_v38 = vld [vmem:[#allocation3 + $0x20] sm:$0xff] }
 0x6b8   :  { %v4085_v62 = vpop.permute.xlu0 %4084  ;;  %v4299_v58 = vld [vmem:[#allocation3 + $0x40] sm:$0xff] }
 0x6b9   :  { %v4274_v0 = vmax.f32 %v4258_v12, 0.0  ;;  %4188 = vst.msk [vmem:[#allocation2 + $0xa0] sm:$0xff] %vm1674_vm4, %v4164_v45  ;;  %v4087_v60 = vpop.permute.xlu1 %4086  ;;  %v4552_v12 = vld [vmem:[#allocation3 + $0x12] sm:$0xff] }
 0x6ba   :  { %v4117_v3 = vsel %vm1601_vm3, %v4085_v62, %v4087_v60  ;;  %6428 = vmatpush3.bf16.msra.mxu0 %v7137_v10  ;;  %v4298_v10 = vld [vmem:[#allocation3 + $0x30] sm:$0xff]  ;;  %v4551_v62 = vld [vmem:[#allocation3 + $0x2] sm:$0xff] }
 0x6bb   :  { %4290 = vst.msk [vmem:[#allocation3 + $0x58] sm:$0xf] %vm1818_vm5, %v4274_v0  ;;  %v4165_v40 = vmax.f32 %v8837_v15, %v4117_v3  ;;  %7035 = vmatprep.subr.msk.bf16.mxu0 %vm1916_vm2, %v7138_v8  ;;  %v4304_v56 = vpack.c.bf16 %v4298_v10, %v4297_v38  ;;  %v7142_v0 = vld [vmem:[%s9314_s4 + $0x60] sm:$0xff]   ;;  %v4559_v60 = vpack.c.bf16 %v4552_v12, %v4551_v62  ;;  %v7143_v3 = vld [vmem:[%s9314_s4 + $0x68] ss:$0 sps:$4 sm:$0xff]   ;;  %v7156_v12 = vld [vmem:[%s9317_s6 + $0x10] sm:$0xff]  }
 0x6bc   :  { %v4204_v7 = vld [vmem:[#allocation2 + $0x90] ss:$2 sm:$0xff]  ;;  %v4220_v6 = vld [vmem:[#allocation2 + $0x91] ss:$2 sm:$0xff]  ;;  %v4089_v61 = vpop.permute.xlu0 %4088 }
 0x6bd   :  { %v4236_v11 = vmax.f32 %v4204_v7, %v4220_v6  ;;  %4189 = vst.msk [vmem:[#allocation2 + $0xa8] sm:$0xff] %vm1674_vm4, %v4165_v40  ;;  %v4091_v59 = vpop.permute.xlu1 %4090  ;;  %v4612_v40 = vsel %vm1916_vm2, %v7143_v3, 0  ;;  %v4553_v6 = vld [vmem:[#allocation3 + $0x22] sm:$0xff] }
 0x6be   :  { %v4118_v13 = vsel %vm1601_vm3, %v4089_v61, %v4091_v59  ;;  %6430 = vmatpush3.bf16.msra.mxu0 %v4484_v14  ;;  %v4300_v23 = vld [vmem:[#allocation3 + $0x50] sm:$0xff] }
 0x6bf   :  { %v4259_v15 = vadd.f32 %v8886_v17, %v4236_v11  ;;  %v4166_v44 = vmax.f32 %v8842_v63, %v4118_v13  ;;  %6439 = vmatprep.subr.bf16.mxu0 %v7139_v34  ;;  %v4305_v19 = vpack.c.bf16 %v4300_v23, %v4299_v58  ;;  %v7144_v14 = vld [vmem:[%s9314_s4 + $0x6c] sm:$0xff]   ;;  %v4555_v11 = vld [vmem:[#allocation3 + $0x42] sm:$0xff]  ;;  %v7145_v59 = vld [vmem:[%s9314_s4 + $0x74] sm:$0xff]  }
 0x6c0   :  { %v4205_v29 = vld [vmem:[#allocation2 + $0xa0] ss:$2 sm:$0xf]  ;;  %v4221_v16 = vld [vmem:[#allocation2 + $0xa1] ss:$2 sm:$0xf]  ;;  %v4093_v20 = vpop.permute.xlu0 %4092 }
 0x6c1   :  { %v4275_v48 = vmax.f32 %v4259_v15, 0.0  ;;  %v4237_v22 = vmax.f32 %v4205_v29, %v4221_v16  ;;  %4190 = vst.msk [vmem:[#allocation2 + $0xb0] sm:$0xff] %vm1674_vm4, %v4166_v44  ;;  %v4095_v5 = vpop.permute.xlu1 %4094  ;;  %v7146_v15 = vld [vmem:[%s9314_s4 + $0x7c] sm:$0xff]   ;;  %v4688_v29 = vld [vmem:[#allocation3 + $0x13] sm:$0xff]  ;;  %v4827_v23 = vld [vmem:[#allocation3 + $0x44] sm:$0xff] }
 0x6c2   :  { %v4119_v53 = vsel %vm1601_vm3, %v4093_v20, %v4095_v5  ;;  %v4321_v31 = vld [vmem:[#allocation3 + $0x51] sm:$0xff] }
 0x6c3   :  { %4291 = vst.msk [vmem:[#allocation3 + $0x60] sm:$0xff] %vm1674_vm4, %v4275_v48  ;;  %v4260_v32 = vadd.f32 %v8886_v17, %v4237_v22  ;;  %v4167_v37 = vmax.f32 %v8847_v18, %v4119_v53  ;;  %v4326_v63 = vpack.c.bf16 %v4321_v31, %v4320_v2  ;;  %v4556_v7 = vld [vmem:[#allocation3 + $0x52] sm:$0xff]  ;;  %v4687_v48 = vld [vmem:[#allocation3 + $0x3] sm:$0xff]  ;;  %v7148_v53 = vld [vmem:[%s9314_s4 + $0x8c] ss:$0 sps:$4 sm:$0xff]  }
 0x6c4   :  { %v4561_v13 = vpack.c.bf16 %v4556_v7, %v4555_v11  ;;  %v7147_v22 = vld [vmem:[%s9314_s4 + $0x84] sm:$0xff]   ;;  %v4695_v5 = vpack.c.bf16 %v4688_v29, %v4687_v48  ;;  %v4748_v2 = vsel %vm1916_vm2, %v7148_v53, 0  ;;  %v7149_v31 = vld [vmem:[%s9314_s4 + $0x90] sm:$0xff]   ;;  %v7161_v11 = vld [vmem:[%s9317_s6 + $0x38] sm:$0xff]  }
 0x6c5   :  { %v4276_v57 = vmax.f32 %v4260_v32, 0.0  ;;  %4191 = vst.msk [vmem:[#allocation2 + $0xb8] sm:$0xff] %vm1674_vm4, %v4167_v37  ;;  %6417 = vmatprep.mubr.msk.bf16.mxu0 %vm1674_vm4, %v4326_v63  ;;  %v4690_v32 = vld [vmem:[#allocation3 + $0x33] sm:$0xff]  ;;  %v4689_v63 = vld [vmem:[#allocation3 + $0x23] sm:$0xff] }
 0x6c6   :  { %v4692_v37 = vld [vmem:[#allocation3 + $0x53] sm:$0xff]  ;;  %v7159_v7 = vld [vmem:[%s9317_s6 + $0x28] sm:$0xff]  }
 0x6c7   :  { %4292 = vst.msk [vmem:[#allocation3 + $0x68] sm:$0xf] %vm1818_vm5, %v4276_v57  ;;  %v4696_v57 = vpack.c.bf16 %v4690_v32, %v4689_v63  ;;  %v4828_v46 = vld [vmem:[#allocation3 + $0x54] sm:$0xff] }
 0x6c8   :  { %v4206_v27 = vld [vmem:[#allocation2 + $0xa8] ss:$2 sm:$0xff]  ;;  %v4222_v39 = vld [vmem:[#allocation2 + $0xa9] ss:$2 sm:$0xff]  ;;  %v4833_v38 = vpack.c.bf16 %v4828_v46, %v4827_v23 }
 0x6c9   :  { %v4238_v41 = vmax.f32 %v4206_v27, %v4222_v39  ;;  %v4691_v27 = vld [vmem:[#allocation3 + $0x43] sm:$0xff]  ;;  %v7150_v39 = vld [vmem:[%s9314_s4 + $0x98] sm:$0xff]  }
 0x6ca   :  { %v4301_v45 = vld [vmem:[#allocation3 + $0x60] sm:$0xff] }
 0x6cb   :  { %v4261_v43 = vadd.f32 %v8886_v17, %v4238_v41  ;;  %v4697_v41 = vpack.c.bf16 %v4692_v37, %v4691_v27 }
 0x6cc   :  { %v4207_v42 = vld [vmem:[#allocation2 + $0xb8] ss:$2 sm:$0xf]  ;;  %v4223_v9 = vld [vmem:[#allocation2 + $0xb9] ss:$2 sm:$0xf] }
 0x6cd   :  { %v4277_v35 = vmax.f32 %v4261_v43, 0.0  ;;  %v4239_v55 = vmax.f32 %v4207_v42, %v4223_v9  ;;  %v7151_v43 = vld [vmem:[%s9314_s4 + $0xa0] sm:$0xff]   ;;  %v4824_v9 = vld [vmem:[#allocation3 + $0x14] sm:$0xff] }
 0x6ce   :  { %v4322_v54 = vld [vmem:[#allocation3 + $0x61] sm:$0xff] }
 0x6cf   :  { %4293 = vst.msk [vmem:[#allocation3 + $0x70] sm:$0xff] %vm1674_vm4, %v4277_v35  ;;  %v4262_v18 = vadd.f32 %v8886_v17, %v4239_v55  ;;  %v7140_v17 = vld [vmem:[%s9314_s4 + $0x50] sm:$0xff]   ;;  %v4557_v16 = vld [vmem:[#allocation3 + $0x62] sm:$0xff] }
 0x6d0   :  { %v4693_v35 = vld [vmem:[#allocation3 + $0x63] sm:$0xff] }
 0x6d1   :  { %v4278_v47 = vmax.f32 %v4262_v18, 0.0  ;;  %v4823_v18 = vld [vmem:[#allocation3 + $0x4] sm:$0xff] }
 0x6d2   :  { %v4831_v49 = vpack.c.bf16 %v4824_v9, %v4823_v18  ;;  %v4829_v58 = vld [vmem:[#allocation3 + $0x64] sm:$0xff] }
 0x6d3   :  { %4294 = vst.msk [vmem:[#allocation3 + $0x78] sm:$0xf] %vm1818_vm5, %v4278_v47  ;;  %v7152_v47 = vld [vmem:[%s9314_s4 + $0xa8] sm:$0xff]  }
 0x6d6   :  { %v4302_v1 = vld [vmem:[#allocation3 + $0x70] sm:$0xff] }
 0x6d7   :  { %v4306_v8 = vpack.c.bf16 %v4302_v1, %v4301_v45  ;;  %v7155_v1 = vld [vmem:[%s9317_s6 + $0x8] sm:$0xff]  }
 0x6da   :  { %v4323_v51 = vld [vmem:[#allocation3 + $0x71] sm:$0xff] }
 0x6db   :  { %v4327_v24 = vpack.c.bf16 %v4323_v51, %v4322_v54  ;;  %v4558_v44 = vld [vmem:[#allocation3 + $0x72] sm:$0xff]  ;;  %v7153_v54 = vld [vmem:[%s9314_s4 + $0xb0] ss:$0 sps:$4 sm:$0xff]  }
 0x6dc   :  { %v4562_v20 = vpack.c.bf16 %v4558_v44, %v4557_v16  ;;  %v4694_v42 = vld [vmem:[#allocation3 + $0x73] sm:$0xff]  ;;  %v4884_v51 = vsel %vm1916_vm2, %v7153_v54, 0  ;;  %v2514_v44 = vpop.permute.xlu1 %2513 }
 0x6dd   :  { %6418 = vmatmul.mubr.msk.bf16.gmra.mrb[52].mxu0 %vm1674_vm4, %v4327_v24  ;;  %v4698_v55 = vpack.c.bf16 %v4694_v42, %v4693_v35  ;;  %v4826_v24 = vld [vmem:[#allocation3 + $0x34] sm:$0xff] }
 0x6de   :  { %6431 = vmatprep.mubr.msk.bf16.mxu0 %vm1674_vm4, %v4303_v52  ;;  %v4825_v52 = vld [vmem:[#allocation3 + $0x24] sm:$0xff] }
 0x6df   :  { %v4832_v10 = vpack.c.bf16 %v4826_v24, %v4825_v52 }
 0x6e5   :  { %6432 = vmatmul.mubr.msk.bf16.vlgmr.msra.gmra.mrb[48].mxu0 %vm1674_vm4, %v4304_v56  ;;  %v4830_v56 = vld [vmem:[#allocation3 + $0x74] sm:$0xff] }
 0x6e6   :  { %6440 = vmatpush3.bf16.msra.mxu0 %v7139_v34  ;;  %6435 = vmatprep.mubr.msk.bf16.mxu0 %vm1674_vm4, %v4305_v19  ;;  %v4554_v34 = vld [vmem:[#allocation3 + $0x32] sm:$0xff]  ;;  %v7194_v19 = vmov 0.0  }
 0x6e7   :  { %6441 = vmatprep.subr.bf16.mxu0 %v7140_v17  ;;  %v4560_v61 = vpack.c.bf16 %v4554_v34, %v4553_v6  ;;  %6505 = vmatprep.subr.bf16.mxu1 %v7194_v19  ;;  %v7158_v34 = vld [vmem:[%s9317_s6 + $0x20] sm:$0xff]   ;;  %v7160_v6 = vld [vmem:[%s9317_s6 + $0x30] sm:$0xff]  }
 0x6e8   :  { %6513 = vmatprep.mubr.msk.bf16.mxu1 %vm7195_vm6, %v7194_v19 }
 0x6ea   :  { %6442 = vmatpush3.bf16.msra.mxu0 %v7140_v17  ;;  %v4834_v17 = vpack.c.bf16 %v4830_v56, %v4829_v58 }
 0x6eb   :  { %6443 = vmatprep.subr.bf16.mxu0 %v7141_v25 }
 0x6ed   :  { %6436 = vmatmul.mubr.msk.bf16.gmra.mrb[52].mxu0 %vm1674_vm4, %v4306_v8 }
 0x6ee   :  { %6444 = vmatpush3.bf16.msra.mxu0 %v7141_v25  ;;  %6449 = vmatprep.mubr.msk.bf16.mxu0 %vm1674_vm4, %v4559_v60  ;;  %v7154_v25 = vld [vmem:[%s9317_s6] sm:$0xff]  }
 0x6ef   :  { %6445 = vmatprep.subr.bf16.mxu0 %v7142_v0  ;;  %6506 = vmatpush3.bf16.msra.mxu1 %v7154_v25 }
 0x6f0   :  { %6507 = vmatprep.subr.bf16.mxu1 %v7194_v19 }
 0x6f2   :  { %6446 = vmatpush3.bf16.msra.mxu0 %v7142_v0 }
 0x6f3   :  { %7036 = vmatprep.subr.msk.bf16.mxu0 %vm1916_vm2, %v7143_v3  ;;  %6508 = vmatpush3.bf16.msra.mxu1 %v7155_v1 }
 0x6f4   :  { %6509 = vmatprep.subr.bf16.mxu1 %v7194_v19 }
 0x6f6   :  { %6448 = vmatpush3.bf16.msra.mxu0 %v4612_v40 }
 0x6f7   :  { %6457 = vmatprep.subr.bf16.mxu0 %v7144_v14  ;;  %6510 = vmatpush3.bf16.msra.mxu1 %v7156_v12 }
 0x6f8   :  { %6511 = vmatprep.subr.bf16.mxu1 %v7194_v19 }
 0x6f9   :  { %6450 = vmatmul.mubr.msk.bf16.vlgmr.msra.gmra.mrb[48].mxu0 %vm1674_vm4, %v4560_v61  ;;  %v7157_v61 = vld [vmem:[%s9317_s6 + $0x18] sm:$0xff]  }
 0x6fa   :  { %6453 = vmatprep.mubr.msk.bf16.mxu0 %vm1674_vm4, %v4561_v13  ;;  %6458 = vmatpush3.bf16.msra.mxu0 %v7144_v14 }
 0x6fb   :  { %6459 = vmatprep.subr.bf16.mxu0 %v7145_v59  ;;  %6512 = vmatpush3.bf16.msra.mxu1 %v7157_v61 }
 0x6fc   :  { %6529 = vmatprep.subr.bf16.mxu1 %v7194_v19 }
 0x6fe   :  { %6460 = vmatpush3.bf16.msra.mxu0 %v7145_v59  ;;  %v2512_v59 = vpop.permute.xlu0 %2511 }
 0x6ff   :  { %6461 = vmatprep.subr.bf16.mxu0 %v7146_v15  ;;  %v2535_v16 = vmax.f32 %v8417_v28, %v2512_v59  ;;  %v9141_v28 = vld [vmem:[%s9319_s5] ss:$0 sm:$0xff] }
 0x701   :  { %6454 = vmatmul.mubr.msk.bf16.gmra.mrb[52].mxu0 %vm1674_vm4, %v4562_v20 }
 0x702   :  { %6462 = vmatpush3.bf16.msra.mxu0 %v7146_v15  ;;  %6467 = vmatprep.mubr.msk.bf16.mxu0 %vm1674_vm4, %v4695_v5  ;;  %v2518_v13 = vpop.permute.xlu0 %2517  ;;  %v2520_v5 = vpop.permute.xlu1 %2519 }
 0x703   :  { %6463 = vmatprep.subr.bf16.mxu0 %v7147_v22  ;;  %v2538_v20 = vmax.f32 %v8419_v30, %v2518_v13  ;;  %v2539_v32 = vmax.f32 %v8433_v33, %v2520_v5 }
 0x705   :  { %v5012_v42 = vrot.slane %v2539_v32, 1 }
 0x706   :  { %6464 = vmatpush3.bf16.msra.mxu0 %v7147_v22  ;;  %v2516_v15 = vpop.permute.xlu0 %2515 }
 0x707   :  { %7037 = vmatprep.subr.msk.bf16.mxu0 %vm1916_vm2, %v7148_v53  ;;  %v2537_v29 = vmax.f32 %v8415_v26, %v2516_v15  ;;  %v5008_v53 = vrot.slane %v2535_v16, 1  ;;  %v5028_v23 = vmax.f32 %v2539_v32, %v5012_v42 }
 0x709   :  { %v5010_v48 = vrot.slane %v2537_v29, 1  ;;  %v5024_v27 = vmax.f32 %v2535_v16, %v5008_v53 }
 0x70a   :  { %6466 = vmatpush3.bf16.msra.mxu0 %v4748_v2  ;;  %v2522_v22 = vpop.permute.xlu0 %2521  ;;  %v2536_v2 = vmax.f32 %v8421_v50, %v2514_v44 }
 0x70b   :  { %6475 = vmatprep.subr.bf16.mxu0 %v7149_v31  ;;  %v5026_v37 = vmax.f32 %v2537_v29, %v5010_v48  ;;  %v2540_v9 = vmax.f32 %v8437_v4, %v2522_v22 }
 0x70d   :  { %6468 = vmatmul.mubr.msk.bf16.vlgmr.msra.gmra.mrb[48].mxu0 %vm1674_vm4, %v4696_v57  ;;  %v5040_v50 = vadd.f32 %v9141_v28, %v5026_v37  ;;  %v5013_v4 = vrot.slane %v2540_v9, 1 }
 0x70e   :  { %6471 = vmatprep.mubr.msk.bf16.mxu0 %vm1674_vm4, %v4697_v41  ;;  %6476 = vmatpush3.bf16.msra.mxu0 %v7149_v31  ;;  %v5011_v31 = vrot.slane %v2538_v20, 1 }
 0x70f   :  { %6477 = vmatprep.subr.bf16.mxu0 %v7150_v39  ;;  %v5029_v59 = vmax.f32 %v2540_v9, %v5013_v4 }
 0x710   :  { %v5027_v41 = vmax.f32 %v2538_v20, %v5011_v31 }
 0x712   :  { %6478 = vmatpush3.bf16.msra.mxu0 %v7150_v39  ;;  %v5009_v39 = vrot.slane %v2536_v2, 1 }
 0x713   :  { %6479 = vmatprep.subr.bf16.mxu0 %v7151_v43 }
 0x715   :  { %6472 = vmatmul.mubr.msk.bf16.gmra.mrb[52].mxu0 %vm1674_vm4, %v4698_v55 }
 0x716   :  { %6480 = vmatpush3.bf16.msra.mxu0 %v7151_v43  ;;  %6485 = vmatprep.mubr.msk.bf16.mxu0 %vm1674_vm4, %v4831_v49  ;;  %v5025_v49 = vmax.f32 %v2536_v2, %v5009_v39 }
 0x717   :  { %6481 = vmatprep.subr.bf16.mxu0 %v7152_v47 }
 0x71a   :  { %6482 = vmatpush3.bf16.msra.mxu0 %v7152_v47  ;;  %v5038_v47 = vadd.f32 %v9141_v28, %v5024_v27  ;;  %v9164_v27 = vadd.f32 %v9141_v28, %v5029_v59 }
 0x71b   :  { %7038 = vmatprep.subr.msk.bf16.mxu0 %vm1916_vm2, %v7153_v54  ;;  %v5041_v54 = vadd.f32 %v9141_v28, %v5027_v41 }
 0x71c   :  { %v5046_v12 = vmax.f32 %v5038_v47, 0.0 }
 0x71e   :  { %6484 = vmatpush3.bf16.msra.mxu0 %v4884_v51 }
 0x71f   :  { %6493 = vmatprep.subr.bf16.mxu0 %v7194_v19 }
 0x721   :  { %6486 = vmatmul.mubr.msk.bf16.vlgmr.msra.gmra.mrb[48].mxu0 %vm1674_vm4, %v4832_v10 }
 0x722   :  { %6489 = vmatprep.mubr.msk.bf16.mxu0 %vm1674_vm4, %v4833_v38  ;;  %6494 = vmatpush3.bf16.msra.mxu0 %v7158_v34  ;;  %v5048_v38 = vmax.f32 %v5040_v50, 0.0 }
 0x723   :  { %6495 = vmatprep.subr.bf16.mxu0 %v7194_v19 }
 0x726   :  { %6496 = vmatpush3.bf16.msra.mxu0 %v7159_v7 }
 0x727   :  { %6497 = vmatprep.subr.bf16.mxu0 %v7194_v19 }
 0x729   :  { %6490 = vmatmul.mubr.msk.bf16.gmra.mrb[52].mxu0 %vm1674_vm4, %v4834_v17 }
 0x72a   :  { %6498 = vmatpush3.bf16.msra.mxu0 %v7160_v6  ;;  %6501 = vmatprep.mubr.msk.bf16.mxu0 %vm7195_vm6, %v7194_v19 }
 0x72b   :  { %6499 = vmatprep.subr.bf16.mxu0 %v7194_v19 }
 0x72e   :  { %6500 = vmatpush3.bf16.msra.mxu0 %v7161_v11  ;;  %v9155_v11 = vadd.f32 %v9141_v28, %v5028_v23 }
 0x72f   :  { %6517 = vmatprep.subr.bf16.mxu0 %v7194_v19 }
 0x7f4   :  { %v6487_v45 = vpop.f32.mrb[48].mxu0 }
 0x7f5   :  { %4971 = vrot.lane.b32.xlu0 %v6487_v45, %s7193_s26  ;;  %v9080_v8 = vpop.f32.mrb[49].mxu0 }
 0x7f6   :  { %v6488_v62 = vpop.f32.mrb[50].mxu0 }
 0x7f7   :  { %4973 = vrot.lane.b32.xlu1 %v6488_v62, %s7193_s26  ;;  %v9083_v0 = vpop.f32.mrb[51].mxu0 }
 0x7f9   :  { %4967 = vrot.lane.b32.xlu0 %v9080_v8, %s7193_s26 }
 0x7fb   :  { %4969 = vrot.lane.b32.xlu1 %v9083_v0, %s7193_s26 }
 0x7fc   :  { %v9089_v60 = vpop.f32.mrb[52].mxu0 }
 0x7fd   :  { %2523 = vrot.lane.b32.xlu0 %v8431_v36, %s7193_s26  ;;  %v9093_v3 = vpop.f32.mrb[53].mxu0 }
 0x7fe   :  { %v9095_v40 = vpop.f32.mrb[54].mxu0 }
 0x7ff   :  { %4979 = vrot.lane.b32.xlu1 %v9089_v60, %s7193_s26  ;;  %v9099_v14 = vpop.f32.mrb[55].mxu0 }
 0x801   :  { %2525 = vrot.lane.b32.xlu0 %v8435_v21, %s7193_s26 }
 0x803   :  { %4975 = vrot.lane.b32.xlu1 %v9093_v3, %s7193_s26 }
 0x807   :  { %4977 = vrot.lane.b32.xlu1 %v9099_v14, %s7193_s26 }
 0x80b   :  { %4981 = vrot.lane.b32.xlu1 %v9095_v40, %s7193_s26 }
 0x867   :  { %v4972_v63 = vpop.permute.xlu0 %4971 }
 0x868   :  { %v4993_v57 = vmax.f32 %v6487_v45, %v4972_v63  ;;  %v5039_v45 = vadd.f32 %v9141_v28, %v5025_v49 }
 0x869   :  { %v4974_v26 = vpop.permute.xlu1 %4973 }
 0x86a   :  { %v5064_v30 = vrot.slane %v4993_v57, 1  ;;  %v4994_v43 = vmax.f32 %v6488_v62, %v4974_v26  ;;  %v5047_v63 = vmax.f32 %v5039_v45, 0.0 }
 0x86b   :  { %v4968_v33 = vpop.permute.xlu0 %4967 }
 0x86c   :  { %v5080_v35 = vmax.f32 %v4993_v57, %v5064_v30  ;;  %v5065_v55 = vrot.slane %v4994_v43, 1  ;;  %v4991_v18 = vmax.f32 %v9080_v8, %v4968_v33  ;;  %v5049_v8 = vmax.f32 %v5041_v54, 0.0 }
 0x86d   :  { %v4970_v51 = vpop.permute.xlu1 %4969  ;;  %v5050_v57 = vmax.f32 %v9155_v11, 0.0 }
 0x86e   :  { %v5088_v24 = vadd.f32 %v9141_v28, %v5080_v35  ;;  %v5081_v46 = vmax.f32 %v4994_v43, %v5065_v55  ;;  %v5062_v52 = vrot.slane %v4991_v18, 1  ;;  %v4992_v10 = vmax.f32 %v9083_v0, %v4970_v51 }
 0x86f   :  { %v2524_v56 = vpop.permute.xlu0 %2523 }
 0x870   :  { %v5096_v58 = vmax.f32 %v5088_v24, 0.0  ;;  %v5089_v17 = vadd.f32 %v9141_v28, %v5081_v46  ;;  %v5078_v25 = vmax.f32 %v4991_v18, %v5062_v52  ;;  %v5063_v1 = vrot.slane %v4992_v10, 1 }
 0x871   :  { %v2541_v62 = vmax.f32 %v8431_v36, %v2524_v56  ;;  %v4980_v34 = vpop.permute.xlu1 %4979 }
 0x872   :  { %v5104_v7 = vadd.f32 %v5096_v58, %v5048_v38  ;;  %v5097_v6 = vmax.f32 %v5089_v17, 0.0  ;;  %v5086_v0 = vadd.f32 %v9141_v28, %v5078_v25  ;;  %v5079_v61 = vmax.f32 %v4992_v10, %v5063_v1 }
 0x873   :  { %v5014_v13 = vrot.slane %v2541_v62, 1  ;;  %v4997_v15 = vmax.f32 %v9089_v60, %v4980_v34  ;;  %v2526_v44 = vpop.permute.xlu0 %2525 }
 0x874   :  { %v5112_v29 = vpack.c.bf16 %v5104_v7, %v5104_v7  ;;  %v5105_v16 = vadd.f32 %v5097_v6, %v5049_v8  ;;  %v5094_v20 = vmax.f32 %v5086_v0, 0.0  ;;  %v5087_v48 = vadd.f32 %v9141_v28, %v5079_v61 }
 0x875   :  { %v5030_v36 = vmax.f32 %v2541_v62, %v5014_v13  ;;  %v5068_v22 = vrot.slane %v4997_v15, 1  ;;  %v9160_v5 = vmax.f32 %v8435_v21, %v2526_v44  ;;  %v4976_v53 = vpop.permute.xlu1 %4975 }
 0x876   :  { %v5145_v2 = vunpack.c.l.b16 %v5112_v29  ;;  %v5113_v31 = vpack.c.bf16 %v5105_v16, %v5105_v16  ;;  %v5102_v32 = vadd.f32 %v5094_v20, %v5046_v12  ;;  %v5095_v37 = vmax.f32 %v5087_v48, 0.0 }
 0x877   :  { %v5084_v60 = vmax.f32 %v4997_v15, %v5068_v22  ;;  %v5044_v39 = vadd.f32 %v9141_v28, %v5030_v36  ;;  %v4995_v41 = vmax.f32 %v9093_v3, %v4976_v53  ;;  %v5015_v9 = vrot.slane %v9160_v5, 1 }
 0x878   :  { %v5146_v26 = vunpack.c.l.b16 %v5113_v31  ;;  %v5110_v21 = vpack.c.bf16 %v5102_v32, %v5102_v32  ;;  %v5103_v30 = vadd.f32 %v5095_v37, %v5047_v63  ;;  %v5243_v50 = vrot.slane %v5145_v2, 6 }
 0x879   :  { %v5092_v43 = vadd.f32 %v9141_v28, %v5084_v60  ;;  %v4978_v42 = vpop.permute.xlu1 %4977  ;;  %v5335_v33 = vrot.slane %v5145_v2, 2  ;;  %v5427_v47 = vrot.slane %v5145_v2, 4  ;;  %v5052_v49 = vmax.f32 %v5044_v39, 0.0 }
 0x87a   :  { %v5143_v35 = vunpack.c.l.b16 %v5110_v21  ;;  %v5111_v55 = vpack.c.bf16 %v5103_v30, %v5103_v30  ;;  %v5066_v54 = vrot.slane %v4995_v41, 1  ;;  %v4996_v3 = vmax.f32 %v9099_v14, %v4978_v42 }
 0x87b   :  { %v5100_v18 = vmax.f32 %v5092_v43, 0.0  ;;  %v5157_v51 = vrot.slane %v5146_v26, 7  ;;  %v5245_v1 = vrot.slane %v5146_v26, 5  ;;  %v5337_v12 = vrot.slane %v5146_v26, 1 }
 0x87c   :  { %v5151_v24 = vrot.slane %v5143_v35, 2  ;;  %v5332_v46 = vrot.slane %v5143_v35, 4  ;;  %v5144_v52 = vunpack.c.l.b16 %v5111_v55  ;;  %v5424_v10 = vrot.slane %v5143_v35, 6 }
 0x87d   :  { %v5108_v23 = vadd.f32 %v5100_v18, %v5052_v49  ;;  %v5082_v38 = vmax.f32 %v4995_v41, %v5066_v54  ;;  %v5067_v4 = vrot.slane %v4996_v3, 1  ;;  %v5429_v6 = vrot.slane %v5146_v26, 3  ;;  %v4982_v59 = vpop.permute.xlu1 %4981 }
 0x87e   :  { %v5152_v56 = vrot.slane %v5144_v52, 1  ;;  %v5241_v58 = vrot.slane %v5144_v52, 7  ;;  %v5333_v17 = vrot.slane %v5144_v52, 3  ;;  %v5425_v25 = vrot.slane %v5144_v52, 5 }
 0x87f   :  { %v5090_v45 = vadd.f32 %v9141_v28, %v5082_v38  ;;  %v5083_v8 = vmax.f32 %v4996_v3, %v5067_v4  ;;  %v4998_v36 = vmax.f32 %v9095_v40, %v4982_v59  ;;  %v5031_v53 = vmax.f32 %v9160_v5, %v5015_v9  ;;  %v7164_v59 = vld [vmem:[%s9317_s6 + $0x48] sm:$0xff]  }
 0x880   :  { %v5154_v62 = vsel %vm5153_vm7, %v5152_v56, %v5151_v24  ;;  %v5242_v14 = vsel %vm5153_vm7, %v5241_v58, %v5143_v35  ;;  %v5334_v34 = vsel %vm5153_vm7, %v5333_v17, %v5332_v46  ;;  %v5426_v7 = vsel %vm5153_vm7, %v5425_v25, %v5424_v10 }
 0x881   :  { %v5156_v0 = vsel %vm5155_vm8, %v5145_v2, %v5154_v62  ;;  %v5244_v61 = vsel %vm5155_vm8, %v5243_v50, %v5242_v14  ;;  %v5428_v11 = vsel %vm5155_vm8, %v5427_v47, %v5426_v7  ;;  %v5336_v44 = vsel %vm5155_vm8, %v5335_v33, %v5334_v34  ;;  %v7162_v34 = vld [vmem:[%s9317_s6 + $0x40] sm:$0xff]  }
 0x882   :  { %v5159_v13 = vsel %vm5158_vm9, %v5157_v51, %v5156_v0  ;;  %v5246_v15 = vsel %vm5158_vm9, %v5245_v1, %v5244_v61  ;;  %v5098_v29 = vmax.f32 %v5090_v45, 0.0  ;;  %v5338_v16 = vsel %vm5158_vm9, %v5337_v12, %v5336_v44  ;;  %v7163_v7 = vld [vmem:[%s9317_s6 + $0x60] sm:$0xff]   ;;  %v7167_v44 = vld [vmem:[%s9317_s6 + $0x70] sm:$0xff]  }
 0x883   :  { %v5091_v48 = vadd.f32 %v9141_v28, %v5083_v8  ;;  %v5430_v22 = vsel %vm5158_vm9, %v5429_v6, %v5428_v11  ;;  %v5051_v2 = vmax.f32 %v9164_v27, 0.0  ;;  %v5069_v37 = vrot.slane %v4998_v36, 1 }
 0x884   :  { %v5106_v20 = vadd.f32 %v5098_v29, %v5050_v57  ;;  %v5116_v63 = vpack.c.bf16 %v5108_v23, %v5108_v23  ;;  %v5045_v57 = vadd.f32 %v9141_v28, %v5031_v53  ;;  %v7168_v29 = vld [vmem:[%s9317_s6 + $0x58] sm:$0xff]   ;;  %v7172_v53 = vld [vmem:[%s9318_s8 + $0x10] sm:$0xff]  }
 0x885   :  { %v5099_v32 = vmax.f32 %v5091_v48, 0.0  ;;  %v5085_v41 = vmax.f32 %v4998_v36, %v5069_v37  ;;  %v7176_v37 = vld [vmem:[%s9318_s8 + $0x30] sm:$0xff]  }
 0x886   :  { %v5114_v31 = vpack.c.bf16 %v5106_v20, %v5106_v20  ;;  %v5149_v5 = vunpack.c.l.b16 %v5116_v63  ;;  %v5053_v55 = vmax.f32 %v5045_v57, 0.0  ;;  %v7170_v20 = vld [vmem:[%s9318_s8] sm:$0xff]   ;;  %v7177_v63 = vld [vmem:[%s9318_s8 + $0x38] sm:$0xff]  }
 0x887   :  { %v5107_v39 = vadd.f32 %v5099_v32, %v5051_v2  ;;  %v5093_v42 = vadd.f32 %v9141_v28, %v5085_v41  ;;  %v7173_v2 = vld [vmem:[%s9318_s8 + $0x18] sm:$0xff]   ;;  %v7175_v32 = vld [vmem:[%s9318_s8 + $0x28] sm:$0xff]   ;;  %v7180_v41 = vld [vmem:[%s9320_s10 + $0x10] sm:$0xff]  }
 0x888   :  { %v5147_v60 = vunpack.c.l.b16 %v5114_v31  ;;  %v5166_v3 = vrot.slane %v5149_v5, 4  ;;  %v5251_v51 = vrot.slane %v5149_v5, 2  ;;  %v5342_v24 = vrot.slane %v5149_v5, 6  ;;  %v7174_v31 = vld [vmem:[%s9318_s8 + $0x20] sm:$0xff]   ;;  %v7181_v57 = vld [vmem:[%s9320_s10 + $0x18] sm:$0xff]  }
 0x889   :  { %v5115_v43 = vpack.c.bf16 %v5107_v39, %v5107_v39  ;;  %v5101_v35 = vmax.f32 %v5093_v42, 0.0  ;;  %v7179_v39 = vld [vmem:[%s9320_s10 + $0x8] sm:$0xff]  }
 0x88a   :  { %v5160_v26 = vrot.slane %v5147_v60, 6  ;;  %v5247_v21 = vrot.slane %v5147_v60, 4  ;;  %v5339_v30 = vsel %vm5161_vm10, %v5147_v60, %v5338_v16  ;;  %v5431_v40 = vrot.slane %v5147_v60, 2  ;;  %v7169_v16 = vld [vmem:[%s9317_s6 + $0x78] sm:$0xff]   ;;  %v7178_v60 = vld [vmem:[%s9320_s10] sm:$0xff]  }
 0x88b   :  { %v5148_v33 = vunpack.c.l.b16 %v5115_v43  ;;  %v5109_v46 = vadd.f32 %v5101_v35, %v5053_v55 }
 0x88c   :  { %v5162_v50 = vsel %vm5161_vm10, %v5160_v26, %v5159_v13  ;;  %v5248_v27 = vsel %vm5161_vm10, %v5247_v21, %v5246_v15  ;;  %v5432_v9 = vsel %vm5161_vm10, %v5431_v40, %v5430_v22  ;;  %v7165_v13 = vld [vmem:[%s9317_s6 + $0x68] sm:$0xff]   ;;  %v7166_v15 = vld [vmem:[%s9317_s6 + $0x50] sm:$0xff]   ;;  %v7182_v26 = vld [vmem:[%s9320_s10 + $0x20] sm:$0xff]  }
 0x88d   :  { %v5163_v18 = vrot.slane %v5148_v33, 5  ;;  %v5249_v47 = vrot.slane %v5148_v33, 3  ;;  %v5340_v49 = vrot.slane %v5148_v33, 7  ;;  %v5433_v54 = vrot.slane %v5148_v33, 1  ;;  %v7171_v22 = vld [vmem:[%s9318_s8 + $0x8] sm:$0xff]  }
 0x88e   :  { %v5117_v38 = vpack.c.bf16 %v5109_v46, %v5109_v46  ;;  %v7183_v21 = vld [vmem:[%s9320_s10 + $0x28] sm:$0xff]  }
 0x88f   :  { %v5165_v52 = vsel %vm5164_vm11, %v5163_v18, %v5162_v50  ;;  %v5250_v10 = vsel %vm5164_vm11, %v5249_v47, %v5248_v27  ;;  %v5341_v28 = vsel %vm5164_vm11, %v5340_v49, %v5339_v30  ;;  %v5434_v23 = vsel %vm5164_vm11, %v5433_v54, %v5432_v9  ;;  %v6166_v54 = vld [vmem:[%s9321_s7] ss:$0 sm:$0xff] }
 0x890   :  { %v5168_v4 = vsel %vm5167_vm12, %v5166_v3, %v5165_v52  ;;  %v5252_v56 = vsel %vm5167_vm12, %v5251_v51, %v5250_v10  ;;  %v5343_v58 = vsel %vm5167_vm12, %v5342_v24, %v5341_v28  ;;  %v5435_v17 = vsel %vm5167_vm12, %v5149_v5, %v5434_v23 }
 0x891   :  { %v5150_v25 = vunpack.c.l.b16 %v5117_v38  ;;  %v7184_v38 = vld [vmem:[%s9320_s10 + $0x30] sm:$0xff]  }
 0x893   :  { %v5169_v1 = vrot.slane %v5150_v25, 3  ;;  %v5253_v12 = vrot.slane %v5150_v25, 1  ;;  %v5344_v45 = vrot.slane %v5150_v25, 5  ;;  %v5436_v8 = vrot.slane %v5150_v25, 7 }
 0x895   :  { %v5171_v62 = vsel %vm5170_vm13, %v5169_v1, %v5168_v4  ;;  %v5254_v14 = vsel %vm5170_vm13, %v5253_v12, %v5252_v56  ;;  %v5345_v6 = vsel %vm5170_vm13, %v5344_v45, %v5343_v58  ;;  %v5437_v0 = vsel %vm5170_vm13, %v5436_v8, %v5435_v17  ;;  %v7185_v4 = vld [vmem:[%s9320_s10 + $0x38] sm:$0xff]   ;;  %v6167_v56 = vld [vmem:[%s9322_s9] ss:$0 sm:$0xff] }
 0x896   :  { %v5172_v61 = vpack.c.b16 %v5171_v62, %v5171_v62  ;;  %v5255_v11 = vpack.c.b16 %v5254_v14, %v5254_v14  ;;  %v5346_v48 = vpack.c.b16 %v5345_v6, %v5345_v6  ;;  %v5438_v36 = vpack.c.b16 %v5437_v0, %v5437_v0 }
 0x898   :  { %6502 = vmatmul.mubr.msk.bf16.vlgmr.msra.gmra.mrb[56].mxu0 %vm5197_vm14, %v5172_v61  ;;  %6514 = vmatmul.mubr.msk.bf16.vlgmr.msra.gmra.mrb[56].mxu1 %vm5197_vm14, %v5255_v11 }
 0x899   :  { %6518 = vmatpush3.bf16.msra.mxu0 %v7162_v34  ;;  %6530 = vmatpush3.bf16.msra.mxu1 %v7163_v7 }
 0x89a   :  { %6519 = vmatprep.subr.bf16.mxu0 %v7194_v19  ;;  %6531 = vmatprep.subr.bf16.mxu1 %v7194_v19 }
 0x89b   :  { %6525 = vmatprep.mubr.msk.bf16.mxu0 %vm7195_vm6, %v7194_v19  ;;  %6537 = vmatprep.mubr.msk.bf16.mxu1 %vm7195_vm6, %v7194_v19 }
 0x89d   :  { %6520 = vmatpush3.bf16.msra.mxu0 %v7164_v59  ;;  %6532 = vmatpush3.bf16.msra.mxu1 %v7165_v13 }
 0x89e   :  { %6521 = vmatprep.subr.bf16.mxu0 %v7194_v19  ;;  %6533 = vmatprep.subr.bf16.mxu1 %v7194_v19 }
 0x8a1   :  { %6522 = vmatpush3.bf16.msra.mxu0 %v7166_v15  ;;  %6534 = vmatpush3.bf16.msra.mxu1 %v7167_v44 }
 0x8a2   :  { %6523 = vmatprep.subr.bf16.mxu0 %v7194_v19  ;;  %6535 = vmatprep.subr.bf16.mxu1 %v7194_v19 }
 0x8a5   :  { %6524 = vmatpush3.bf16.msra.mxu0 %v7168_v29  ;;  %6536 = vmatpush3.bf16.msra.mxu1 %v7169_v16 }
 0x8a6   :  { %6541 = vmatprep.subr.bf16.mxu0 %v7194_v19  ;;  %6561 = vmatprep.subr.bf16.mxu1 %v7194_v19 }
 0x8a8   :  { %6526 = vmatmul.mubr.msk.bf16.vlgmr.msra.gmra.mrb[60].mxu0 %vm5197_vm14, %v5346_v48  ;;  %6538 = vmatmul.mubr.msk.bf16.vlgmr.msra.gmra.mrb[60].mxu1 %vm5197_vm14, %v5438_v36 }
 0x8a9   :  { %6542 = vmatpush3.bf16.msra.mxu0 %v7170_v20  ;;  %6557 = vmatprep.mubr.msk.bf16.mxu0 %vm7195_vm6, %v7194_v19 }
 0x8aa   :  { %6543 = vmatprep.subr.bf16.mxu0 %v7194_v19  ;;  %6577 = vmatprep.mubr.msk.bf16.mxu1 %vm7195_vm6, %v7194_v19 }
 0x8ab   :  { %6562 = vmatpush3.bf16.msra.mxu1 %v7178_v60 }
 0x8ac   :  { %6563 = vmatprep.subr.bf16.mxu1 %v7194_v19 }
 0x8ad   :  { %6544 = vmatpush3.bf16.msra.mxu0 %v7171_v22 }
 0x8ae   :  { %6545 = vmatprep.subr.bf16.mxu0 %v7194_v19 }
 0x8af   :  { %6564 = vmatpush3.bf16.msra.mxu1 %v7179_v39 }
 0x8b0   :  { %6565 = vmatprep.subr.bf16.mxu1 %v7194_v19 }
 0x8b1   :  { %6546 = vmatpush3.bf16.msra.mxu0 %v7172_v53 }
 0x8b2   :  { %6547 = vmatprep.subr.bf16.mxu0 %v7194_v19 }
 0x8b3   :  { %6566 = vmatpush3.bf16.msra.mxu1 %v7180_v41 }
 0x8b4   :  { %6567 = vmatprep.subr.bf16.mxu1 %v7194_v19 }
 0x8b5   :  { %6548 = vmatpush3.bf16.msra.mxu0 %v7173_v2 }
 0x8b6   :  { %6549 = vmatprep.subr.bf16.mxu0 %v7194_v19 }
 0x8b7   :  { %6568 = vmatpush3.bf16.msra.mxu1 %v7181_v57 }
 0x8b8   :  { %6569 = vmatprep.subr.bf16.mxu1 %v7194_v19 }
 0x8b9   :  { %6550 = vmatpush3.bf16.msra.mxu0 %v7174_v31 }
 0x8ba   :  { %6551 = vmatprep.subr.bf16.mxu0 %v7194_v19 }
 0x8bb   :  { %6570 = vmatpush3.bf16.msra.mxu1 %v7182_v26 }
 0x8bc   :  { %6571 = vmatprep.subr.bf16.mxu1 %v7194_v19 }
 0x8bd   :  { %6552 = vmatpush3.bf16.msra.mxu0 %v7175_v32 }
 0x8be   :  { %6553 = vmatprep.subr.bf16.mxu0 %v7194_v19 }
 0x8bf   :  { %6572 = vmatpush3.bf16.msra.mxu1 %v7183_v21 }
 0x8c0   :  { %6573 = vmatprep.subr.bf16.mxu1 %v7194_v19 }
 0x8c1   :  { %6554 = vmatpush3.bf16.msra.mxu0 %v7176_v37 }
 0x8c2   :  { %6555 = vmatprep.subr.bf16.mxu0 %v7194_v19 }
 0x8c3   :  { %6574 = vmatpush3.bf16.msra.mxu1 %v7184_v38 }
 0x8c4   :  { %6575 = vmatprep.subr.bf16.mxu1 %v7194_v19  ;;  %v6176_v19 = vld [vmem:[%s9323_s11] ss:$0 sm:$0xff] }
 0x8c5   :  { %6556 = vmatpush3.bf16.msra.mxu0 %v7177_v63 }
 0x8c7   :  { %6576 = vmatpush3.bf16.msra.mxu1 %v7185_v4 }
 0x96b   :  { %v5235_v30 = vpop.f32.mrb[56].mxu0  ;;  %v5317_v40 = vpop.f32.mrb[56].mxu1 }
 0x96c   :  { %v5318_v43 = vadd.f32 %v5317_v40, %v5235_v30  ;;  %v6503_v42 = vpop.f32.mrb[57].mxu0  ;;  %v6515_v5 = vpop.f32.mrb[57].mxu1 }
 0x96d   :  { %v5238_v50 = vpop.f32.mrb[58].mxu0  ;;  %v5320_v27 = vpop.f32.mrb[58].mxu1 }
 0x96e   :  { %v6504_v9 = vpop.f32.mrb[59].mxu0  ;;  %v6516_v33 = vpop.f32.mrb[59].mxu1 }
 0x97b   :  { %v5408_v35 = vpop.f32.mrb[60].mxu0  ;;  %v5500_v55 = vpop.f32.mrb[60].mxu1 }
 0x97c   :  { %v5414_v18 = vadd.f32 %v5408_v35, %v5318_v43  ;;  %v6527_v47 = vpop.f32.mrb[61].mxu0  ;;  %v6539_v49 = vpop.f32.mrb[61].mxu1 }
 0x97d   :  { %v5411_v3 = vpop.f32.mrb[62].mxu0  ;;  %v5503_v51 = vpop.f32.mrb[62].mxu1 }
 0x97e   :  { %v5506_v24 = vadd.f32 %v5500_v55, %v5414_v18  ;;  %v6528_v46 = vpop.f32.mrb[63].mxu0  ;;  %v6540_v52 = vpop.f32.mrb[63].mxu1 }
 0x980   :  { %v5514_v10 = vadd.f32 %v6166_v54, %v5506_v24 }
 0x982   :  { %v5515_v28 = vmax.f32 %v5514_v10, 0.0 }
 0x984   :  { %v5516_v23 = vpack.c.bf16 %v5515_v28, %v5515_v28 }
 0x986   :  { %6558 = vmatmul.mubr.bf16.vlgmr.msra.gmra.mrb[64].mxu0 %v5516_v23 }
 0xa59   :  { %v5622_v58 = vpop.f32.mrb[64].mxu0 }
 0xa5a   :  { %v5623_v17 = vadd.f32 %v6167_v56, %v5622_v58  ;;  %v6559_v25 = vpop.f32.mrb[65].mxu0 }
 0xa5b   :  { %v5625_v1 = vpop.f32.mrb[66].mxu0 }
 0xa5c   :  { %v5628_v12 = vmax.f32 %v5623_v17, 0.0  ;;  %v6560_v45 = vpop.f32.mrb[67].mxu0 }
 0xa5e   :  { %v5629_v8 = vpack.c.bf16 %v5628_v12, %v5628_v12 }
 0xa60   :  { %6578 = vmatmul.mubr.bf16.vlgmr.msra.gmra.mrb[64].mxu1 %v5629_v8 }
 0xb33   :  { %v5735_v62 = vpop.f32.mrb[64].mxu1 }
 0xb34   :  { %v5736_v14 = vadd.f32 %v6176_v19, %v5735_v62  ;;  %v6579_v34 = vpop.f32.mrb[65].mxu1 }
 0xb35   :  { %v5738_v7 = vpop.f32.mrb[66].mxu1 }
 0xb36   :  { %5741 = vmax.xlane.f32.xlu0 %v5736_v14  ;;  %v6580_v6 = vpop.f32.mrb[67].mxu1 }
 0xbc3   :  { %v5742_v0 = vpop.xlane.xlu0 %5741 }
 0xbc4   :  { %v5743_v61 = vsub.f32 %v5736_v14, %v5742_v0 }
 0xbc6   :  { %v5744_v11 = vmul.f32 1.442695, %v5743_v61 }
 0xbc8   :  { %7186 = vpow2.f32 %v5744_v11 }
 0xbd2   :  { %v7187_v59 = vpop.eup %7186 }
 0xbd3   :  { %5746 = vadd.xlane.f32.xlu1 %v7187_v59 }
 0xc60   :  { %v5747_v13 = vpop.xlane.xlu1 %5746 }
 0xc61   :  { %7188 = vrcp.f32 %v5747_v13 }
 0xc6b   :  { %v7189_v15 = vpop.eup %7188 }
 0xc6c   :  { %v5749_v44 = vmul.f32 %v7189_v15, %v7187_v59 }
 0xc6e   :  { %5750 = vst [vmem:[%s9324_s12] sm:$0xff] %v5749_v44 }

</bundles_post_ra>
